<compile_context>
chip_gen: v6e
topology: v6e:2x2x1
jax: 0.10.0
libtpu: 0.0.40
codegen_flags: <defaults>
</compile_context>

<pallas_src>
import functools
import math

import jax
import jax.numpy as jnp
import numpy as np
from jax import lax
from jax.experimental import pallas as pl
from jax.experimental.pallas import tpu as pltpu  # noqa: F401


# ----------------------------------------------------------------------------
# small in-kernel helpers
# ----------------------------------------------------------------------------

def _recip(x):
    if hasattr(pl, "reciprocal"):
        return pl.reciprocal(x, approx=True)   # EUP slot, essentially free
    return 1.0 / x


def _layernorm(x, g, b, eps=1e-5):
    mu = jnp.mean(x, axis=-1, keepdims=True)
    xc = x - mu
    var = jnp.mean(xc * xc, axis=-1, keepdims=True)
    return xc * lax.rsqrt(var + eps) * g + b


def _split_plan(nh, dh, T):
    """Plan reproducing the reference's quirky head split z.reshape(nh, dh, T)
    (z row-major, shape (T, nh*dh)) using only static rectangular slices of z
    concatenated along axis 0.  Returns (plans, orders): plans[h] is a list of
    blocks, each block a list of (r0, r1, c0, c1) rects concatenated along
    axis 1; blocks are stacked along axis 0.  orders[h][i] is the original
    feature index d of output row i (rows may be emitted permuted, consistently
    for Q/K; for V the out-projection rows are pre-permuted at init to match)."""
    dH = nh * dh
    plans, orders = [], []
    if dH % T == 0 and T % nh == 0:
        # fast path: m contiguous slabs per head, one concat
        m = dH // T
        rph = T // nh                       # rows of z per head (= dh // m)
        for h in range(nh):
            blocks, order = [], []
            for s in range(m):
                blocks.append([(h * rph, (h + 1) * rph, s * T, (s + 1) * T)])
                order.extend(s + j * m for j in range(rph))
            plans.append(blocks)
            orders.append(order)
    else:
        # general path: one T-long flat segment per output row (may span 2 rows)
        for h in range(nh):
            blocks, order = [], []
            for d in range(dh):
                start = (h * dh + d) * T
                r, c = divmod(start, dH)
                if c + T <= dH:
                    blocks.append([(r, r + 1, c, c + T)])
                else:
                    blocks.append([(r, r + 1, c, dH),
                                   (r + 1, r + 2, 0, c + T - dH)])
                order.append(d)
            plans.append(blocks)
            orders.append(order)
    return plans, orders


def _apply_split(z, plan):
    """Materialize the per-head raw (dh, T) matrices from the plan above."""
    heads = []
    for blocks in plan:
        rows = []
        for rects in blocks:
            parts = [z[r0:r1, c0:c1] for (r0, r1, c0, c1) in rects]
            rows.append(parts[0] if len(parts) == 1
                        else jnp.concatenate(parts, axis=1))
        heads.append(rows[0] if len(rows) == 1
                     else jnp.concatenate(rows, axis=0))
    return heads


def _attention(q_heads, k_heads, v_heads, wo, bo, mask, eye):
    """Multi-head attention over raw (dh, T) head matrices.
    K and V stay un-transposed; Q is transposed on the MXU via an NT dot with
    the identity so every contraction is a plain NN / NT matmul."""
    outs = []
    for qh, kh, vh in zip(q_heads, k_heads, v_heads):
        qt = lax.dot_general(eye, qh, (((1,), (1,)), ((), ())),
                             preferred_element_type=jnp.float32)    # (T, dk)
        s = jnp.dot(qt, kh, preferred_element_type=jnp.float32)     # (T, T)
        if mask is not None:
            s = s + mask
        s = s - jnp.max(s, axis=-1, keepdims=True)
        e = jnp.exp(s)
        p = e * _recip(jnp.sum(e, axis=-1, keepdims=True))          # softmax(keys)
        outs.append(lax.dot_general(p, vh, (((1,), (1,)), ((), ())),
                                    preferred_element_type=jnp.float32))  # (T, dv)
    a = outs[0] if len(outs) == 1 else jnp.concatenate(outs, axis=1)  # (T, dv*H)
    # single merged out-projection (weight rows pre-permuted at init)
    return jnp.dot(a, wo, preferred_element_type=jnp.float32) + bo


def _mha_self(x, wqkv, bqkv, wo, bo, mask, *, plan_k, plan_v, dkH, eye):
    qkv = jnp.dot(x, wqkv, preferred_element_type=jnp.float32) + bqkv
    qh = _apply_split(qkv[:, :dkH], plan_k)
    kh = _apply_split(qkv[:, dkH:2 * dkH], plan_k)
    vh = _apply_split(qkv[:, 2 * dkH:], plan_v)
    return _attention(qh, kh, vh, wo, bo, mask, eye)


def _mha_cross(q_src, v_src, wqk, bqk, wv, bv, wo, bo, *,
               plan_k, plan_v, dkH, eye):
    # reference quirk: MHA2(memory, memory, X) -> Q,K from `q_src`, V from `v_src`
    qk = jnp.dot(q_src, wqk, preferred_element_type=jnp.float32) + bqk
    vv = jnp.dot(v_src, wv, preferred_element_type=jnp.float32) + bv
    qh = _apply_split(qk[:, :dkH], plan_k)
    kh = _apply_split(qk[:, dkH:], plan_k)
    vh = _apply_split(vv, plan_v)
    return _attention(qh, kh, vh, wo, bo, None, eye)


def _encoder_layer(x, w, shared):
    (wqkv, bqkv, wo, bo, g1, b1, w1, c1, w2, c2, g2, b2) = w
    attn = _mha_self(x, wqkv, bqkv, wo, bo, None, **shared)
    x1 = _layernorm(attn + x, g1, b1)
    h = jnp.maximum(jnp.dot(x1, w1, preferred_element_type=jnp.float32) + c1, 0.0)
    ff = jnp.dot(h, w2, preferred_element_type=jnp.float32) + c2
    # reference quirk: memory = LayerNorm2(ff + dropout(ff)) == LN2(ff + ff)
    return _layernorm(ff + ff, g2, b2)


def _decoder_layer(mem, x, w, mask, shared):
    (wqkv1, bqkv1, wo1, bo1, g1, b1,
     wqk2, bqk2, wv2, bv2, wo2, bo2, g2, b2,
     w1, c1, w2, c2, g3, b3) = w
    a1 = _mha_self(x, wqkv1, bqkv1, wo1, bo1, mask, **shared)
    x1 = _layernorm(a1 + x, g1, b1)
    a2 = _mha_cross(mem, x1, wqk2, bqk2, wv2, bv2, wo2, bo2, **shared)
    x2 = _layernorm(a2 + x1, g2, b2)
    h = jnp.maximum(jnp.dot(x2, w1, preferred_element_type=jnp.float32) + c1, 0.0)
    ff = jnp.dot(h, w2, preferred_element_type=jnp.float32) + c2
    return _layernorm(ff + x2, g3, b3)


# ----------------------------------------------------------------------------
# the single fused whole-forward kernel
# ----------------------------------------------------------------------------

_N_ENC_W = 12
_N_DEC_W = 20


def _transformer_kernel(*refs, nhead, dk, dv, n_enc, n_dec, use_mask):
    it = iter(refs)
    src_ids = next(it)
    tgt_ids = next(it)
    emb_src = next(it)
    emb_tgt = next(it)
    pe_ref = next(it)
    src_pad = next(it)
    tgt_pad = next(it)
    mask_ref = next(it) if use_mask else None
    enc_refs = [[next(it) for _ in range(_N_ENC_W)] for _ in range(n_enc)]
    dec_refs = [[next(it) for _ in range(_N_DEC_W)] for _ in range(n_dec)]
    wout = next(it)
    bout = next(it)
    out_ref = next(it)

    T = pe_ref.shape[0]
    pe = pe_ref[...]
    eye = (lax.broadcasted_iota(jnp.int32, (T, T), 0) ==
           lax.broadcasted_iota(jnp.int32, (T, T), 1)).astype(jnp.float32)
    plan_k, _ = _split_plan(nhead, dk, T)
    plan_v, _ = _split_plan(nhead, dv, T)
    shared = dict(plan_k=plan_k, plan_v=plan_v, dkH=dk * nhead, eye=eye)

    def embed(ids_ref, table_ref, pad_ref):
        # embedding gather as a one-hot matmul (padding_idx rows are zero in the
        # table), fused with positional encoding add and padding-mask multiply
        vocab = table_ref.shape[0]
        pos = lax.broadcasted_iota(jnp.int32, (T, vocab), 1)
        onehot = (ids_ref[...] == pos).astype(jnp.float32)
        x = jnp.dot(onehot, table_ref[...], preferred_element_type=jnp.float32)
        return (x + pe) * pad_ref[...]

    X = embed(src_ids, emb_src, src_pad)
    Temb = embed(tgt_ids, emb_tgt, tgt_pad)
    mask = mask_ref[...] if use_mask else None

    memory = X
    for lr in enc_refs:                       # encoder gets no mask (reference)
        memory = _encoder_layer(memory, [r[...] for r in lr], shared)

    # reference quirk: Transformer calls decoder(tgt_emb, memory, tgt_mask) so
    # the running state starts from the encoder output and the embedded tgt
    # plays the "memory" (Q/K source of cross-attn); tgt_mask gates only MHA1.
    state = memory
    for lr in dec_refs:
        state = _decoder_layer(Temb, state, [r[...] for r in lr], mask, shared)

    # lane-dense (vocab padded to 128) final projection store
    out_ref[...] = jnp.dot(state, wout[...],
                           preferred_element_type=jnp.float32) + bout[...]


# ----------------------------------------------------------------------------
# python wrapper
# ----------------------------------------------------------------------------

_ENC_KEYS = ("wqkv", "bqkv", "wo", "bo", "ln1_g", "ln1_b",
             "ff_w1", "ff_b1", "ff_w2", "ff_b2", "ln2_g", "ln2_b")
_DEC_KEYS = ("wqkv1", "bqkv1", "wo1", "bo1", "ln1_g", "ln1_b",
             "wqk2", "bqk2", "wv2", "bv2", "wo2", "bo2", "ln2_g", "ln2_b",
             "ff_w1", "ff_b1", "ff_w2", "ff_b2", "ln3_g", "ln3_b")


def build_forward(cfg):
    nhead, dk, dv = cfg["nhead"], cfg["dk"], cfg["dv"]
    n_layers = cfg["num_layers"]
    tgt_vocab = cfg["tgt_vocab_size"]

    def forward(params, src, tgt, src_padding_mask, tgt_padding_mask,
                tgt_mask=None):
        T = params["pos_enc"].shape[0]
        use_mask = tgt_mask is not None
        args = [src.reshape(T, 1).astype(jnp.int32),
                tgt.reshape(T, 1).astype(jnp.int32),
                params["emb_src"], params["emb_tgt"], params["pos_enc"],
                src_padding_mask, tgt_padding_mask]
        if use_mask:
            args.append(tgt_mask)
        for lp in params["enc_layers"]:
            args += [lp[k] for k in _ENC_KEYS]
        for lp in params["dec_layers"]:
            args += [lp[k] for k in _DEC_KEYS]
        args += [params["Wout"], params["bout"]]

        v_pad = params["Wout"].shape[1]
        kern = functools.partial(_transformer_kernel, nhead=nhead, dk=dk, dv=dv,
                                 n_enc=n_layers, n_dec=n_layers,
                                 use_mask=use_mask)
        out = pl.pallas_call(
            kern,
            out_shape=jax.ShapeDtypeStruct((T, v_pad), jnp.float32),
        )(*args)
        return out[:, :tgt_vocab]            # drop the lane padding

    return forward


# ----------------------------------------------------------------------------
# deterministic parameter init (device layouts built once on the host)
# ----------------------------------------------------------------------------

def make_positional_encoding(T, d_model):
    position = np.arange(T, dtype=np.float32)[:, None]
    div_term = np.exp(np.arange(0, d_model, 2, dtype=np.float32)
                      * (-np.log(10000.0) / d_model))
    pe = np.zeros((T, d_model), dtype=np.float32)
    pe[:, 0::2] = np.sin(position * div_term)
    pe[:, 1::2] = np.cos(position * div_term)
    return jnp.asarray(pe)


def _init_linear_raw(key, d_out, d_in):
    kw, kb = jax.random.split(key)
    bound = 1.0 / math.sqrt(d_in)
    w = jax.random.uniform(kw, (d_out, d_in), jnp.float32, -bound, bound)
    b = jax.random.uniform(kb, (d_out,), jnp.float32, -bound, bound)
    return w, b                               # PyTorch nn.Linear layout


def _vcol_perm(nh, dv, T):
    _, orders = _split_plan(nh, dv, T)
    return np.asarray([h * dv + d for h in range(nh) for d in orders[h]])


def init_mha(key, d_model, dk, dv, nhead, T):
    ks = jax.random.split(key, 4)
    wq, bq = _init_linear_raw(ks[0], dk * nhead, d_model)
    wk, bk = _init_linear_raw(ks[1], dk * nhead, d_model)
    wv, bv = _init_linear_raw(ks[2], dv * nhead, d_model)
    wo, bo = _init_linear_raw(ks[3], d_model, dv * nhead)
    inv = 1.0 / math.sqrt(dk)                 # attention scale folded into Wq
    wqk = jnp.concatenate([wq.T * inv, wk.T], axis=1)          # (d_model, 2dkH)
    bqk = jnp.concatenate([bq * inv, bk]).reshape(1, -1)
    wv_t, bv_r = wv.T, bv.reshape(1, -1)
    perm = _vcol_perm(nhead, dv, T)           # match kernel's per-head V row order
    return dict(
        wqkv=jnp.concatenate([wqk, wv_t], axis=1),             # fused QKV weight
        bqkv=jnp.concatenate([bqk, bv_r], axis=1),
        wqk=wqk, bqk=bqk, wv=wv_t, bv=bv_r,                    # split (cross-attn)
        wo=wo.T[perm, :],                                      # (dv*H, d_model)
        bo=bo.reshape(1, -1))


def _init_ffn(key, d_model, d_ff):
    k1, k2 = jax.random.split(key)
    w1, b1 = _init_linear_raw(k1, d_ff, d_model)
    w2, b2 = _init_linear_raw(k2, d_model, d_ff)
    return w1.T, b1.reshape(1, -1), w2.T, b2.reshape(1, -1)


def init_encoder_layer(key, d_model, d_ff, dk, dv, nhead, T):
    km, kf = jax.random.split(key)
    mha = init_mha(km, d_model, dk, dv, nhead, T)
    w1, b1, w2, b2 = _init_ffn(kf, d_model, d_ff)
    ones = jnp.ones((1, d_model), jnp.float32)
    zeros = jnp.zeros((1, d_model), jnp.float32)
    return dict(wqkv=mha["wqkv"], bqkv=mha["bqkv"], wo=mha["wo"], bo=mha["bo"],
                ln1_g=ones, ln1_b=zeros, ln2_g=ones, ln2_b=zeros,
                ff_w1=w1, ff_b1=b1, ff_w2=w2, ff_b2=b2)


def init_decoder_layer(key, d_model, d_ff, dk, dv, nhead, T):
    k1, k2, kf = jax.random.split(key, 3)
    m1 = init_mha(k1, d_model, dk, dv, nhead, T)
    m2 = init_mha(k2, d_model, dk, dv, nhead, T)
    w1, b1, w2, b2 = _init_ffn(kf, d_model, d_ff)
    ones = jnp.ones((1, d_model), jnp.float32)
    zeros = jnp.zeros((1, d_model), jnp.float32)
    return dict(wqkv1=m1["wqkv"], bqkv1=m1["bqkv"], wo1=m1["wo"], bo1=m1["bo"],
                ln1_g=ones, ln1_b=zeros,
                wqk2=m2["wqk"], bqk2=m2["bqk"], wv2=m2["wv"], bv2=m2["bv"],
                wo2=m2["wo"], bo2=m2["bo"],
                ln2_g=ones, ln2_b=zeros,
                ff_w1=w1, ff_b1=b1, ff_w2=w2, ff_b2=b2,
                ln3_g=ones, ln3_b=zeros)


def init_transformer(key, *, T, d_model, nhead, d_ff, num_layers, dk, dv,
                     src_vocab_size, tgt_vocab_size,
                     src_padding_idx, tgt_padding_idx):
    keys = jax.random.split(key, 3 + 2 * num_layers)
    emb_src = jax.random.normal(keys[0], (src_vocab_size, d_model), jnp.float32)
    emb_tgt = jax.random.normal(keys[1], (tgt_vocab_size, d_model), jnp.float32)
    emb_src = emb_src.at[src_padding_idx].set(0.0)   # padding_idx rows are zero
    emb_tgt = emb_tgt.at[tgt_padding_idx].set(0.0)

    wout, bout = _init_linear_raw(keys[2], tgt_vocab_size, d_model)
    v_pad = ((tgt_vocab_size + 127) // 128) * 128    # lane-dense output store
    Wout = jnp.zeros((d_model, v_pad), jnp.float32).at[:, :tgt_vocab_size].set(wout.T)
    bout_p = jnp.zeros((1, v_pad), jnp.float32).at[0, :tgt_vocab_size].set(bout)

    enc_layers = [init_encoder_layer(keys[3 + i], d_model, d_ff, dk, dv, nhead, T)
                  for i in range(num_layers)]
    dec_layers = [init_decoder_layer(keys[3 + num_layers + i], d_model, d_ff,
                                     dk, dv, nhead, T)
                  for i in range(num_layers)]
    return dict(emb_src=emb_src, emb_tgt=emb_tgt,
                pos_enc=make_positional_encoding(T, d_model),
                Wout=Wout, bout=bout_p,
                enc_layers=enc_layers, dec_layers=dec_layers)


# ----------------------------------------------------------------------------
if __name__ == "__main__":
    T, d_model, nhead = 8, 32, 2
    d_ff, num_layers = 64, 2
    dk, dv = 8, 16
    src_vocab, tgt_vocab = 50, 60

    key = jax.random.PRNGKey(0)
    kp, ks, kt = jax.random.split(key, 3)

    cfg = dict(T=T, d_model=d_model, nhead=nhead, d_ff=d_ff,
               num_layers=num_layers, dk=dk, dv=dv,
               src_vocab_size=src_vocab, tgt_vocab_size=tgt_vocab)

    params = init_transformer(
        kp, T=T, d_model=d_model, nhead=nhead, d_ff=d_ff,
        num_layers=num_layers, dk=dk, dv=dv,
        src_vocab_size=src_vocab, tgt_vocab_size=tgt_vocab,
        src_padding_idx=0, tgt_padding_idx=0)

    src = jax.random.randint(ks, (T,), 1, src_vocab)
    tgt = jax.random.randint(kt, (T,), 1, tgt_vocab)
    # padding masks multiply the embeddings; (T,1) broadcasts over d_model
    src_padding_mask = jnp.ones((T, 1), jnp.float32)
    tgt_padding_mask = jnp.ones((T, 1), jnp.float32).at[T - 1, 0].set(0.0)

    fwd = jax.jit(build_forward(cfg))
    out = fwd(params, src, tgt, src_padding_mask, tgt_padding_mask)
    out = jax.block_until_ready(out)
    assert out.shape == (T, tgt_vocab) and bool(jnp.all(jnp.isfinite(out)))
    print("KERNEL_OK")
</pallas_src>

<mosaic_0001>
module attributes {stable_mosaic.version = 11 : i64} {
  func.func @_transformer_kernel(%arg0: memref<8x1xi32, #tpu.memory_space<vmem>>, %arg1: memref<8x1xi32, #tpu.memory_space<vmem>>, %arg2: memref<50x32xf32, #tpu.memory_space<vmem>>, %arg3: memref<60x32xf32, #tpu.memory_space<vmem>>, %arg4: memref<8x32xf32, #tpu.memory_space<vmem>>, %arg5: memref<8x1xf32, #tpu.memory_space<vmem>>, %arg6: memref<8x1xf32, #tpu.memory_space<vmem>>, %arg7: memref<32x64xf32, #tpu.memory_space<vmem>>, %arg8: memref<1x64xf32, #tpu.memory_space<vmem>>, %arg9: memref<32x32xf32, #tpu.memory_space<vmem>>, %arg10: memref<1x32xf32, #tpu.memory_space<vmem>>, %arg11: memref<1x32xf32, #tpu.memory_space<vmem>>, %arg12: memref<1x32xf32, #tpu.memory_space<vmem>>, %arg13: memref<32x64xf32, #tpu.memory_space<vmem>>, %arg14: memref<1x64xf32, #tpu.memory_space<vmem>>, %arg15: memref<64x32xf32, #tpu.memory_space<vmem>>, %arg16: memref<1x32xf32, #tpu.memory_space<vmem>>, %arg17: memref<1x32xf32, #tpu.memory_space<vmem>>, %arg18: memref<1x32xf32, #tpu.memory_space<vmem>>, %arg19: memref<32x64xf32, #tpu.memory_space<vmem>>, %arg20: memref<1x64xf32, #tpu.memory_space<vmem>>, %arg21: memref<32x32xf32, #tpu.memory_space<vmem>>, %arg22: memref<1x32xf32, #tpu.memory_space<vmem>>, %arg23: memref<1x32xf32, #tpu.memory_space<vmem>>, %arg24: memref<1x32xf32, #tpu.memory_space<vmem>>, %arg25: memref<32x64xf32, #tpu.memory_space<vmem>>, %arg26: memref<1x64xf32, #tpu.memory_space<vmem>>, %arg27: memref<64x32xf32, #tpu.memory_space<vmem>>, %arg28: memref<1x32xf32, #tpu.memory_space<vmem>>, %arg29: memref<1x32xf32, #tpu.memory_space<vmem>>, %arg30: memref<1x32xf32, #tpu.memory_space<vmem>>, %arg31: memref<32x64xf32, #tpu.memory_space<vmem>>, %arg32: memref<1x64xf32, #tpu.memory_space<vmem>>, %arg33: memref<32x32xf32, #tpu.memory_space<vmem>>, %arg34: memref<1x32xf32, #tpu.memory_space<vmem>>, %arg35: memref<1x32xf32, #tpu.memory_space<vmem>>, %arg36: memref<1x32xf32, #tpu.memory_space<vmem>>, %arg37: memref<32x32xf32, #tpu.memory_space<vmem>>, %arg38: memref<1x32xf32, #tpu.memory_space<vmem>>, %arg39: memref<32x32xf32, #tpu.memory_space<vmem>>, %arg40: memref<1x32xf32, #tpu.memory_space<vmem>>, %arg41: memref<32x32xf32, #tpu.memory_space<vmem>>, %arg42: memref<1x32xf32, #tpu.memory_space<vmem>>, %arg43: memref<1x32xf32, #tpu.memory_space<vmem>>, %arg44: memref<1x32xf32, #tpu.memory_space<vmem>>, %arg45: memref<32x64xf32, #tpu.memory_space<vmem>>, %arg46: memref<1x64xf32, #tpu.memory_space<vmem>>, %arg47: memref<64x32xf32, #tpu.memory_space<vmem>>, %arg48: memref<1x32xf32, #tpu.memory_space<vmem>>, %arg49: memref<1x32xf32, #tpu.memory_space<vmem>>, %arg50: memref<1x32xf32, #tpu.memory_space<vmem>>, %arg51: memref<32x64xf32, #tpu.memory_space<vmem>>, %arg52: memref<1x64xf32, #tpu.memory_space<vmem>>, %arg53: memref<32x32xf32, #tpu.memory_space<vmem>>, %arg54: memref<1x32xf32, #tpu.memory_space<vmem>>, %arg55: memref<1x32xf32, #tpu.memory_space<vmem>>, %arg56: memref<1x32xf32, #tpu.memory_space<vmem>>, %arg57: memref<32x32xf32, #tpu.memory_space<vmem>>, %arg58: memref<1x32xf32, #tpu.memory_space<vmem>>, %arg59: memref<32x32xf32, #tpu.memory_space<vmem>>, %arg60: memref<1x32xf32, #tpu.memory_space<vmem>>, %arg61: memref<32x32xf32, #tpu.memory_space<vmem>>, %arg62: memref<1x32xf32, #tpu.memory_space<vmem>>, %arg63: memref<1x32xf32, #tpu.memory_space<vmem>>, %arg64: memref<1x32xf32, #tpu.memory_space<vmem>>, %arg65: memref<32x64xf32, #tpu.memory_space<vmem>>, %arg66: memref<1x64xf32, #tpu.memory_space<vmem>>, %arg67: memref<64x32xf32, #tpu.memory_space<vmem>>, %arg68: memref<1x32xf32, #tpu.memory_space<vmem>>, %arg69: memref<1x32xf32, #tpu.memory_space<vmem>>, %arg70: memref<1x32xf32, #tpu.memory_space<vmem>>, %arg71: memref<32x128xf32, #tpu.memory_space<vmem>>, %arg72: memref<1x128xf32, #tpu.memory_space<vmem>>, %arg73: memref<8x128xf32, #tpu.memory_space<vmem>>) attributes {dimension_semantics = [], scalar_prefetch = 0 : i64, scratch_operands = 0 : i64, tpu.core_type = #tpu.core_type<tc>} {
    %c0 = arith.constant 0 : index
    %c0_0 = arith.constant 0 : index
    %0 = vector.load %arg4[%c0, %c0_0] : memref<8x32xf32, #tpu.memory_space<vmem>>, vector<8x32xf32>
    %1 = tpu.iota {dimensions = array<i32: 0>} : vector<8x8xi32>
    %2 = tpu.iota {dimensions = array<i32: 1>} : vector<8x8xi32>
    %3 = arith.cmpi eq, %1, %2 : vector<8x8xi32>
    %4 = arith.extui %3 : vector<8x8xi1> to vector<8x8xi32>
    %5 = arith.sitofp %4 : vector<8x8xi32> to vector<8x8xf32>
    %6 = tpu.iota {dimensions = array<i32: 1>} : vector<8x50xi32>
    %c0_1 = arith.constant 0 : index
    %c0_2 = arith.constant 0 : index
    %7 = vector.load %arg0[%c0_1, %c0_2] : memref<8x1xi32, #tpu.memory_space<vmem>>, vector<8x1xi32>
    %8 = vector.broadcast %7 : vector<8x1xi32> to vector<8x50xi32>
    %9 = arith.cmpi eq, %8, %6 : vector<8x50xi32>
    %10 = arith.extui %9 : vector<8x50xi1> to vector<8x50xi32>
    %11 = arith.sitofp %10 : vector<8x50xi32> to vector<8x50xf32>
    %c0_3 = arith.constant 0 : index
    %c0_4 = arith.constant 0 : index
    %12 = vector.load %arg2[%c0_3, %c0_4] : memref<50x32xf32, #tpu.memory_space<vmem>>, vector<50x32xf32>
    %cst = arith.constant dense<0.000000e+00> : vector<8x32xf32>
    %13 = tpu.matmul %11, %12, %cst {dimension_numbers = #tpu.dot_dimension_numbers<[1], [0], [0], [1], [0, 0, 1, 1], [], []>} : vector<8x50xf32>, vector<50x32xf32>, vector<8x32xf32> -> vector<8x32xf32>
    %14 = arith.addf %13, %0 : vector<8x32xf32>
    %c0_5 = arith.constant 0 : index
    %c0_6 = arith.constant 0 : index
    %15 = vector.load %arg5[%c0_5, %c0_6] : memref<8x1xf32, #tpu.memory_space<vmem>>, vector<8x1xf32>
    %16 = vector.broadcast %15 : vector<8x1xf32> to vector<8x32xf32>
    %17 = arith.mulf %14, %16 : vector<8x32xf32>
    %18 = tpu.iota {dimensions = array<i32: 1>} : vector<8x60xi32>
    %c0_7 = arith.constant 0 : index
    %c0_8 = arith.constant 0 : index
    %19 = vector.load %arg1[%c0_7, %c0_8] : memref<8x1xi32, #tpu.memory_space<vmem>>, vector<8x1xi32>
    %20 = vector.broadcast %19 : vector<8x1xi32> to vector<8x60xi32>
    %21 = arith.cmpi eq, %20, %18 : vector<8x60xi32>
    %22 = arith.extui %21 : vector<8x60xi1> to vector<8x60xi32>
    %23 = arith.sitofp %22 : vector<8x60xi32> to vector<8x60xf32>
    %c0_9 = arith.constant 0 : index
    %c0_10 = arith.constant 0 : index
    %24 = vector.load %arg3[%c0_9, %c0_10] : memref<60x32xf32, #tpu.memory_space<vmem>>, vector<60x32xf32>
    %cst_11 = arith.constant dense<0.000000e+00> : vector<8x32xf32>
    %25 = tpu.matmul %23, %24, %cst_11 {dimension_numbers = #tpu.dot_dimension_numbers<[1], [0], [0], [1], [0, 0, 1, 1], [], []>} : vector<8x60xf32>, vector<60x32xf32>, vector<8x32xf32> -> vector<8x32xf32>
    %26 = arith.addf %25, %0 : vector<8x32xf32>
    %c0_12 = arith.constant 0 : index
    %c0_13 = arith.constant 0 : index
    %27 = vector.load %arg6[%c0_12, %c0_13] : memref<8x1xf32, #tpu.memory_space<vmem>>, vector<8x1xf32>
    %28 = vector.broadcast %27 : vector<8x1xf32> to vector<8x32xf32>
    %29 = arith.mulf %26, %28 : vector<8x32xf32>
    %c0_14 = arith.constant 0 : index
    %c0_15 = arith.constant 0 : index
    %30 = vector.load %arg7[%c0_14, %c0_15] : memref<32x64xf32, #tpu.memory_space<vmem>>, vector<32x64xf32>
    %c0_16 = arith.constant 0 : index
    %c0_17 = arith.constant 0 : index
    %31 = vector.load %arg8[%c0_16, %c0_17] : memref<1x64xf32, #tpu.memory_space<vmem>>, vector<1x64xf32>
    %c0_18 = arith.constant 0 : index
    %c0_19 = arith.constant 0 : index
    %32 = vector.load %arg9[%c0_18, %c0_19] : memref<32x32xf32, #tpu.memory_space<vmem>>, vector<32x32xf32>
    %c0_20 = arith.constant 0 : index
    %c0_21 = arith.constant 0 : index
    %33 = vector.load %arg10[%c0_20, %c0_21] : memref<1x32xf32, #tpu.memory_space<vmem>>, vector<1x32xf32>
    %c0_22 = arith.constant 0 : index
    %c0_23 = arith.constant 0 : index
    %34 = vector.load %arg11[%c0_22, %c0_23] : memref<1x32xf32, #tpu.memory_space<vmem>>, vector<1x32xf32>
    %c0_24 = arith.constant 0 : index
    %c0_25 = arith.constant 0 : index
    %35 = vector.load %arg12[%c0_24, %c0_25] : memref<1x32xf32, #tpu.memory_space<vmem>>, vector<1x32xf32>
    %c0_26 = arith.constant 0 : index
    %c0_27 = arith.constant 0 : index
    %36 = vector.load %arg13[%c0_26, %c0_27] : memref<32x64xf32, #tpu.memory_space<vmem>>, vector<32x64xf32>
    %c0_28 = arith.constant 0 : index
    %c0_29 = arith.constant 0 : index
    %37 = vector.load %arg14[%c0_28, %c0_29] : memref<1x64xf32, #tpu.memory_space<vmem>>, vector<1x64xf32>
    %c0_30 = arith.constant 0 : index
    %c0_31 = arith.constant 0 : index
    %38 = vector.load %arg15[%c0_30, %c0_31] : memref<64x32xf32, #tpu.memory_space<vmem>>, vector<64x32xf32>
    %c0_32 = arith.constant 0 : index
    %c0_33 = arith.constant 0 : index
    %39 = vector.load %arg16[%c0_32, %c0_33] : memref<1x32xf32, #tpu.memory_space<vmem>>, vector<1x32xf32>
    %c0_34 = arith.constant 0 : index
    %c0_35 = arith.constant 0 : index
    %40 = vector.load %arg17[%c0_34, %c0_35] : memref<1x32xf32, #tpu.memory_space<vmem>>, vector<1x32xf32>
    %c0_36 = arith.constant 0 : index
    %c0_37 = arith.constant 0 : index
    %41 = vector.load %arg18[%c0_36, %c0_37] : memref<1x32xf32, #tpu.memory_space<vmem>>, vector<1x32xf32>
    %cst_38 = arith.constant dense<0.000000e+00> : vector<8x64xf32>
    %42 = tpu.matmul %17, %30, %cst_38 {dimension_numbers = #tpu.dot_dimension_numbers<[1], [0], [0], [1], [0, 0, 1, 1], [], []>} : vector<8x32xf32>, vector<32x64xf32>, vector<8x64xf32> -> vector<8x64xf32>
    %43 = vector.broadcast %31 : vector<1x64xf32> to vector<8x64xf32>
    %44 = arith.addf %42, %43 : vector<8x64xf32>
    %45 = vector.extract_strided_slice %44 {offsets = [0, 0], sizes = [8, 16], strides = [1, 1]} : vector<8x64xf32> to vector<8x16xf32>
    %46 = vector.extract_strided_slice %45 {offsets = [0, 0], sizes = [4, 8], strides = [1, 1]} : vector<8x16xf32> to vector<4x8xf32>
    %47 = vector.extract_strided_slice %45 {offsets = [0, 8], sizes = [4, 8], strides = [1, 1]} : vector<8x16xf32> to vector<4x8xf32>
    %48 = tpu.concatenate %46, %47 in 0 : vector<4x8xf32>, vector<4x8xf32> -> vector<8x8xf32>
    %49 = vector.extract_strided_slice %45 {offsets = [4, 0], sizes = [4, 8], strides = [1, 1]} : vector<8x16xf32> to vector<4x8xf32>
    %50 = vector.extract_strided_slice %45 {offsets = [4, 8], sizes = [4, 8], strides = [1, 1]} : vector<8x16xf32> to vector<4x8xf32>
    %51 = tpu.concatenate %49, %50 in 0 : vector<4x8xf32>, vector<4x8xf32> -> vector<8x8xf32>
    %52 = vector.extract_strided_slice %44 {offsets = [0, 16], sizes = [8, 16], strides = [1, 1]} : vector<8x64xf32> to vector<8x16xf32>
    %53 = vector.extract_strided_slice %52 {offsets = [0, 0], sizes = [4, 8], strides = [1, 1]} : vector<8x16xf32> to vector<4x8xf32>
    %54 = vector.extract_strided_slice %52 {offsets = [0, 8], sizes = [4, 8], strides = [1, 1]} : vector<8x16xf32> to vector<4x8xf32>
    %55 = tpu.concatenate %53, %54 in 0 : vector<4x8xf32>, vector<4x8xf32> -> vector<8x8xf32>
    %56 = vector.extract_strided_slice %52 {offsets = [4, 0], sizes = [4, 8], strides = [1, 1]} : vector<8x16xf32> to vector<4x8xf32>
    %57 = vector.extract_strided_slice %52 {offsets = [4, 8], sizes = [4, 8], strides = [1, 1]} : vector<8x16xf32> to vector<4x8xf32>
    %58 = tpu.concatenate %56, %57 in 0 : vector<4x8xf32>, vector<4x8xf32> -> vector<8x8xf32>
    %59 = vector.extract_strided_slice %44 {offsets = [0, 32], sizes = [8, 32], strides = [1, 1]} : vector<8x64xf32> to vector<8x32xf32>
    %60 = vector.extract_strided_slice %59 {offsets = [0, 0], sizes = [4, 8], strides = [1, 1]} : vector<8x32xf32> to vector<4x8xf32>
    %61 = vector.extract_strided_slice %59 {offsets = [0, 8], sizes = [4, 8], strides = [1, 1]} : vector<8x32xf32> to vector<4x8xf32>
    %62 = vector.extract_strided_slice %59 {offsets = [0, 16], sizes = [4, 8], strides = [1, 1]} : vector<8x32xf32> to vector<4x8xf32>
    %63 = vector.extract_strided_slice %59 {offsets = [0, 24], sizes = [4, 8], strides = [1, 1]} : vector<8x32xf32> to vector<4x8xf32>
    %64 = tpu.concatenate %60, %61, %62, %63 in 0 : vector<4x8xf32>, vector<4x8xf32>, vector<4x8xf32>, vector<4x8xf32> -> vector<16x8xf32>
    %65 = vector.extract_strided_slice %59 {offsets = [4, 0], sizes = [4, 8], strides = [1, 1]} : vector<8x32xf32> to vector<4x8xf32>
    %66 = vector.extract_strided_slice %59 {offsets = [4, 8], sizes = [4, 8], strides = [1, 1]} : vector<8x32xf32> to vector<4x8xf32>
    %67 = vector.extract_strided_slice %59 {offsets = [4, 16], sizes = [4, 8], strides = [1, 1]} : vector<8x32xf32> to vector<4x8xf32>
    %68 = vector.extract_strided_slice %59 {offsets = [4, 24], sizes = [4, 8], strides = [1, 1]} : vector<8x32xf32> to vector<4x8xf32>
    %69 = tpu.concatenate %65, %66, %67, %68 in 0 : vector<4x8xf32>, vector<4x8xf32>, vector<4x8xf32>, vector<4x8xf32> -> vector<16x8xf32>
    %cst_39 = arith.constant dense<0.000000e+00> : vector<8x8xf32>
    %70 = tpu.matmul %5, %48, %cst_39 {dimension_numbers = #tpu.dot_dimension_numbers<[1], [1], [0], [0], [0, 0, 1, 0], [], []>} : vector<8x8xf32>, vector<8x8xf32>, vector<8x8xf32> -> vector<8x8xf32>
    %cst_40 = arith.constant dense<0.000000e+00> : vector<8x8xf32>
    %71 = tpu.matmul %70, %55, %cst_40 {dimension_numbers = #tpu.dot_dimension_numbers<[1], [0], [0], [1], [0, 0, 1, 1], [], []>} : vector<8x8xf32>, vector<8x8xf32>, vector<8x8xf32> -> vector<8x8xf32>
    %cst_41 = arith.constant dense<0xFF800000> : vector<8xf32>
    %72 = vector.multi_reduction <maximumf>, %71, %cst_41 [1] : vector<8x8xf32> to vector<8xf32>
    %73 = vector.shape_cast %72 : vector<8xf32> to vector<8x1xf32>
    %74 = vector.broadcast %73 : vector<8x1xf32> to vector<8x8xf32>
    %75 = arith.subf %71, %74 : vector<8x8xf32>
    %76 = math.exp %75 : vector<8x8xf32>
    %cst_42 = arith.constant dense<0.000000e+00> : vector<8xf32>
    %77 = vector.multi_reduction <add>, %76, %cst_42 [1] : vector<8x8xf32> to vector<8xf32>
    %78 = vector.shape_cast %77 : vector<8xf32> to vector<8x1xf32>
    %79 = tpu.reciprocal %78 {approx = true} : vector<8x1xf32> -> vector<8x1xf32>
    %80 = vector.broadcast %79 : vector<8x1xf32> to vector<8x8xf32>
    %81 = arith.mulf %76, %80 : vector<8x8xf32>
    %cst_43 = arith.constant dense<0.000000e+00> : vector<8x16xf32>
    %82 = tpu.matmul %81, %64, %cst_43 {dimension_numbers = #tpu.dot_dimension_numbers<[1], [1], [0], [0], [0, 0, 1, 0], [], []>} : vector<8x8xf32>, vector<16x8xf32>, vector<8x16xf32> -> vector<8x16xf32>
    %cst_44 = arith.constant dense<0.000000e+00> : vector<8x8xf32>
    %83 = tpu.matmul %5, %51, %cst_44 {dimension_numbers = #tpu.dot_dimension_numbers<[1], [1], [0], [0], [0, 0, 1, 0], [], []>} : vector<8x8xf32>, vector<8x8xf32>, vector<8x8xf32> -> vector<8x8xf32>
    %cst_45 = arith.constant dense<0.000000e+00> : vector<8x8xf32>
    %84 = tpu.matmul %83, %58, %cst_45 {dimension_numbers = #tpu.dot_dimension_numbers<[1], [0], [0], [1], [0, 0, 1, 1], [], []>} : vector<8x8xf32>, vector<8x8xf32>, vector<8x8xf32> -> vector<8x8xf32>
    %cst_46 = arith.constant dense<0xFF800000> : vector<8xf32>
    %85 = vector.multi_reduction <maximumf>, %84, %cst_46 [1] : vector<8x8xf32> to vector<8xf32>
    %86 = vector.shape_cast %85 : vector<8xf32> to vector<8x1xf32>
    %87 = vector.broadcast %86 : vector<8x1xf32> to vector<8x8xf32>
    %88 = arith.subf %84, %87 : vector<8x8xf32>
    %89 = math.exp %88 : vector<8x8xf32>
    %cst_47 = arith.constant dense<0.000000e+00> : vector<8xf32>
    %90 = vector.multi_reduction <add>, %89, %cst_47 [1] : vector<8x8xf32> to vector<8xf32>
    %91 = vector.shape_cast %90 : vector<8xf32> to vector<8x1xf32>
    %92 = tpu.reciprocal %91 {approx = true} : vector<8x1xf32> -> vector<8x1xf32>
    %93 = vector.broadcast %92 : vector<8x1xf32> to vector<8x8xf32>
    %94 = arith.mulf %89, %93 : vector<8x8xf32>
    %cst_48 = arith.constant dense<0.000000e+00> : vector<8x16xf32>
    %95 = tpu.matmul %94, %69, %cst_48 {dimension_numbers = #tpu.dot_dimension_numbers<[1], [1], [0], [0], [0, 0, 1, 0], [], []>} : vector<8x8xf32>, vector<16x8xf32>, vector<8x16xf32> -> vector<8x16xf32>
    %96 = tpu.concatenate %82, %95 in 1 : vector<8x16xf32>, vector<8x16xf32> -> vector<8x32xf32>
    %cst_49 = arith.constant dense<0.000000e+00> : vector<8x32xf32>
    %97 = tpu.matmul %96, %32, %cst_49 {dimension_numbers = #tpu.dot_dimension_numbers<[1], [0], [0], [1], [0, 0, 1, 1], [], []>} : vector<8x32xf32>, vector<32x32xf32>, vector<8x32xf32> -> vector<8x32xf32>
    %98 = vector.broadcast %33 : vector<1x32xf32> to vector<8x32xf32>
    %99 = arith.addf %97, %98 : vector<8x32xf32>
    %100 = arith.addf %99, %17 : vector<8x32xf32>
    %cst_50 = arith.constant dense<0.000000e+00> : vector<8xf32>
    %101 = vector.multi_reduction <add>, %100, %cst_50 [1] : vector<8x32xf32> to vector<8xf32>
    %102 = vector.shape_cast %101 : vector<8xf32> to vector<8x1xf32>
    %cst_51 = arith.constant 3.200000e+01 : f32
    %103 = vector.broadcast %cst_51 : f32 to vector<8x1xf32>
    %104 = arith.divf %102, %103 : vector<8x1xf32>
    %105 = vector.broadcast %104 : vector<8x1xf32> to vector<8x32xf32>
    %106 = arith.subf %100, %105 : vector<8x32xf32>
    %107 = arith.mulf %106, %106 : vector<8x32xf32>
    %cst_52 = arith.constant dense<0.000000e+00> : vector<8xf32>
    %108 = vector.multi_reduction <add>, %107, %cst_52 [1] : vector<8x32xf32> to vector<8xf32>
    %109 = vector.shape_cast %108 : vector<8xf32> to vector<8x1xf32>
    %cst_53 = arith.constant 3.200000e+01 : f32
    %110 = vector.broadcast %cst_53 : f32 to vector<8x1xf32>
    %111 = arith.divf %109, %110 : vector<8x1xf32>
    %cst_54 = arith.constant 9.99999974E-6 : f32
    %112 = vector.broadcast %cst_54 : f32 to vector<8x1xf32>
    %113 = arith.addf %111, %112 : vector<8x1xf32>
    %114 = math.rsqrt %113 : vector<8x1xf32>
    %115 = vector.broadcast %114 : vector<8x1xf32> to vector<8x32xf32>
    %116 = arith.mulf %106, %115 : vector<8x32xf32>
    %117 = vector.broadcast %34 : vector<1x32xf32> to vector<8x32xf32>
    %118 = arith.mulf %116, %117 : vector<8x32xf32>
    %119 = vector.broadcast %35 : vector<1x32xf32> to vector<8x32xf32>
    %120 = arith.addf %118, %119 : vector<8x32xf32>
    %cst_55 = arith.constant dense<0.000000e+00> : vector<8x64xf32>
    %121 = tpu.matmul %120, %36, %cst_55 {dimension_numbers = #tpu.dot_dimension_numbers<[1], [0], [0], [1], [0, 0, 1, 1], [], []>} : vector<8x32xf32>, vector<32x64xf32>, vector<8x64xf32> -> vector<8x64xf32>
    %122 = vector.broadcast %37 : vector<1x64xf32> to vector<8x64xf32>
    %123 = arith.addf %121, %122 : vector<8x64xf32>
    %cst_56 = arith.constant 0.000000e+00 : f32
    %124 = vector.broadcast %cst_56 : f32 to vector<8x64xf32>
    %125 = arith.maximumf %123, %124 : vector<8x64xf32>
    %cst_57 = arith.constant dense<0.000000e+00> : vector<8x32xf32>
    %126 = tpu.matmul %125, %38, %cst_57 {dimension_numbers = #tpu.dot_dimension_numbers<[1], [0], [0], [1], [0, 0, 1, 1], [], []>} : vector<8x64xf32>, vector<64x32xf32>, vector<8x32xf32> -> vector<8x32xf32>
    %127 = vector.broadcast %39 : vector<1x32xf32> to vector<8x32xf32>
    %128 = arith.addf %126, %127 : vector<8x32xf32>
    %129 = arith.addf %128, %128 : vector<8x32xf32>
    %cst_58 = arith.constant dense<0.000000e+00> : vector<8xf32>
    %130 = vector.multi_reduction <add>, %129, %cst_58 [1] : vector<8x32xf32> to vector<8xf32>
    %131 = vector.shape_cast %130 : vector<8xf32> to vector<8x1xf32>
    %cst_59 = arith.constant 3.200000e+01 : f32
    %132 = vector.broadcast %cst_59 : f32 to vector<8x1xf32>
    %133 = arith.divf %131, %132 : vector<8x1xf32>
    %134 = vector.broadcast %133 : vector<8x1xf32> to vector<8x32xf32>
    %135 = arith.subf %129, %134 : vector<8x32xf32>
    %136 = arith.mulf %135, %135 : vector<8x32xf32>
    %cst_60 = arith.constant dense<0.000000e+00> : vector<8xf32>
    %137 = vector.multi_reduction <add>, %136, %cst_60 [1] : vector<8x32xf32> to vector<8xf32>
    %138 = vector.shape_cast %137 : vector<8xf32> to vector<8x1xf32>
    %cst_61 = arith.constant 3.200000e+01 : f32
    %139 = vector.broadcast %cst_61 : f32 to vector<8x1xf32>
    %140 = arith.divf %138, %139 : vector<8x1xf32>
    %cst_62 = arith.constant 9.99999974E-6 : f32
    %141 = vector.broadcast %cst_62 : f32 to vector<8x1xf32>
    %142 = arith.addf %140, %141 : vector<8x1xf32>
    %143 = math.rsqrt %142 : vector<8x1xf32>
    %144 = vector.broadcast %143 : vector<8x1xf32> to vector<8x32xf32>
    %145 = arith.mulf %135, %144 : vector<8x32xf32>
    %146 = vector.broadcast %40 : vector<1x32xf32> to vector<8x32xf32>
    %147 = arith.mulf %145, %146 : vector<8x32xf32>
    %148 = vector.broadcast %41 : vector<1x32xf32> to vector<8x32xf32>
    %149 = arith.addf %147, %148 : vector<8x32xf32>
    %c0_63 = arith.constant 0 : index
    %c0_64 = arith.constant 0 : index
    %150 = vector.load %arg19[%c0_63, %c0_64] : memref<32x64xf32, #tpu.memory_space<vmem>>, vector<32x64xf32>
    %c0_65 = arith.constant 0 : index
    %c0_66 = arith.constant 0 : index
    %151 = vector.load %arg20[%c0_65, %c0_66] : memref<1x64xf32, #tpu.memory_space<vmem>>, vector<1x64xf32>
    %c0_67 = arith.constant 0 : index
    %c0_68 = arith.constant 0 : index
    %152 = vector.load %arg21[%c0_67, %c0_68] : memref<32x32xf32, #tpu.memory_space<vmem>>, vector<32x32xf32>
    %c0_69 = arith.constant 0 : index
    %c0_70 = arith.constant 0 : index
    %153 = vector.load %arg22[%c0_69, %c0_70] : memref<1x32xf32, #tpu.memory_space<vmem>>, vector<1x32xf32>
    %c0_71 = arith.constant 0 : index
    %c0_72 = arith.constant 0 : index
    %154 = vector.load %arg23[%c0_71, %c0_72] : memref<1x32xf32, #tpu.memory_space<vmem>>, vector<1x32xf32>
    %c0_73 = arith.constant 0 : index
    %c0_74 = arith.constant 0 : index
    %155 = vector.load %arg24[%c0_73, %c0_74] : memref<1x32xf32, #tpu.memory_space<vmem>>, vector<1x32xf32>
    %c0_75 = arith.constant 0 : index
    %c0_76 = arith.constant 0 : index
    %156 = vector.load %arg25[%c0_75, %c0_76] : memref<32x64xf32, #tpu.memory_space<vmem>>, vector<32x64xf32>
    %c0_77 = arith.constant 0 : index
    %c0_78 = arith.constant 0 : index
    %157 = vector.load %arg26[%c0_77, %c0_78] : memref<1x64xf32, #tpu.memory_space<vmem>>, vector<1x64xf32>
    %c0_79 = arith.constant 0 : index
    %c0_80 = arith.constant 0 : index
    %158 = vector.load %arg27[%c0_79, %c0_80] : memref<64x32xf32, #tpu.memory_space<vmem>>, vector<64x32xf32>
    %c0_81 = arith.constant 0 : index
    %c0_82 = arith.constant 0 : index
    %159 = vector.load %arg28[%c0_81, %c0_82] : memref<1x32xf32, #tpu.memory_space<vmem>>, vector<1x32xf32>
    %c0_83 = arith.constant 0 : index
    %c0_84 = arith.constant 0 : index
    %160 = vector.load %arg29[%c0_83, %c0_84] : memref<1x32xf32, #tpu.memory_space<vmem>>, vector<1x32xf32>
    %c0_85 = arith.constant 0 : index
    %c0_86 = arith.constant 0 : index
    %161 = vector.load %arg30[%c0_85, %c0_86] : memref<1x32xf32, #tpu.memory_space<vmem>>, vector<1x32xf32>
    %cst_87 = arith.constant dense<0.000000e+00> : vector<8x64xf32>
    %162 = tpu.matmul %149, %150, %cst_87 {dimension_numbers = #tpu.dot_dimension_numbers<[1], [0], [0], [1], [0, 0, 1, 1], [], []>} : vector<8x32xf32>, vector<32x64xf32>, vector<8x64xf32> -> vector<8x64xf32>
    %163 = vector.broadcast %151 : vector<1x64xf32> to vector<8x64xf32>
    %164 = arith.addf %162, %163 : vector<8x64xf32>
    %165 = vector.extract_strided_slice %164 {offsets = [0, 0], sizes = [8, 16], strides = [1, 1]} : vector<8x64xf32> to vector<8x16xf32>
    %166 = vector.extract_strided_slice %165 {offsets = [0, 0], sizes = [4, 8], strides = [1, 1]} : vector<8x16xf32> to vector<4x8xf32>
    %167 = vector.extract_strided_slice %165 {offsets = [0, 8], sizes = [4, 8], strides = [1, 1]} : vector<8x16xf32> to vector<4x8xf32>
    %168 = tpu.concatenate %166, %167 in 0 : vector<4x8xf32>, vector<4x8xf32> -> vector<8x8xf32>
    %169 = vector.extract_strided_slice %165 {offsets = [4, 0], sizes = [4, 8], strides = [1, 1]} : vector<8x16xf32> to vector<4x8xf32>
    %170 = vector.extract_strided_slice %165 {offsets = [4, 8], sizes = [4, 8], strides = [1, 1]} : vector<8x16xf32> to vector<4x8xf32>
    %171 = tpu.concatenate %169, %170 in 0 : vector<4x8xf32>, vector<4x8xf32> -> vector<8x8xf32>
    %172 = vector.extract_strided_slice %164 {offsets = [0, 16], sizes = [8, 16], strides = [1, 1]} : vector<8x64xf32> to vector<8x16xf32>
    %173 = vector.extract_strided_slice %172 {offsets = [0, 0], sizes = [4, 8], strides = [1, 1]} : vector<8x16xf32> to vector<4x8xf32>
    %174 = vector.extract_strided_slice %172 {offsets = [0, 8], sizes = [4, 8], strides = [1, 1]} : vector<8x16xf32> to vector<4x8xf32>
    %175 = tpu.concatenate %173, %174 in 0 : vector<4x8xf32>, vector<4x8xf32> -> vector<8x8xf32>
    %176 = vector.extract_strided_slice %172 {offsets = [4, 0], sizes = [4, 8], strides = [1, 1]} : vector<8x16xf32> to vector<4x8xf32>
    %177 = vector.extract_strided_slice %172 {offsets = [4, 8], sizes = [4, 8], strides = [1, 1]} : vector<8x16xf32> to vector<4x8xf32>
    %178 = tpu.concatenate %176, %177 in 0 : vector<4x8xf32>, vector<4x8xf32> -> vector<8x8xf32>
    %179 = vector.extract_strided_slice %164 {offsets = [0, 32], sizes = [8, 32], strides = [1, 1]} : vector<8x64xf32> to vector<8x32xf32>
    %180 = vector.extract_strided_slice %179 {offsets = [0, 0], sizes = [4, 8], strides = [1, 1]} : vector<8x32xf32> to vector<4x8xf32>
    %181 = vector.extract_strided_slice %179 {offsets = [0, 8], sizes = [4, 8], strides = [1, 1]} : vector<8x32xf32> to vector<4x8xf32>
    %182 = vector.extract_strided_slice %179 {offsets = [0, 16], sizes = [4, 8], strides = [1, 1]} : vector<8x32xf32> to vector<4x8xf32>
    %183 = vector.extract_strided_slice %179 {offsets = [0, 24], sizes = [4, 8], strides = [1, 1]} : vector<8x32xf32> to vector<4x8xf32>
    %184 = tpu.concatenate %180, %181, %182, %183 in 0 : vector<4x8xf32>, vector<4x8xf32>, vector<4x8xf32>, vector<4x8xf32> -> vector<16x8xf32>
    %185 = vector.extract_strided_slice %179 {offsets = [4, 0], sizes = [4, 8], strides = [1, 1]} : vector<8x32xf32> to vector<4x8xf32>
    %186 = vector.extract_strided_slice %179 {offsets = [4, 8], sizes = [4, 8], strides = [1, 1]} : vector<8x32xf32> to vector<4x8xf32>
    %187 = vector.extract_strided_slice %179 {offsets = [4, 16], sizes = [4, 8], strides = [1, 1]} : vector<8x32xf32> to vector<4x8xf32>
    %188 = vector.extract_strided_slice %179 {offsets = [4, 24], sizes = [4, 8], strides = [1, 1]} : vector<8x32xf32> to vector<4x8xf32>
    %189 = tpu.concatenate %185, %186, %187, %188 in 0 : vector<4x8xf32>, vector<4x8xf32>, vector<4x8xf32>, vector<4x8xf32> -> vector<16x8xf32>
    %cst_88 = arith.constant dense<0.000000e+00> : vector<8x8xf32>
    %190 = tpu.matmul %5, %168, %cst_88 {dimension_numbers = #tpu.dot_dimension_numbers<[1], [1], [0], [0], [0, 0, 1, 0], [], []>} : vector<8x8xf32>, vector<8x8xf32>, vector<8x8xf32> -> vector<8x8xf32>
    %cst_89 = arith.constant dense<0.000000e+00> : vector<8x8xf32>
    %191 = tpu.matmul %190, %175, %cst_89 {dimension_numbers = #tpu.dot_dimension_numbers<[1], [0], [0], [1], [0, 0, 1, 1], [], []>} : vector<8x8xf32>, vector<8x8xf32>, vector<8x8xf32> -> vector<8x8xf32>
    %cst_90 = arith.constant dense<0xFF800000> : vector<8xf32>
    %192 = vector.multi_reduction <maximumf>, %191, %cst_90 [1] : vector<8x8xf32> to vector<8xf32>
    %193 = vector.shape_cast %192 : vector<8xf32> to vector<8x1xf32>
    %194 = vector.broadcast %193 : vector<8x1xf32> to vector<8x8xf32>
    %195 = arith.subf %191, %194 : vector<8x8xf32>
    %196 = math.exp %195 : vector<8x8xf32>
    %cst_91 = arith.constant dense<0.000000e+00> : vector<8xf32>
    %197 = vector.multi_reduction <add>, %196, %cst_91 [1] : vector<8x8xf32> to vector<8xf32>
    %198 = vector.shape_cast %197 : vector<8xf32> to vector<8x1xf32>
    %199 = tpu.reciprocal %198 {approx = true} : vector<8x1xf32> -> vector<8x1xf32>
    %200 = vector.broadcast %199 : vector<8x1xf32> to vector<8x8xf32>
    %201 = arith.mulf %196, %200 : vector<8x8xf32>
    %cst_92 = arith.constant dense<0.000000e+00> : vector<8x16xf32>
    %202 = tpu.matmul %201, %184, %cst_92 {dimension_numbers = #tpu.dot_dimension_numbers<[1], [1], [0], [0], [0, 0, 1, 0], [], []>} : vector<8x8xf32>, vector<16x8xf32>, vector<8x16xf32> -> vector<8x16xf32>
    %cst_93 = arith.constant dense<0.000000e+00> : vector<8x8xf32>
    %203 = tpu.matmul %5, %171, %cst_93 {dimension_numbers = #tpu.dot_dimension_numbers<[1], [1], [0], [0], [0, 0, 1, 0], [], []>} : vector<8x8xf32>, vector<8x8xf32>, vector<8x8xf32> -> vector<8x8xf32>
    %cst_94 = arith.constant dense<0.000000e+00> : vector<8x8xf32>
    %204 = tpu.matmul %203, %178, %cst_94 {dimension_numbers = #tpu.dot_dimension_numbers<[1], [0], [0], [1], [0, 0, 1, 1], [], []>} : vector<8x8xf32>, vector<8x8xf32>, vector<8x8xf32> -> vector<8x8xf32>
    %cst_95 = arith.constant dense<0xFF800000> : vector<8xf32>
    %205 = vector.multi_reduction <maximumf>, %204, %cst_95 [1] : vector<8x8xf32> to vector<8xf32>
    %206 = vector.shape_cast %205 : vector<8xf32> to vector<8x1xf32>
    %207 = vector.broadcast %206 : vector<8x1xf32> to vector<8x8xf32>
    %208 = arith.subf %204, %207 : vector<8x8xf32>
    %209 = math.exp %208 : vector<8x8xf32>
    %cst_96 = arith.constant dense<0.000000e+00> : vector<8xf32>
    %210 = vector.multi_reduction <add>, %209, %cst_96 [1] : vector<8x8xf32> to vector<8xf32>
    %211 = vector.shape_cast %210 : vector<8xf32> to vector<8x1xf32>
    %212 = tpu.reciprocal %211 {approx = true} : vector<8x1xf32> -> vector<8x1xf32>
    %213 = vector.broadcast %212 : vector<8x1xf32> to vector<8x8xf32>
    %214 = arith.mulf %209, %213 : vector<8x8xf32>
    %cst_97 = arith.constant dense<0.000000e+00> : vector<8x16xf32>
    %215 = tpu.matmul %214, %189, %cst_97 {dimension_numbers = #tpu.dot_dimension_numbers<[1], [1], [0], [0], [0, 0, 1, 0], [], []>} : vector<8x8xf32>, vector<16x8xf32>, vector<8x16xf32> -> vector<8x16xf32>
    %216 = tpu.concatenate %202, %215 in 1 : vector<8x16xf32>, vector<8x16xf32> -> vector<8x32xf32>
    %cst_98 = arith.constant dense<0.000000e+00> : vector<8x32xf32>
    %217 = tpu.matmul %216, %152, %cst_98 {dimension_numbers = #tpu.dot_dimension_numbers<[1], [0], [0], [1], [0, 0, 1, 1], [], []>} : vector<8x32xf32>, vector<32x32xf32>, vector<8x32xf32> -> vector<8x32xf32>
    %218 = vector.broadcast %153 : vector<1x32xf32> to vector<8x32xf32>
    %219 = arith.addf %217, %218 : vector<8x32xf32>
    %220 = arith.addf %219, %149 : vector<8x32xf32>
    %cst_99 = arith.constant dense<0.000000e+00> : vector<8xf32>
    %221 = vector.multi_reduction <add>, %220, %cst_99 [1] : vector<8x32xf32> to vector<8xf32>
    %222 = vector.shape_cast %221 : vector<8xf32> to vector<8x1xf32>
    %cst_100 = arith.constant 3.200000e+01 : f32
    %223 = vector.broadcast %cst_100 : f32 to vector<8x1xf32>
    %224 = arith.divf %222, %223 : vector<8x1xf32>
    %225 = vector.broadcast %224 : vector<8x1xf32> to vector<8x32xf32>
    %226 = arith.subf %220, %225 : vector<8x32xf32>
    %227 = arith.mulf %226, %226 : vector<8x32xf32>
    %cst_101 = arith.constant dense<0.000000e+00> : vector<8xf32>
    %228 = vector.multi_reduction <add>, %227, %cst_101 [1] : vector<8x32xf32> to vector<8xf32>
    %229 = vector.shape_cast %228 : vector<8xf32> to vector<8x1xf32>
    %cst_102 = arith.constant 3.200000e+01 : f32
    %230 = vector.broadcast %cst_102 : f32 to vector<8x1xf32>
    %231 = arith.divf %229, %230 : vector<8x1xf32>
    %cst_103 = arith.constant 9.99999974E-6 : f32
    %232 = vector.broadcast %cst_103 : f32 to vector<8x1xf32>
    %233 = arith.addf %231, %232 : vector<8x1xf32>
    %234 = math.rsqrt %233 : vector<8x1xf32>
    %235 = vector.broadcast %234 : vector<8x1xf32> to vector<8x32xf32>
    %236 = arith.mulf %226, %235 : vector<8x32xf32>
    %237 = vector.broadcast %154 : vector<1x32xf32> to vector<8x32xf32>
    %238 = arith.mulf %236, %237 : vector<8x32xf32>
    %239 = vector.broadcast %155 : vector<1x32xf32> to vector<8x32xf32>
    %240 = arith.addf %238, %239 : vector<8x32xf32>
    %cst_104 = arith.constant dense<0.000000e+00> : vector<8x64xf32>
    %241 = tpu.matmul %240, %156, %cst_104 {dimension_numbers = #tpu.dot_dimension_numbers<[1], [0], [0], [1], [0, 0, 1, 1], [], []>} : vector<8x32xf32>, vector<32x64xf32>, vector<8x64xf32> -> vector<8x64xf32>
    %242 = vector.broadcast %157 : vector<1x64xf32> to vector<8x64xf32>
    %243 = arith.addf %241, %242 : vector<8x64xf32>
    %cst_105 = arith.constant 0.000000e+00 : f32
    %244 = vector.broadcast %cst_105 : f32 to vector<8x64xf32>
    %245 = arith.maximumf %243, %244 : vector<8x64xf32>
    %cst_106 = arith.constant dense<0.000000e+00> : vector<8x32xf32>
    %246 = tpu.matmul %245, %158, %cst_106 {dimension_numbers = #tpu.dot_dimension_numbers<[1], [0], [0], [1], [0, 0, 1, 1], [], []>} : vector<8x64xf32>, vector<64x32xf32>, vector<8x32xf32> -> vector<8x32xf32>
    %247 = vector.broadcast %159 : vector<1x32xf32> to vector<8x32xf32>
    %248 = arith.addf %246, %247 : vector<8x32xf32>
    %249 = arith.addf %248, %248 : vector<8x32xf32>
    %cst_107 = arith.constant dense<0.000000e+00> : vector<8xf32>
    %250 = vector.multi_reduction <add>, %249, %cst_107 [1] : vector<8x32xf32> to vector<8xf32>
    %251 = vector.shape_cast %250 : vector<8xf32> to vector<8x1xf32>
    %cst_108 = arith.constant 3.200000e+01 : f32
    %252 = vector.broadcast %cst_108 : f32 to vector<8x1xf32>
    %253 = arith.divf %251, %252 : vector<8x1xf32>
    %254 = vector.broadcast %253 : vector<8x1xf32> to vector<8x32xf32>
    %255 = arith.subf %249, %254 : vector<8x32xf32>
    %256 = arith.mulf %255, %255 : vector<8x32xf32>
    %cst_109 = arith.constant dense<0.000000e+00> : vector<8xf32>
    %257 = vector.multi_reduction <add>, %256, %cst_109 [1] : vector<8x32xf32> to vector<8xf32>
    %258 = vector.shape_cast %257 : vector<8xf32> to vector<8x1xf32>
    %cst_110 = arith.constant 3.200000e+01 : f32
    %259 = vector.broadcast %cst_110 : f32 to vector<8x1xf32>
    %260 = arith.divf %258, %259 : vector<8x1xf32>
    %cst_111 = arith.constant 9.99999974E-6 : f32
    %261 = vector.broadcast %cst_111 : f32 to vector<8x1xf32>
    %262 = arith.addf %260, %261 : vector<8x1xf32>
    %263 = math.rsqrt %262 : vector<8x1xf32>
    %264 = vector.broadcast %263 : vector<8x1xf32> to vector<8x32xf32>
    %265 = arith.mulf %255, %264 : vector<8x32xf32>
    %266 = vector.broadcast %160 : vector<1x32xf32> to vector<8x32xf32>
    %267 = arith.mulf %265, %266 : vector<8x32xf32>
    %268 = vector.broadcast %161 : vector<1x32xf32> to vector<8x32xf32>
    %269 = arith.addf %267, %268 : vector<8x32xf32>
    %c0_112 = arith.constant 0 : index
    %c0_113 = arith.constant 0 : index
    %270 = vector.load %arg31[%c0_112, %c0_113] : memref<32x64xf32, #tpu.memory_space<vmem>>, vector<32x64xf32>
    %c0_114 = arith.constant 0 : index
    %c0_115 = arith.constant 0 : index
    %271 = vector.load %arg32[%c0_114, %c0_115] : memref<1x64xf32, #tpu.memory_space<vmem>>, vector<1x64xf32>
    %c0_116 = arith.constant 0 : index
    %c0_117 = arith.constant 0 : index
    %272 = vector.load %arg33[%c0_116, %c0_117] : memref<32x32xf32, #tpu.memory_space<vmem>>, vector<32x32xf32>
    %c0_118 = arith.constant 0 : index
    %c0_119 = arith.constant 0 : index
    %273 = vector.load %arg34[%c0_118, %c0_119] : memref<1x32xf32, #tpu.memory_space<vmem>>, vector<1x32xf32>
    %c0_120 = arith.constant 0 : index
    %c0_121 = arith.constant 0 : index
    %274 = vector.load %arg35[%c0_120, %c0_121] : memref<1x32xf32, #tpu.memory_space<vmem>>, vector<1x32xf32>
    %c0_122 = arith.constant 0 : index
    %c0_123 = arith.constant 0 : index
    %275 = vector.load %arg36[%c0_122, %c0_123] : memref<1x32xf32, #tpu.memory_space<vmem>>, vector<1x32xf32>
    %c0_124 = arith.constant 0 : index
    %c0_125 = arith.constant 0 : index
    %276 = vector.load %arg37[%c0_124, %c0_125] : memref<32x32xf32, #tpu.memory_space<vmem>>, vector<32x32xf32>
    %c0_126 = arith.constant 0 : index
    %c0_127 = arith.constant 0 : index
    %277 = vector.load %arg38[%c0_126, %c0_127] : memref<1x32xf32, #tpu.memory_space<vmem>>, vector<1x32xf32>
    %c0_128 = arith.constant 0 : index
    %c0_129 = arith.constant 0 : index
    %278 = vector.load %arg39[%c0_128, %c0_129] : memref<32x32xf32, #tpu.memory_space<vmem>>, vector<32x32xf32>
    %c0_130 = arith.constant 0 : index
    %c0_131 = arith.constant 0 : index
    %279 = vector.load %arg40[%c0_130, %c0_131] : memref<1x32xf32, #tpu.memory_space<vmem>>, vector<1x32xf32>
    %c0_132 = arith.constant 0 : index
    %c0_133 = arith.constant 0 : index
    %280 = vector.load %arg41[%c0_132, %c0_133] : memref<32x32xf32, #tpu.memory_space<vmem>>, vector<32x32xf32>
    %c0_134 = arith.constant 0 : index
    %c0_135 = arith.constant 0 : index
    %281 = vector.load %arg42[%c0_134, %c0_135] : memref<1x32xf32, #tpu.memory_space<vmem>>, vector<1x32xf32>
    %c0_136 = arith.constant 0 : index
    %c0_137 = arith.constant 0 : index
    %282 = vector.load %arg43[%c0_136, %c0_137] : memref<1x32xf32, #tpu.memory_space<vmem>>, vector<1x32xf32>
    %c0_138 = arith.constant 0 : index
    %c0_139 = arith.constant 0 : index
    %283 = vector.load %arg44[%c0_138, %c0_139] : memref<1x32xf32, #tpu.memory_space<vmem>>, vector<1x32xf32>
    %c0_140 = arith.constant 0 : index
    %c0_141 = arith.constant 0 : index
    %284 = vector.load %arg45[%c0_140, %c0_141] : memref<32x64xf32, #tpu.memory_space<vmem>>, vector<32x64xf32>
    %c0_142 = arith.constant 0 : index
    %c0_143 = arith.constant 0 : index
    %285 = vector.load %arg46[%c0_142, %c0_143] : memref<1x64xf32, #tpu.memory_space<vmem>>, vector<1x64xf32>
    %c0_144 = arith.constant 0 : index
    %c0_145 = arith.constant 0 : index
    %286 = vector.load %arg47[%c0_144, %c0_145] : memref<64x32xf32, #tpu.memory_space<vmem>>, vector<64x32xf32>
    %c0_146 = arith.constant 0 : index
    %c0_147 = arith.constant 0 : index
    %287 = vector.load %arg48[%c0_146, %c0_147] : memref<1x32xf32, #tpu.memory_space<vmem>>, vector<1x32xf32>
    %c0_148 = arith.constant 0 : index
    %c0_149 = arith.constant 0 : index
    %288 = vector.load %arg49[%c0_148, %c0_149] : memref<1x32xf32, #tpu.memory_space<vmem>>, vector<1x32xf32>
    %c0_150 = arith.constant 0 : index
    %c0_151 = arith.constant 0 : index
    %289 = vector.load %arg50[%c0_150, %c0_151] : memref<1x32xf32, #tpu.memory_space<vmem>>, vector<1x32xf32>
    %cst_152 = arith.constant dense<0.000000e+00> : vector<8x64xf32>
    %290 = tpu.matmul %269, %270, %cst_152 {dimension_numbers = #tpu.dot_dimension_numbers<[1], [0], [0], [1], [0, 0, 1, 1], [], []>} : vector<8x32xf32>, vector<32x64xf32>, vector<8x64xf32> -> vector<8x64xf32>
    %291 = vector.broadcast %271 : vector<1x64xf32> to vector<8x64xf32>
    %292 = arith.addf %290, %291 : vector<8x64xf32>
    %293 = vector.extract_strided_slice %292 {offsets = [0, 0], sizes = [8, 16], strides = [1, 1]} : vector<8x64xf32> to vector<8x16xf32>
    %294 = vector.extract_strided_slice %293 {offsets = [0, 0], sizes = [4, 8], strides = [1, 1]} : vector<8x16xf32> to vector<4x8xf32>
    %295 = vector.extract_strided_slice %293 {offsets = [0, 8], sizes = [4, 8], strides = [1, 1]} : vector<8x16xf32> to vector<4x8xf32>
    %296 = tpu.concatenate %294, %295 in 0 : vector<4x8xf32>, vector<4x8xf32> -> vector<8x8xf32>
    %297 = vector.extract_strided_slice %293 {offsets = [4, 0], sizes = [4, 8], strides = [1, 1]} : vector<8x16xf32> to vector<4x8xf32>
    %298 = vector.extract_strided_slice %293 {offsets = [4, 8], sizes = [4, 8], strides = [1, 1]} : vector<8x16xf32> to vector<4x8xf32>
    %299 = tpu.concatenate %297, %298 in 0 : vector<4x8xf32>, vector<4x8xf32> -> vector<8x8xf32>
    %300 = vector.extract_strided_slice %292 {offsets = [0, 16], sizes = [8, 16], strides = [1, 1]} : vector<8x64xf32> to vector<8x16xf32>
    %301 = vector.extract_strided_slice %300 {offsets = [0, 0], sizes = [4, 8], strides = [1, 1]} : vector<8x16xf32> to vector<4x8xf32>
    %302 = vector.extract_strided_slice %300 {offsets = [0, 8], sizes = [4, 8], strides = [1, 1]} : vector<8x16xf32> to vector<4x8xf32>
    %303 = tpu.concatenate %301, %302 in 0 : vector<4x8xf32>, vector<4x8xf32> -> vector<8x8xf32>
    %304 = vector.extract_strided_slice %300 {offsets = [4, 0], sizes = [4, 8], strides = [1, 1]} : vector<8x16xf32> to vector<4x8xf32>
    %305 = vector.extract_strided_slice %300 {offsets = [4, 8], sizes = [4, 8], strides = [1, 1]} : vector<8x16xf32> to vector<4x8xf32>
    %306 = tpu.concatenate %304, %305 in 0 : vector<4x8xf32>, vector<4x8xf32> -> vector<8x8xf32>
    %307 = vector.extract_strided_slice %292 {offsets = [0, 32], sizes = [8, 32], strides = [1, 1]} : vector<8x64xf32> to vector<8x32xf32>
    %308 = vector.extract_strided_slice %307 {offsets = [0, 0], sizes = [4, 8], strides = [1, 1]} : vector<8x32xf32> to vector<4x8xf32>
    %309 = vector.extract_strided_slice %307 {offsets = [0, 8], sizes = [4, 8], strides = [1, 1]} : vector<8x32xf32> to vector<4x8xf32>
    %310 = vector.extract_strided_slice %307 {offsets = [0, 16], sizes = [4, 8], strides = [1, 1]} : vector<8x32xf32> to vector<4x8xf32>
    %311 = vector.extract_strided_slice %307 {offsets = [0, 24], sizes = [4, 8], strides = [1, 1]} : vector<8x32xf32> to vector<4x8xf32>
    %312 = tpu.concatenate %308, %309, %310, %311 in 0 : vector<4x8xf32>, vector<4x8xf32>, vector<4x8xf32>, vector<4x8xf32> -> vector<16x8xf32>
    %313 = vector.extract_strided_slice %307 {offsets = [4, 0], sizes = [4, 8], strides = [1, 1]} : vector<8x32xf32> to vector<4x8xf32>
    %314 = vector.extract_strided_slice %307 {offsets = [4, 8], sizes = [4, 8], strides = [1, 1]} : vector<8x32xf32> to vector<4x8xf32>
    %315 = vector.extract_strided_slice %307 {offsets = [4, 16], sizes = [4, 8], strides = [1, 1]} : vector<8x32xf32> to vector<4x8xf32>
    %316 = vector.extract_strided_slice %307 {offsets = [4, 24], sizes = [4, 8], strides = [1, 1]} : vector<8x32xf32> to vector<4x8xf32>
    %317 = tpu.concatenate %313, %314, %315, %316 in 0 : vector<4x8xf32>, vector<4x8xf32>, vector<4x8xf32>, vector<4x8xf32> -> vector<16x8xf32>
    %cst_153 = arith.constant dense<0.000000e+00> : vector<8x8xf32>
    %318 = tpu.matmul %5, %296, %cst_153 {dimension_numbers = #tpu.dot_dimension_numbers<[1], [1], [0], [0], [0, 0, 1, 0], [], []>} : vector<8x8xf32>, vector<8x8xf32>, vector<8x8xf32> -> vector<8x8xf32>
    %cst_154 = arith.constant dense<0.000000e+00> : vector<8x8xf32>
    %319 = tpu.matmul %318, %303, %cst_154 {dimension_numbers = #tpu.dot_dimension_numbers<[1], [0], [0], [1], [0, 0, 1, 1], [], []>} : vector<8x8xf32>, vector<8x8xf32>, vector<8x8xf32> -> vector<8x8xf32>
    %cst_155 = arith.constant dense<0xFF800000> : vector<8xf32>
    %320 = vector.multi_reduction <maximumf>, %319, %cst_155 [1] : vector<8x8xf32> to vector<8xf32>
    %321 = vector.shape_cast %320 : vector<8xf32> to vector<8x1xf32>
    %322 = vector.broadcast %321 : vector<8x1xf32> to vector<8x8xf32>
    %323 = arith.subf %319, %322 : vector<8x8xf32>
    %324 = math.exp %323 : vector<8x8xf32>
    %cst_156 = arith.constant dense<0.000000e+00> : vector<8xf32>
    %325 = vector.multi_reduction <add>, %324, %cst_156 [1] : vector<8x8xf32> to vector<8xf32>
    %326 = vector.shape_cast %325 : vector<8xf32> to vector<8x1xf32>
    %327 = tpu.reciprocal %326 {approx = true} : vector<8x1xf32> -> vector<8x1xf32>
    %328 = vector.broadcast %327 : vector<8x1xf32> to vector<8x8xf32>
    %329 = arith.mulf %324, %328 : vector<8x8xf32>
    %cst_157 = arith.constant dense<0.000000e+00> : vector<8x16xf32>
    %330 = tpu.matmul %329, %312, %cst_157 {dimension_numbers = #tpu.dot_dimension_numbers<[1], [1], [0], [0], [0, 0, 1, 0], [], []>} : vector<8x8xf32>, vector<16x8xf32>, vector<8x16xf32> -> vector<8x16xf32>
    %cst_158 = arith.constant dense<0.000000e+00> : vector<8x8xf32>
    %331 = tpu.matmul %5, %299, %cst_158 {dimension_numbers = #tpu.dot_dimension_numbers<[1], [1], [0], [0], [0, 0, 1, 0], [], []>} : vector<8x8xf32>, vector<8x8xf32>, vector<8x8xf32> -> vector<8x8xf32>
    %cst_159 = arith.constant dense<0.000000e+00> : vector<8x8xf32>
    %332 = tpu.matmul %331, %306, %cst_159 {dimension_numbers = #tpu.dot_dimension_numbers<[1], [0], [0], [1], [0, 0, 1, 1], [], []>} : vector<8x8xf32>, vector<8x8xf32>, vector<8x8xf32> -> vector<8x8xf32>
    %cst_160 = arith.constant dense<0xFF800000> : vector<8xf32>
    %333 = vector.multi_reduction <maximumf>, %332, %cst_160 [1] : vector<8x8xf32> to vector<8xf32>
    %334 = vector.shape_cast %333 : vector<8xf32> to vector<8x1xf32>
    %335 = vector.broadcast %334 : vector<8x1xf32> to vector<8x8xf32>
    %336 = arith.subf %332, %335 : vector<8x8xf32>
    %337 = math.exp %336 : vector<8x8xf32>
    %cst_161 = arith.constant dense<0.000000e+00> : vector<8xf32>
    %338 = vector.multi_reduction <add>, %337, %cst_161 [1] : vector<8x8xf32> to vector<8xf32>
    %339 = vector.shape_cast %338 : vector<8xf32> to vector<8x1xf32>
    %340 = tpu.reciprocal %339 {approx = true} : vector<8x1xf32> -> vector<8x1xf32>
    %341 = vector.broadcast %340 : vector<8x1xf32> to vector<8x8xf32>
    %342 = arith.mulf %337, %341 : vector<8x8xf32>
    %cst_162 = arith.constant dense<0.000000e+00> : vector<8x16xf32>
    %343 = tpu.matmul %342, %317, %cst_162 {dimension_numbers = #tpu.dot_dimension_numbers<[1], [1], [0], [0], [0, 0, 1, 0], [], []>} : vector<8x8xf32>, vector<16x8xf32>, vector<8x16xf32> -> vector<8x16xf32>
    %344 = tpu.concatenate %330, %343 in 1 : vector<8x16xf32>, vector<8x16xf32> -> vector<8x32xf32>
    %cst_163 = arith.constant dense<0.000000e+00> : vector<8x32xf32>
    %345 = tpu.matmul %344, %272, %cst_163 {dimension_numbers = #tpu.dot_dimension_numbers<[1], [0], [0], [1], [0, 0, 1, 1], [], []>} : vector<8x32xf32>, vector<32x32xf32>, vector<8x32xf32> -> vector<8x32xf32>
    %346 = vector.broadcast %273 : vector<1x32xf32> to vector<8x32xf32>
    %347 = arith.addf %345, %346 : vector<8x32xf32>
    %348 = arith.addf %347, %269 : vector<8x32xf32>
    %cst_164 = arith.constant dense<0.000000e+00> : vector<8xf32>
    %349 = vector.multi_reduction <add>, %348, %cst_164 [1] : vector<8x32xf32> to vector<8xf32>
    %350 = vector.shape_cast %349 : vector<8xf32> to vector<8x1xf32>
    %cst_165 = arith.constant 3.200000e+01 : f32
    %351 = vector.broadcast %cst_165 : f32 to vector<8x1xf32>
    %352 = arith.divf %350, %351 : vector<8x1xf32>
    %353 = vector.broadcast %352 : vector<8x1xf32> to vector<8x32xf32>
    %354 = arith.subf %348, %353 : vector<8x32xf32>
    %355 = arith.mulf %354, %354 : vector<8x32xf32>
    %cst_166 = arith.constant dense<0.000000e+00> : vector<8xf32>
    %356 = vector.multi_reduction <add>, %355, %cst_166 [1] : vector<8x32xf32> to vector<8xf32>
    %357 = vector.shape_cast %356 : vector<8xf32> to vector<8x1xf32>
    %cst_167 = arith.constant 3.200000e+01 : f32
    %358 = vector.broadcast %cst_167 : f32 to vector<8x1xf32>
    %359 = arith.divf %357, %358 : vector<8x1xf32>
    %cst_168 = arith.constant 9.99999974E-6 : f32
    %360 = vector.broadcast %cst_168 : f32 to vector<8x1xf32>
    %361 = arith.addf %359, %360 : vector<8x1xf32>
    %362 = math.rsqrt %361 : vector<8x1xf32>
    %363 = vector.broadcast %362 : vector<8x1xf32> to vector<8x32xf32>
    %364 = arith.mulf %354, %363 : vector<8x32xf32>
    %365 = vector.broadcast %274 : vector<1x32xf32> to vector<8x32xf32>
    %366 = arith.mulf %364, %365 : vector<8x32xf32>
    %367 = vector.broadcast %275 : vector<1x32xf32> to vector<8x32xf32>
    %368 = arith.addf %366, %367 : vector<8x32xf32>
    %cst_169 = arith.constant dense<0.000000e+00> : vector<8x32xf32>
    %369 = tpu.matmul %29, %276, %cst_169 {dimension_numbers = #tpu.dot_dimension_numbers<[1], [0], [0], [1], [0, 0, 1, 1], [], []>} : vector<8x32xf32>, vector<32x32xf32>, vector<8x32xf32> -> vector<8x32xf32>
    %370 = vector.broadcast %277 : vector<1x32xf32> to vector<8x32xf32>
    %371 = arith.addf %369, %370 : vector<8x32xf32>
    %cst_170 = arith.constant dense<0.000000e+00> : vector<8x32xf32>
    %372 = tpu.matmul %368, %278, %cst_170 {dimension_numbers = #tpu.dot_dimension_numbers<[1], [0], [0], [1], [0, 0, 1, 1], [], []>} : vector<8x32xf32>, vector<32x32xf32>, vector<8x32xf32> -> vector<8x32xf32>
    %373 = vector.broadcast %279 : vector<1x32xf32> to vector<8x32xf32>
    %374 = arith.addf %372, %373 : vector<8x32xf32>
    %375 = vector.extract_strided_slice %371 {offsets = [0, 0], sizes = [8, 16], strides = [1, 1]} : vector<8x32xf32> to vector<8x16xf32>
    %376 = vector.extract_strided_slice %375 {offsets = [0, 0], sizes = [4, 8], strides = [1, 1]} : vector<8x16xf32> to vector<4x8xf32>
    %377 = vector.extract_strided_slice %375 {offsets = [0, 8], sizes = [4, 8], strides = [1, 1]} : vector<8x16xf32> to vector<4x8xf32>
    %378 = tpu.concatenate %376, %377 in 0 : vector<4x8xf32>, vector<4x8xf32> -> vector<8x8xf32>
    %379 = vector.extract_strided_slice %375 {offsets = [4, 0], sizes = [4, 8], strides = [1, 1]} : vector<8x16xf32> to vector<4x8xf32>
    %380 = vector.extract_strided_slice %375 {offsets = [4, 8], sizes = [4, 8], strides = [1, 1]} : vector<8x16xf32> to vector<4x8xf32>
    %381 = tpu.concatenate %379, %380 in 0 : vector<4x8xf32>, vector<4x8xf32> -> vector<8x8xf32>
    %382 = vector.extract_strided_slice %371 {offsets = [0, 16], sizes = [8, 16], strides = [1, 1]} : vector<8x32xf32> to vector<8x16xf32>
    %383 = vector.extract_strided_slice %382 {offsets = [0, 0], sizes = [4, 8], strides = [1, 1]} : vector<8x16xf32> to vector<4x8xf32>
    %384 = vector.extract_strided_slice %382 {offsets = [0, 8], sizes = [4, 8], strides = [1, 1]} : vector<8x16xf32> to vector<4x8xf32>
    %385 = tpu.concatenate %383, %384 in 0 : vector<4x8xf32>, vector<4x8xf32> -> vector<8x8xf32>
    %386 = vector.extract_strided_slice %382 {offsets = [4, 0], sizes = [4, 8], strides = [1, 1]} : vector<8x16xf32> to vector<4x8xf32>
    %387 = vector.extract_strided_slice %382 {offsets = [4, 8], sizes = [4, 8], strides = [1, 1]} : vector<8x16xf32> to vector<4x8xf32>
    %388 = tpu.concatenate %386, %387 in 0 : vector<4x8xf32>, vector<4x8xf32> -> vector<8x8xf32>
    %389 = vector.extract_strided_slice %374 {offsets = [0, 0], sizes = [4, 8], strides = [1, 1]} : vector<8x32xf32> to vector<4x8xf32>
    %390 = vector.extract_strided_slice %374 {offsets = [0, 8], sizes = [4, 8], strides = [1, 1]} : vector<8x32xf32> to vector<4x8xf32>
    %391 = vector.extract_strided_slice %374 {offsets = [0, 16], sizes = [4, 8], strides = [1, 1]} : vector<8x32xf32> to vector<4x8xf32>
    %392 = vector.extract_strided_slice %374 {offsets = [0, 24], sizes = [4, 8], strides = [1, 1]} : vector<8x32xf32> to vector<4x8xf32>
    %393 = tpu.concatenate %389, %390, %391, %392 in 0 : vector<4x8xf32>, vector<4x8xf32>, vector<4x8xf32>, vector<4x8xf32> -> vector<16x8xf32>
    %394 = vector.extract_strided_slice %374 {offsets = [4, 0], sizes = [4, 8], strides = [1, 1]} : vector<8x32xf32> to vector<4x8xf32>
    %395 = vector.extract_strided_slice %374 {offsets = [4, 8], sizes = [4, 8], strides = [1, 1]} : vector<8x32xf32> to vector<4x8xf32>
    %396 = vector.extract_strided_slice %374 {offsets = [4, 16], sizes = [4, 8], strides = [1, 1]} : vector<8x32xf32> to vector<4x8xf32>
    %397 = vector.extract_strided_slice %374 {offsets = [4, 24], sizes = [4, 8], strides = [1, 1]} : vector<8x32xf32> to vector<4x8xf32>
    %398 = tpu.concatenate %394, %395, %396, %397 in 0 : vector<4x8xf32>, vector<4x8xf32>, vector<4x8xf32>, vector<4x8xf32> -> vector<16x8xf32>
    %cst_171 = arith.constant dense<0.000000e+00> : vector<8x8xf32>
    %399 = tpu.matmul %5, %378, %cst_171 {dimension_numbers = #tpu.dot_dimension_numbers<[1], [1], [0], [0], [0, 0, 1, 0], [], []>} : vector<8x8xf32>, vector<8x8xf32>, vector<8x8xf32> -> vector<8x8xf32>
    %cst_172 = arith.constant dense<0.000000e+00> : vector<8x8xf32>
    %400 = tpu.matmul %399, %385, %cst_172 {dimension_numbers = #tpu.dot_dimension_numbers<[1], [0], [0], [1], [0, 0, 1, 1], [], []>} : vector<8x8xf32>, vector<8x8xf32>, vector<8x8xf32> -> vector<8x8xf32>
    %cst_173 = arith.constant dense<0xFF800000> : vector<8xf32>
    %401 = vector.multi_reduction <maximumf>, %400, %cst_173 [1] : vector<8x8xf32> to vector<8xf32>
    %402 = vector.shape_cast %401 : vector<8xf32> to vector<8x1xf32>
    %403 = vector.broadcast %402 : vector<8x1xf32> to vector<8x8xf32>
    %404 = arith.subf %400, %403 : vector<8x8xf32>
    %405 = math.exp %404 : vector<8x8xf32>
    %cst_174 = arith.constant dense<0.000000e+00> : vector<8xf32>
    %406 = vector.multi_reduction <add>, %405, %cst_174 [1] : vector<8x8xf32> to vector<8xf32>
    %407 = vector.shape_cast %406 : vector<8xf32> to vector<8x1xf32>
    %408 = tpu.reciprocal %407 {approx = true} : vector<8x1xf32> -> vector<8x1xf32>
    %409 = vector.broadcast %408 : vector<8x1xf32> to vector<8x8xf32>
    %410 = arith.mulf %405, %409 : vector<8x8xf32>
    %cst_175 = arith.constant dense<0.000000e+00> : vector<8x16xf32>
    %411 = tpu.matmul %410, %393, %cst_175 {dimension_numbers = #tpu.dot_dimension_numbers<[1], [1], [0], [0], [0, 0, 1, 0], [], []>} : vector<8x8xf32>, vector<16x8xf32>, vector<8x16xf32> -> vector<8x16xf32>
    %cst_176 = arith.constant dense<0.000000e+00> : vector<8x8xf32>
    %412 = tpu.matmul %5, %381, %cst_176 {dimension_numbers = #tpu.dot_dimension_numbers<[1], [1], [0], [0], [0, 0, 1, 0], [], []>} : vector<8x8xf32>, vector<8x8xf32>, vector<8x8xf32> -> vector<8x8xf32>
    %cst_177 = arith.constant dense<0.000000e+00> : vector<8x8xf32>
    %413 = tpu.matmul %412, %388, %cst_177 {dimension_numbers = #tpu.dot_dimension_numbers<[1], [0], [0], [1], [0, 0, 1, 1], [], []>} : vector<8x8xf32>, vector<8x8xf32>, vector<8x8xf32> -> vector<8x8xf32>
    %cst_178 = arith.constant dense<0xFF800000> : vector<8xf32>
    %414 = vector.multi_reduction <maximumf>, %413, %cst_178 [1] : vector<8x8xf32> to vector<8xf32>
    %415 = vector.shape_cast %414 : vector<8xf32> to vector<8x1xf32>
    %416 = vector.broadcast %415 : vector<8x1xf32> to vector<8x8xf32>
    %417 = arith.subf %413, %416 : vector<8x8xf32>
    %418 = math.exp %417 : vector<8x8xf32>
    %cst_179 = arith.constant dense<0.000000e+00> : vector<8xf32>
    %419 = vector.multi_reduction <add>, %418, %cst_179 [1] : vector<8x8xf32> to vector<8xf32>
    %420 = vector.shape_cast %419 : vector<8xf32> to vector<8x1xf32>
    %421 = tpu.reciprocal %420 {approx = true} : vector<8x1xf32> -> vector<8x1xf32>
    %422 = vector.broadcast %421 : vector<8x1xf32> to vector<8x8xf32>
    %423 = arith.mulf %418, %422 : vector<8x8xf32>
    %cst_180 = arith.constant dense<0.000000e+00> : vector<8x16xf32>
    %424 = tpu.matmul %423, %398, %cst_180 {dimension_numbers = #tpu.dot_dimension_numbers<[1], [1], [0], [0], [0, 0, 1, 0], [], []>} : vector<8x8xf32>, vector<16x8xf32>, vector<8x16xf32> -> vector<8x16xf32>
    %425 = tpu.concatenate %411, %424 in 1 : vector<8x16xf32>, vector<8x16xf32> -> vector<8x32xf32>
    %cst_181 = arith.constant dense<0.000000e+00> : vector<8x32xf32>
    %426 = tpu.matmul %425, %280, %cst_181 {dimension_numbers = #tpu.dot_dimension_numbers<[1], [0], [0], [1], [0, 0, 1, 1], [], []>} : vector<8x32xf32>, vector<32x32xf32>, vector<8x32xf32> -> vector<8x32xf32>
    %427 = vector.broadcast %281 : vector<1x32xf32> to vector<8x32xf32>
    %428 = arith.addf %426, %427 : vector<8x32xf32>
    %429 = arith.addf %428, %368 : vector<8x32xf32>
    %cst_182 = arith.constant dense<0.000000e+00> : vector<8xf32>
    %430 = vector.multi_reduction <add>, %429, %cst_182 [1] : vector<8x32xf32> to vector<8xf32>
    %431 = vector.shape_cast %430 : vector<8xf32> to vector<8x1xf32>
    %cst_183 = arith.constant 3.200000e+01 : f32
    %432 = vector.broadcast %cst_183 : f32 to vector<8x1xf32>
    %433 = arith.divf %431, %432 : vector<8x1xf32>
    %434 = vector.broadcast %433 : vector<8x1xf32> to vector<8x32xf32>
    %435 = arith.subf %429, %434 : vector<8x32xf32>
    %436 = arith.mulf %435, %435 : vector<8x32xf32>
    %cst_184 = arith.constant dense<0.000000e+00> : vector<8xf32>
    %437 = vector.multi_reduction <add>, %436, %cst_184 [1] : vector<8x32xf32> to vector<8xf32>
    %438 = vector.shape_cast %437 : vector<8xf32> to vector<8x1xf32>
    %cst_185 = arith.constant 3.200000e+01 : f32
    %439 = vector.broadcast %cst_185 : f32 to vector<8x1xf32>
    %440 = arith.divf %438, %439 : vector<8x1xf32>
    %cst_186 = arith.constant 9.99999974E-6 : f32
    %441 = vector.broadcast %cst_186 : f32 to vector<8x1xf32>
    %442 = arith.addf %440, %441 : vector<8x1xf32>
    %443 = math.rsqrt %442 : vector<8x1xf32>
    %444 = vector.broadcast %443 : vector<8x1xf32> to vector<8x32xf32>
    %445 = arith.mulf %435, %444 : vector<8x32xf32>
    %446 = vector.broadcast %282 : vector<1x32xf32> to vector<8x32xf32>
    %447 = arith.mulf %445, %446 : vector<8x32xf32>
    %448 = vector.broadcast %283 : vector<1x32xf32> to vector<8x32xf32>
    %449 = arith.addf %447, %448 : vector<8x32xf32>
    %cst_187 = arith.constant dense<0.000000e+00> : vector<8x64xf32>
    %450 = tpu.matmul %449, %284, %cst_187 {dimension_numbers = #tpu.dot_dimension_numbers<[1], [0], [0], [1], [0, 0, 1, 1], [], []>} : vector<8x32xf32>, vector<32x64xf32>, vector<8x64xf32> -> vector<8x64xf32>
    %451 = vector.broadcast %285 : vector<1x64xf32> to vector<8x64xf32>
    %452 = arith.addf %450, %451 : vector<8x64xf32>
    %cst_188 = arith.constant 0.000000e+00 : f32
    %453 = vector.broadcast %cst_188 : f32 to vector<8x64xf32>
    %454 = arith.maximumf %452, %453 : vector<8x64xf32>
    %cst_189 = arith.constant dense<0.000000e+00> : vector<8x32xf32>
    %455 = tpu.matmul %454, %286, %cst_189 {dimension_numbers = #tpu.dot_dimension_numbers<[1], [0], [0], [1], [0, 0, 1, 1], [], []>} : vector<8x64xf32>, vector<64x32xf32>, vector<8x32xf32> -> vector<8x32xf32>
    %456 = vector.broadcast %287 : vector<1x32xf32> to vector<8x32xf32>
    %457 = arith.addf %455, %456 : vector<8x32xf32>
    %458 = arith.addf %457, %449 : vector<8x32xf32>
    %cst_190 = arith.constant dense<0.000000e+00> : vector<8xf32>
    %459 = vector.multi_reduction <add>, %458, %cst_190 [1] : vector<8x32xf32> to vector<8xf32>
    %460 = vector.shape_cast %459 : vector<8xf32> to vector<8x1xf32>
    %cst_191 = arith.constant 3.200000e+01 : f32
    %461 = vector.broadcast %cst_191 : f32 to vector<8x1xf32>
    %462 = arith.divf %460, %461 : vector<8x1xf32>
    %463 = vector.broadcast %462 : vector<8x1xf32> to vector<8x32xf32>
    %464 = arith.subf %458, %463 : vector<8x32xf32>
    %465 = arith.mulf %464, %464 : vector<8x32xf32>
    %cst_192 = arith.constant dense<0.000000e+00> : vector<8xf32>
    %466 = vector.multi_reduction <add>, %465, %cst_192 [1] : vector<8x32xf32> to vector<8xf32>
    %467 = vector.shape_cast %466 : vector<8xf32> to vector<8x1xf32>
    %cst_193 = arith.constant 3.200000e+01 : f32
    %468 = vector.broadcast %cst_193 : f32 to vector<8x1xf32>
    %469 = arith.divf %467, %468 : vector<8x1xf32>
    %cst_194 = arith.constant 9.99999974E-6 : f32
    %470 = vector.broadcast %cst_194 : f32 to vector<8x1xf32>
    %471 = arith.addf %469, %470 : vector<8x1xf32>
    %472 = math.rsqrt %471 : vector<8x1xf32>
    %473 = vector.broadcast %472 : vector<8x1xf32> to vector<8x32xf32>
    %474 = arith.mulf %464, %473 : vector<8x32xf32>
    %475 = vector.broadcast %288 : vector<1x32xf32> to vector<8x32xf32>
    %476 = arith.mulf %474, %475 : vector<8x32xf32>
    %477 = vector.broadcast %289 : vector<1x32xf32> to vector<8x32xf32>
    %478 = arith.addf %476, %477 : vector<8x32xf32>
    %c0_195 = arith.constant 0 : index
    %c0_196 = arith.constant 0 : index
    %479 = vector.load %arg51[%c0_195, %c0_196] : memref<32x64xf32, #tpu.memory_space<vmem>>, vector<32x64xf32>
    %c0_197 = arith.constant 0 : index
    %c0_198 = arith.constant 0 : index
    %480 = vector.load %arg52[%c0_197, %c0_198] : memref<1x64xf32, #tpu.memory_space<vmem>>, vector<1x64xf32>
    %c0_199 = arith.constant 0 : index
    %c0_200 = arith.constant 0 : index
    %481 = vector.load %arg53[%c0_199, %c0_200] : memref<32x32xf32, #tpu.memory_space<vmem>>, vector<32x32xf32>
    %c0_201 = arith.constant 0 : index
    %c0_202 = arith.constant 0 : index
    %482 = vector.load %arg54[%c0_201, %c0_202] : memref<1x32xf32, #tpu.memory_space<vmem>>, vector<1x32xf32>
    %c0_203 = arith.constant 0 : index
    %c0_204 = arith.constant 0 : index
    %483 = vector.load %arg55[%c0_203, %c0_204] : memref<1x32xf32, #tpu.memory_space<vmem>>, vector<1x32xf32>
    %c0_205 = arith.constant 0 : index
    %c0_206 = arith.constant 0 : index
    %484 = vector.load %arg56[%c0_205, %c0_206] : memref<1x32xf32, #tpu.memory_space<vmem>>, vector<1x32xf32>
    %c0_207 = arith.constant 0 : index
    %c0_208 = arith.constant 0 : index
    %485 = vector.load %arg57[%c0_207, %c0_208] : memref<32x32xf32, #tpu.memory_space<vmem>>, vector<32x32xf32>
    %c0_209 = arith.constant 0 : index
    %c0_210 = arith.constant 0 : index
    %486 = vector.load %arg58[%c0_209, %c0_210] : memref<1x32xf32, #tpu.memory_space<vmem>>, vector<1x32xf32>
    %c0_211 = arith.constant 0 : index
    %c0_212 = arith.constant 0 : index
    %487 = vector.load %arg59[%c0_211, %c0_212] : memref<32x32xf32, #tpu.memory_space<vmem>>, vector<32x32xf32>
    %c0_213 = arith.constant 0 : index
    %c0_214 = arith.constant 0 : index
    %488 = vector.load %arg60[%c0_213, %c0_214] : memref<1x32xf32, #tpu.memory_space<vmem>>, vector<1x32xf32>
    %c0_215 = arith.constant 0 : index
    %c0_216 = arith.constant 0 : index
    %489 = vector.load %arg61[%c0_215, %c0_216] : memref<32x32xf32, #tpu.memory_space<vmem>>, vector<32x32xf32>
    %c0_217 = arith.constant 0 : index
    %c0_218 = arith.constant 0 : index
    %490 = vector.load %arg62[%c0_217, %c0_218] : memref<1x32xf32, #tpu.memory_space<vmem>>, vector<1x32xf32>
    %c0_219 = arith.constant 0 : index
    %c0_220 = arith.constant 0 : index
    %491 = vector.load %arg63[%c0_219, %c0_220] : memref<1x32xf32, #tpu.memory_space<vmem>>, vector<1x32xf32>
    %c0_221 = arith.constant 0 : index
    %c0_222 = arith.constant 0 : index
    %492 = vector.load %arg64[%c0_221, %c0_222] : memref<1x32xf32, #tpu.memory_space<vmem>>, vector<1x32xf32>
    %c0_223 = arith.constant 0 : index
    %c0_224 = arith.constant 0 : index
    %493 = vector.load %arg65[%c0_223, %c0_224] : memref<32x64xf32, #tpu.memory_space<vmem>>, vector<32x64xf32>
    %c0_225 = arith.constant 0 : index
    %c0_226 = arith.constant 0 : index
    %494 = vector.load %arg66[%c0_225, %c0_226] : memref<1x64xf32, #tpu.memory_space<vmem>>, vector<1x64xf32>
    %c0_227 = arith.constant 0 : index
    %c0_228 = arith.constant 0 : index
    %495 = vector.load %arg67[%c0_227, %c0_228] : memref<64x32xf32, #tpu.memory_space<vmem>>, vector<64x32xf32>
    %c0_229 = arith.constant 0 : index
    %c0_230 = arith.constant 0 : index
    %496 = vector.load %arg68[%c0_229, %c0_230] : memref<1x32xf32, #tpu.memory_space<vmem>>, vector<1x32xf32>
    %c0_231 = arith.constant 0 : index
    %c0_232 = arith.constant 0 : index
    %497 = vector.load %arg69[%c0_231, %c0_232] : memref<1x32xf32, #tpu.memory_space<vmem>>, vector<1x32xf32>
    %c0_233 = arith.constant 0 : index
    %c0_234 = arith.constant 0 : index
    %498 = vector.load %arg70[%c0_233, %c0_234] : memref<1x32xf32, #tpu.memory_space<vmem>>, vector<1x32xf32>
    %cst_235 = arith.constant dense<0.000000e+00> : vector<8x64xf32>
    %499 = tpu.matmul %478, %479, %cst_235 {dimension_numbers = #tpu.dot_dimension_numbers<[1], [0], [0], [1], [0, 0, 1, 1], [], []>} : vector<8x32xf32>, vector<32x64xf32>, vector<8x64xf32> -> vector<8x64xf32>
    %500 = vector.broadcast %480 : vector<1x64xf32> to vector<8x64xf32>
    %501 = arith.addf %499, %500 : vector<8x64xf32>
    %502 = vector.extract_strided_slice %501 {offsets = [0, 0], sizes = [8, 16], strides = [1, 1]} : vector<8x64xf32> to vector<8x16xf32>
    %503 = vector.extract_strided_slice %502 {offsets = [0, 0], sizes = [4, 8], strides = [1, 1]} : vector<8x16xf32> to vector<4x8xf32>
    %504 = vector.extract_strided_slice %502 {offsets = [0, 8], sizes = [4, 8], strides = [1, 1]} : vector<8x16xf32> to vector<4x8xf32>
    %505 = tpu.concatenate %503, %504 in 0 : vector<4x8xf32>, vector<4x8xf32> -> vector<8x8xf32>
    %506 = vector.extract_strided_slice %502 {offsets = [4, 0], sizes = [4, 8], strides = [1, 1]} : vector<8x16xf32> to vector<4x8xf32>
    %507 = vector.extract_strided_slice %502 {offsets = [4, 8], sizes = [4, 8], strides = [1, 1]} : vector<8x16xf32> to vector<4x8xf32>
    %508 = tpu.concatenate %506, %507 in 0 : vector<4x8xf32>, vector<4x8xf32> -> vector<8x8xf32>
    %509 = vector.extract_strided_slice %501 {offsets = [0, 16], sizes = [8, 16], strides = [1, 1]} : vector<8x64xf32> to vector<8x16xf32>
    %510 = vector.extract_strided_slice %509 {offsets = [0, 0], sizes = [4, 8], strides = [1, 1]} : vector<8x16xf32> to vector<4x8xf32>
    %511 = vector.extract_strided_slice %509 {offsets = [0, 8], sizes = [4, 8], strides = [1, 1]} : vector<8x16xf32> to vector<4x8xf32>
    %512 = tpu.concatenate %510, %511 in 0 : vector<4x8xf32>, vector<4x8xf32> -> vector<8x8xf32>
    %513 = vector.extract_strided_slice %509 {offsets = [4, 0], sizes = [4, 8], strides = [1, 1]} : vector<8x16xf32> to vector<4x8xf32>
    %514 = vector.extract_strided_slice %509 {offsets = [4, 8], sizes = [4, 8], strides = [1, 1]} : vector<8x16xf32> to vector<4x8xf32>
    %515 = tpu.concatenate %513, %514 in 0 : vector<4x8xf32>, vector<4x8xf32> -> vector<8x8xf32>
    %516 = vector.extract_strided_slice %501 {offsets = [0, 32], sizes = [8, 32], strides = [1, 1]} : vector<8x64xf32> to vector<8x32xf32>
    %517 = vector.extract_strided_slice %516 {offsets = [0, 0], sizes = [4, 8], strides = [1, 1]} : vector<8x32xf32> to vector<4x8xf32>
    %518 = vector.extract_strided_slice %516 {offsets = [0, 8], sizes = [4, 8], strides = [1, 1]} : vector<8x32xf32> to vector<4x8xf32>
    %519 = vector.extract_strided_slice %516 {offsets = [0, 16], sizes = [4, 8], strides = [1, 1]} : vector<8x32xf32> to vector<4x8xf32>
    %520 = vector.extract_strided_slice %516 {offsets = [0, 24], sizes = [4, 8], strides = [1, 1]} : vector<8x32xf32> to vector<4x8xf32>
    %521 = tpu.concatenate %517, %518, %519, %520 in 0 : vector<4x8xf32>, vector<4x8xf32>, vector<4x8xf32>, vector<4x8xf32> -> vector<16x8xf32>
    %522 = vector.extract_strided_slice %516 {offsets = [4, 0], sizes = [4, 8], strides = [1, 1]} : vector<8x32xf32> to vector<4x8xf32>
    %523 = vector.extract_strided_slice %516 {offsets = [4, 8], sizes = [4, 8], strides = [1, 1]} : vector<8x32xf32> to vector<4x8xf32>
    %524 = vector.extract_strided_slice %516 {offsets = [4, 16], sizes = [4, 8], strides = [1, 1]} : vector<8x32xf32> to vector<4x8xf32>
    %525 = vector.extract_strided_slice %516 {offsets = [4, 24], sizes = [4, 8], strides = [1, 1]} : vector<8x32xf32> to vector<4x8xf32>
    %526 = tpu.concatenate %522, %523, %524, %525 in 0 : vector<4x8xf32>, vector<4x8xf32>, vector<4x8xf32>, vector<4x8xf32> -> vector<16x8xf32>
    %cst_236 = arith.constant dense<0.000000e+00> : vector<8x8xf32>
    %527 = tpu.matmul %5, %505, %cst_236 {dimension_numbers = #tpu.dot_dimension_numbers<[1], [1], [0], [0], [0, 0, 1, 0], [], []>} : vector<8x8xf32>, vector<8x8xf32>, vector<8x8xf32> -> vector<8x8xf32>
    %cst_237 = arith.constant dense<0.000000e+00> : vector<8x8xf32>
    %528 = tpu.matmul %527, %512, %cst_237 {dimension_numbers = #tpu.dot_dimension_numbers<[1], [0], [0], [1], [0, 0, 1, 1], [], []>} : vector<8x8xf32>, vector<8x8xf32>, vector<8x8xf32> -> vector<8x8xf32>
    %cst_238 = arith.constant dense<0xFF800000> : vector<8xf32>
    %529 = vector.multi_reduction <maximumf>, %528, %cst_238 [1] : vector<8x8xf32> to vector<8xf32>
    %530 = vector.shape_cast %529 : vector<8xf32> to vector<8x1xf32>
    %531 = vector.broadcast %530 : vector<8x1xf32> to vector<8x8xf32>
    %532 = arith.subf %528, %531 : vector<8x8xf32>
    %533 = math.exp %532 : vector<8x8xf32>
    %cst_239 = arith.constant dense<0.000000e+00> : vector<8xf32>
    %534 = vector.multi_reduction <add>, %533, %cst_239 [1] : vector<8x8xf32> to vector<8xf32>
    %535 = vector.shape_cast %534 : vector<8xf32> to vector<8x1xf32>
    %536 = tpu.reciprocal %535 {approx = true} : vector<8x1xf32> -> vector<8x1xf32>
    %537 = vector.broadcast %536 : vector<8x1xf32> to vector<8x8xf32>
    %538 = arith.mulf %533, %537 : vector<8x8xf32>
    %cst_240 = arith.constant dense<0.000000e+00> : vector<8x16xf32>
    %539 = tpu.matmul %538, %521, %cst_240 {dimension_numbers = #tpu.dot_dimension_numbers<[1], [1], [0], [0], [0, 0, 1, 0], [], []>} : vector<8x8xf32>, vector<16x8xf32>, vector<8x16xf32> -> vector<8x16xf32>
    %cst_241 = arith.constant dense<0.000000e+00> : vector<8x8xf32>
    %540 = tpu.matmul %5, %508, %cst_241 {dimension_numbers = #tpu.dot_dimension_numbers<[1], [1], [0], [0], [0, 0, 1, 0], [], []>} : vector<8x8xf32>, vector<8x8xf32>, vector<8x8xf32> -> vector<8x8xf32>
    %cst_242 = arith.constant dense<0.000000e+00> : vector<8x8xf32>
    %541 = tpu.matmul %540, %515, %cst_242 {dimension_numbers = #tpu.dot_dimension_numbers<[1], [0], [0], [1], [0, 0, 1, 1], [], []>} : vector<8x8xf32>, vector<8x8xf32>, vector<8x8xf32> -> vector<8x8xf32>
    %cst_243 = arith.constant dense<0xFF800000> : vector<8xf32>
    %542 = vector.multi_reduction <maximumf>, %541, %cst_243 [1] : vector<8x8xf32> to vector<8xf32>
    %543 = vector.shape_cast %542 : vector<8xf32> to vector<8x1xf32>
    %544 = vector.broadcast %543 : vector<8x1xf32> to vector<8x8xf32>
    %545 = arith.subf %541, %544 : vector<8x8xf32>
    %546 = math.exp %545 : vector<8x8xf32>
    %cst_244 = arith.constant dense<0.000000e+00> : vector<8xf32>
    %547 = vector.multi_reduction <add>, %546, %cst_244 [1] : vector<8x8xf32> to vector<8xf32>
    %548 = vector.shape_cast %547 : vector<8xf32> to vector<8x1xf32>
    %549 = tpu.reciprocal %548 {approx = true} : vector<8x1xf32> -> vector<8x1xf32>
    %550 = vector.broadcast %549 : vector<8x1xf32> to vector<8x8xf32>
    %551 = arith.mulf %546, %550 : vector<8x8xf32>
    %cst_245 = arith.constant dense<0.000000e+00> : vector<8x16xf32>
    %552 = tpu.matmul %551, %526, %cst_245 {dimension_numbers = #tpu.dot_dimension_numbers<[1], [1], [0], [0], [0, 0, 1, 0], [], []>} : vector<8x8xf32>, vector<16x8xf32>, vector<8x16xf32> -> vector<8x16xf32>
    %553 = tpu.concatenate %539, %552 in 1 : vector<8x16xf32>, vector<8x16xf32> -> vector<8x32xf32>
    %cst_246 = arith.constant dense<0.000000e+00> : vector<8x32xf32>
    %554 = tpu.matmul %553, %481, %cst_246 {dimension_numbers = #tpu.dot_dimension_numbers<[1], [0], [0], [1], [0, 0, 1, 1], [], []>} : vector<8x32xf32>, vector<32x32xf32>, vector<8x32xf32> -> vector<8x32xf32>
    %555 = vector.broadcast %482 : vector<1x32xf32> to vector<8x32xf32>
    %556 = arith.addf %554, %555 : vector<8x32xf32>
    %557 = arith.addf %556, %478 : vector<8x32xf32>
    %cst_247 = arith.constant dense<0.000000e+00> : vector<8xf32>
    %558 = vector.multi_reduction <add>, %557, %cst_247 [1] : vector<8x32xf32> to vector<8xf32>
    %559 = vector.shape_cast %558 : vector<8xf32> to vector<8x1xf32>
    %cst_248 = arith.constant 3.200000e+01 : f32
    %560 = vector.broadcast %cst_248 : f32 to vector<8x1xf32>
    %561 = arith.divf %559, %560 : vector<8x1xf32>
    %562 = vector.broadcast %561 : vector<8x1xf32> to vector<8x32xf32>
    %563 = arith.subf %557, %562 : vector<8x32xf32>
    %564 = arith.mulf %563, %563 : vector<8x32xf32>
    %cst_249 = arith.constant dense<0.000000e+00> : vector<8xf32>
    %565 = vector.multi_reduction <add>, %564, %cst_249 [1] : vector<8x32xf32> to vector<8xf32>
    %566 = vector.shape_cast %565 : vector<8xf32> to vector<8x1xf32>
    %cst_250 = arith.constant 3.200000e+01 : f32
    %567 = vector.broadcast %cst_250 : f32 to vector<8x1xf32>
    %568 = arith.divf %566, %567 : vector<8x1xf32>
    %cst_251 = arith.constant 9.99999974E-6 : f32
    %569 = vector.broadcast %cst_251 : f32 to vector<8x1xf32>
    %570 = arith.addf %568, %569 : vector<8x1xf32>
    %571 = math.rsqrt %570 : vector<8x1xf32>
    %572 = vector.broadcast %571 : vector<8x1xf32> to vector<8x32xf32>
    %573 = arith.mulf %563, %572 : vector<8x32xf32>
    %574 = vector.broadcast %483 : vector<1x32xf32> to vector<8x32xf32>
    %575 = arith.mulf %573, %574 : vector<8x32xf32>
    %576 = vector.broadcast %484 : vector<1x32xf32> to vector<8x32xf32>
    %577 = arith.addf %575, %576 : vector<8x32xf32>
    %cst_252 = arith.constant dense<0.000000e+00> : vector<8x32xf32>
    %578 = tpu.matmul %29, %485, %cst_252 {dimension_numbers = #tpu.dot_dimension_numbers<[1], [0], [0], [1], [0, 0, 1, 1], [], []>} : vector<8x32xf32>, vector<32x32xf32>, vector<8x32xf32> -> vector<8x32xf32>
    %579 = vector.broadcast %486 : vector<1x32xf32> to vector<8x32xf32>
    %580 = arith.addf %578, %579 : vector<8x32xf32>
    %cst_253 = arith.constant dense<0.000000e+00> : vector<8x32xf32>
    %581 = tpu.matmul %577, %487, %cst_253 {dimension_numbers = #tpu.dot_dimension_numbers<[1], [0], [0], [1], [0, 0, 1, 1], [], []>} : vector<8x32xf32>, vector<32x32xf32>, vector<8x32xf32> -> vector<8x32xf32>
    %582 = vector.broadcast %488 : vector<1x32xf32> to vector<8x32xf32>
    %583 = arith.addf %581, %582 : vector<8x32xf32>
    %584 = vector.extract_strided_slice %580 {offsets = [0, 0], sizes = [8, 16], strides = [1, 1]} : vector<8x32xf32> to vector<8x16xf32>
    %585 = vector.extract_strided_slice %584 {offsets = [0, 0], sizes = [4, 8], strides = [1, 1]} : vector<8x16xf32> to vector<4x8xf32>
    %586 = vector.extract_strided_slice %584 {offsets = [0, 8], sizes = [4, 8], strides = [1, 1]} : vector<8x16xf32> to vector<4x8xf32>
    %587 = tpu.concatenate %585, %586 in 0 : vector<4x8xf32>, vector<4x8xf32> -> vector<8x8xf32>
    %588 = vector.extract_strided_slice %584 {offsets = [4, 0], sizes = [4, 8], strides = [1, 1]} : vector<8x16xf32> to vector<4x8xf32>
    %589 = vector.extract_strided_slice %584 {offsets = [4, 8], sizes = [4, 8], strides = [1, 1]} : vector<8x16xf32> to vector<4x8xf32>
    %590 = tpu.concatenate %588, %589 in 0 : vector<4x8xf32>, vector<4x8xf32> -> vector<8x8xf32>
    %591 = vector.extract_strided_slice %580 {offsets = [0, 16], sizes = [8, 16], strides = [1, 1]} : vector<8x32xf32> to vector<8x16xf32>
    %592 = vector.extract_strided_slice %591 {offsets = [0, 0], sizes = [4, 8], strides = [1, 1]} : vector<8x16xf32> to vector<4x8xf32>
    %593 = vector.extract_strided_slice %591 {offsets = [0, 8], sizes = [4, 8], strides = [1, 1]} : vector<8x16xf32> to vector<4x8xf32>
    %594 = tpu.concatenate %592, %593 in 0 : vector<4x8xf32>, vector<4x8xf32> -> vector<8x8xf32>
    %595 = vector.extract_strided_slice %591 {offsets = [4, 0], sizes = [4, 8], strides = [1, 1]} : vector<8x16xf32> to vector<4x8xf32>
    %596 = vector.extract_strided_slice %591 {offsets = [4, 8], sizes = [4, 8], strides = [1, 1]} : vector<8x16xf32> to vector<4x8xf32>
    %597 = tpu.concatenate %595, %596 in 0 : vector<4x8xf32>, vector<4x8xf32> -> vector<8x8xf32>
    %598 = vector.extract_strided_slice %583 {offsets = [0, 0], sizes = [4, 8], strides = [1, 1]} : vector<8x32xf32> to vector<4x8xf32>
    %599 = vector.extract_strided_slice %583 {offsets = [0, 8], sizes = [4, 8], strides = [1, 1]} : vector<8x32xf32> to vector<4x8xf32>
    %600 = vector.extract_strided_slice %583 {offsets = [0, 16], sizes = [4, 8], strides = [1, 1]} : vector<8x32xf32> to vector<4x8xf32>
    %601 = vector.extract_strided_slice %583 {offsets = [0, 24], sizes = [4, 8], strides = [1, 1]} : vector<8x32xf32> to vector<4x8xf32>
    %602 = tpu.concatenate %598, %599, %600, %601 in 0 : vector<4x8xf32>, vector<4x8xf32>, vector<4x8xf32>, vector<4x8xf32> -> vector<16x8xf32>
    %603 = vector.extract_strided_slice %583 {offsets = [4, 0], sizes = [4, 8], strides = [1, 1]} : vector<8x32xf32> to vector<4x8xf32>
    %604 = vector.extract_strided_slice %583 {offsets = [4, 8], sizes = [4, 8], strides = [1, 1]} : vector<8x32xf32> to vector<4x8xf32>
    %605 = vector.extract_strided_slice %583 {offsets = [4, 16], sizes = [4, 8], strides = [1, 1]} : vector<8x32xf32> to vector<4x8xf32>
    %606 = vector.extract_strided_slice %583 {offsets = [4, 24], sizes = [4, 8], strides = [1, 1]} : vector<8x32xf32> to vector<4x8xf32>
    %607 = tpu.concatenate %603, %604, %605, %606 in 0 : vector<4x8xf32>, vector<4x8xf32>, vector<4x8xf32>, vector<4x8xf32> -> vector<16x8xf32>
    %cst_254 = arith.constant dense<0.000000e+00> : vector<8x8xf32>
    %608 = tpu.matmul %5, %587, %cst_254 {dimension_numbers = #tpu.dot_dimension_numbers<[1], [1], [0], [0], [0, 0, 1, 0], [], []>} : vector<8x8xf32>, vector<8x8xf32>, vector<8x8xf32> -> vector<8x8xf32>
    %cst_255 = arith.constant dense<0.000000e+00> : vector<8x8xf32>
    %609 = tpu.matmul %608, %594, %cst_255 {dimension_numbers = #tpu.dot_dimension_numbers<[1], [0], [0], [1], [0, 0, 1, 1], [], []>} : vector<8x8xf32>, vector<8x8xf32>, vector<8x8xf32> -> vector<8x8xf32>
    %cst_256 = arith.constant dense<0xFF800000> : vector<8xf32>
    %610 = vector.multi_reduction <maximumf>, %609, %cst_256 [1] : vector<8x8xf32> to vector<8xf32>
    %611 = vector.shape_cast %610 : vector<8xf32> to vector<8x1xf32>
    %612 = vector.broadcast %611 : vector<8x1xf32> to vector<8x8xf32>
    %613 = arith.subf %609, %612 : vector<8x8xf32>
    %614 = math.exp %613 : vector<8x8xf32>
    %cst_257 = arith.constant dense<0.000000e+00> : vector<8xf32>
    %615 = vector.multi_reduction <add>, %614, %cst_257 [1] : vector<8x8xf32> to vector<8xf32>
    %616 = vector.shape_cast %615 : vector<8xf32> to vector<8x1xf32>
    %617 = tpu.reciprocal %616 {approx = true} : vector<8x1xf32> -> vector<8x1xf32>
    %618 = vector.broadcast %617 : vector<8x1xf32> to vector<8x8xf32>
    %619 = arith.mulf %614, %618 : vector<8x8xf32>
    %cst_258 = arith.constant dense<0.000000e+00> : vector<8x16xf32>
    %620 = tpu.matmul %619, %602, %cst_258 {dimension_numbers = #tpu.dot_dimension_numbers<[1], [1], [0], [0], [0, 0, 1, 0], [], []>} : vector<8x8xf32>, vector<16x8xf32>, vector<8x16xf32> -> vector<8x16xf32>
    %cst_259 = arith.constant dense<0.000000e+00> : vector<8x8xf32>
    %621 = tpu.matmul %5, %590, %cst_259 {dimension_numbers = #tpu.dot_dimension_numbers<[1], [1], [0], [0], [0, 0, 1, 0], [], []>} : vector<8x8xf32>, vector<8x8xf32>, vector<8x8xf32> -> vector<8x8xf32>
    %cst_260 = arith.constant dense<0.000000e+00> : vector<8x8xf32>
    %622 = tpu.matmul %621, %597, %cst_260 {dimension_numbers = #tpu.dot_dimension_numbers<[1], [0], [0], [1], [0, 0, 1, 1], [], []>} : vector<8x8xf32>, vector<8x8xf32>, vector<8x8xf32> -> vector<8x8xf32>
    %cst_261 = arith.constant dense<0xFF800000> : vector<8xf32>
    %623 = vector.multi_reduction <maximumf>, %622, %cst_261 [1] : vector<8x8xf32> to vector<8xf32>
    %624 = vector.shape_cast %623 : vector<8xf32> to vector<8x1xf32>
    %625 = vector.broadcast %624 : vector<8x1xf32> to vector<8x8xf32>
    %626 = arith.subf %622, %625 : vector<8x8xf32>
    %627 = math.exp %626 : vector<8x8xf32>
    %cst_262 = arith.constant dense<0.000000e+00> : vector<8xf32>
    %628 = vector.multi_reduction <add>, %627, %cst_262 [1] : vector<8x8xf32> to vector<8xf32>
    %629 = vector.shape_cast %628 : vector<8xf32> to vector<8x1xf32>
    %630 = tpu.reciprocal %629 {approx = true} : vector<8x1xf32> -> vector<8x1xf32>
    %631 = vector.broadcast %630 : vector<8x1xf32> to vector<8x8xf32>
    %632 = arith.mulf %627, %631 : vector<8x8xf32>
    %cst_263 = arith.constant dense<0.000000e+00> : vector<8x16xf32>
    %633 = tpu.matmul %632, %607, %cst_263 {dimension_numbers = #tpu.dot_dimension_numbers<[1], [1], [0], [0], [0, 0, 1, 0], [], []>} : vector<8x8xf32>, vector<16x8xf32>, vector<8x16xf32> -> vector<8x16xf32>
    %634 = tpu.concatenate %620, %633 in 1 : vector<8x16xf32>, vector<8x16xf32> -> vector<8x32xf32>
    %cst_264 = arith.constant dense<0.000000e+00> : vector<8x32xf32>
    %635 = tpu.matmul %634, %489, %cst_264 {dimension_numbers = #tpu.dot_dimension_numbers<[1], [0], [0], [1], [0, 0, 1, 1], [], []>} : vector<8x32xf32>, vector<32x32xf32>, vector<8x32xf32> -> vector<8x32xf32>
    %636 = vector.broadcast %490 : vector<1x32xf32> to vector<8x32xf32>
    %637 = arith.addf %635, %636 : vector<8x32xf32>
    %638 = arith.addf %637, %577 : vector<8x32xf32>
    %cst_265 = arith.constant dense<0.000000e+00> : vector<8xf32>
    %639 = vector.multi_reduction <add>, %638, %cst_265 [1] : vector<8x32xf32> to vector<8xf32>
    %640 = vector.shape_cast %639 : vector<8xf32> to vector<8x1xf32>
    %cst_266 = arith.constant 3.200000e+01 : f32
    %641 = vector.broadcast %cst_266 : f32 to vector<8x1xf32>
    %642 = arith.divf %640, %641 : vector<8x1xf32>
    %643 = vector.broadcast %642 : vector<8x1xf32> to vector<8x32xf32>
    %644 = arith.subf %638, %643 : vector<8x32xf32>
    %645 = arith.mulf %644, %644 : vector<8x32xf32>
    %cst_267 = arith.constant dense<0.000000e+00> : vector<8xf32>
    %646 = vector.multi_reduction <add>, %645, %cst_267 [1] : vector<8x32xf32> to vector<8xf32>
    %647 = vector.shape_cast %646 : vector<8xf32> to vector<8x1xf32>
    %cst_268 = arith.constant 3.200000e+01 : f32
    %648 = vector.broadcast %cst_268 : f32 to vector<8x1xf32>
    %649 = arith.divf %647, %648 : vector<8x1xf32>
    %cst_269 = arith.constant 9.99999974E-6 : f32
    %650 = vector.broadcast %cst_269 : f32 to vector<8x1xf32>
    %651 = arith.addf %649, %650 : vector<8x1xf32>
    %652 = math.rsqrt %651 : vector<8x1xf32>
    %653 = vector.broadcast %652 : vector<8x1xf32> to vector<8x32xf32>
    %654 = arith.mulf %644, %653 : vector<8x32xf32>
    %655 = vector.broadcast %491 : vector<1x32xf32> to vector<8x32xf32>
    %656 = arith.mulf %654, %655 : vector<8x32xf32>
    %657 = vector.broadcast %492 : vector<1x32xf32> to vector<8x32xf32>
    %658 = arith.addf %656, %657 : vector<8x32xf32>
    %cst_270 = arith.constant dense<0.000000e+00> : vector<8x64xf32>
    %659 = tpu.matmul %658, %493, %cst_270 {dimension_numbers = #tpu.dot_dimension_numbers<[1], [0], [0], [1], [0, 0, 1, 1], [], []>} : vector<8x32xf32>, vector<32x64xf32>, vector<8x64xf32> -> vector<8x64xf32>
    %660 = vector.broadcast %494 : vector<1x64xf32> to vector<8x64xf32>
    %661 = arith.addf %659, %660 : vector<8x64xf32>
    %cst_271 = arith.constant 0.000000e+00 : f32
    %662 = vector.broadcast %cst_271 : f32 to vector<8x64xf32>
    %663 = arith.maximumf %661, %662 : vector<8x64xf32>
    %cst_272 = arith.constant dense<0.000000e+00> : vector<8x32xf32>
    %664 = tpu.matmul %663, %495, %cst_272 {dimension_numbers = #tpu.dot_dimension_numbers<[1], [0], [0], [1], [0, 0, 1, 1], [], []>} : vector<8x64xf32>, vector<64x32xf32>, vector<8x32xf32> -> vector<8x32xf32>
    %665 = vector.broadcast %496 : vector<1x32xf32> to vector<8x32xf32>
    %666 = arith.addf %664, %665 : vector<8x32xf32>
    %667 = arith.addf %666, %658 : vector<8x32xf32>
    %cst_273 = arith.constant dense<0.000000e+00> : vector<8xf32>
    %668 = vector.multi_reduction <add>, %667, %cst_273 [1] : vector<8x32xf32> to vector<8xf32>
    %669 = vector.shape_cast %668 : vector<8xf32> to vector<8x1xf32>
    %cst_274 = arith.constant 3.200000e+01 : f32
    %670 = vector.broadcast %cst_274 : f32 to vector<8x1xf32>
    %671 = arith.divf %669, %670 : vector<8x1xf32>
    %672 = vector.broadcast %671 : vector<8x1xf32> to vector<8x32xf32>
    %673 = arith.subf %667, %672 : vector<8x32xf32>
    %674 = arith.mulf %673, %673 : vector<8x32xf32>
    %cst_275 = arith.constant dense<0.000000e+00> : vector<8xf32>
    %675 = vector.multi_reduction <add>, %674, %cst_275 [1] : vector<8x32xf32> to vector<8xf32>
    %676 = vector.shape_cast %675 : vector<8xf32> to vector<8x1xf32>
    %cst_276 = arith.constant 3.200000e+01 : f32
    %677 = vector.broadcast %cst_276 : f32 to vector<8x1xf32>
    %678 = arith.divf %676, %677 : vector<8x1xf32>
    %cst_277 = arith.constant 9.99999974E-6 : f32
    %679 = vector.broadcast %cst_277 : f32 to vector<8x1xf32>
    %680 = arith.addf %678, %679 : vector<8x1xf32>
    %681 = math.rsqrt %680 : vector<8x1xf32>
    %682 = vector.broadcast %681 : vector<8x1xf32> to vector<8x32xf32>
    %683 = arith.mulf %673, %682 : vector<8x32xf32>
    %684 = vector.broadcast %497 : vector<1x32xf32> to vector<8x32xf32>
    %685 = arith.mulf %683, %684 : vector<8x32xf32>
    %686 = vector.broadcast %498 : vector<1x32xf32> to vector<8x32xf32>
    %687 = arith.addf %685, %686 : vector<8x32xf32>
    %c0_278 = arith.constant 0 : index
    %c0_279 = arith.constant 0 : index
    %688 = vector.load %arg71[%c0_278, %c0_279] : memref<32x128xf32, #tpu.memory_space<vmem>>, vector<32x128xf32>
    %cst_280 = arith.constant dense<0.000000e+00> : vector<8x128xf32>
    %689 = tpu.matmul %687, %688, %cst_280 {dimension_numbers = #tpu.dot_dimension_numbers<[1], [0], [0], [1], [0, 0, 1, 1], [], []>} : vector<8x32xf32>, vector<32x128xf32>, vector<8x128xf32> -> vector<8x128xf32>
    %c0_281 = arith.constant 0 : index
    %c0_282 = arith.constant 0 : index
    %690 = vector.load %arg72[%c0_281, %c0_282] : memref<1x128xf32, #tpu.memory_space<vmem>>, vector<1x128xf32>
    %691 = vector.broadcast %690 : vector<1x128xf32> to vector<8x128xf32>
    %692 = arith.addf %689, %691 : vector<8x128xf32>
    %c0_283 = arith.constant 0 : index
    %c0_284 = arith.constant 0 : index
    %693 = vector.load %arg73[%c0_283, %c0_284] : memref<8x128xf32, #tpu.memory_space<vmem>>, vector<8x128xf32>
    tpu.vector_store %arg73[%c0_283, %c0_284], %692 {strides = array<i32>} : memref<8x128xf32, #tpu.memory_space<vmem>>, vector<8x128xf32>,
    return
  }
}

</mosaic_0001>

<bundles_post_ra>
// kernel: forward.1
= control target key start
LH: loop header
LB: loop body
LE: loop exit
PB: predicated region body
PF: predicated region fallthrough
CT: control target
= control target key end

     0   :  { %s8156_s6 = smov 1   ;;  %s8157_s10 = smov 2   ;;  %s9417_s0 = inlined_call_operand.smem [shape: u32[74], index: -1, kind: input, shape index: {}] }
   0x1   :  { %s8281_s5 = sld [smem:[%s9417_s0]]   ;;  %s8158_s14 = smov 3  }
   0x2   :  { %s8286_s9 = sld [smem:[%s9417_s0 + %s8156_s6]]   ;;  %s8159_s18 = smov 4  }
   0x3   :  { %s8291_s13 = sld [smem:[%s9417_s0 + %s8157_s10]]   ;;  %s8160_s22 = smov 5  }
   0x4   :  { %s8296_s17 = sld [smem:[%s9417_s0 + %s8158_s14]]   ;;  %s8161_s26 = smov 6  }
   0x5   :  { %s8301_s21 = sld [smem:[%s9417_s0 + %s8159_s18]]   ;;  %s8162_s30 = smov 7  }
   0x6   :  { %s8306_s25 = sld [smem:[%s9417_s0 + %s8160_s22]]   ;;  %s8163_s4 = smov 8  }
   0x7   :  { %9440 = sst [smem:[#allocation72_spill]] %s8281_s5  ;;  %s8164_s10 = smov 9  }
   0x8   :  { %9441 = sst [smem:[#allocation73_spill]] %s8286_s9  ;;  %s8165_s15 = smov 10  }
   0x9   :  { %9442 = sst [smem:[#allocation74_spill]] %s8291_s13  ;;  %s8166_s20 = smov 11  }
   0xa   :  { %9443 = sst [smem:[#allocation75_spill]] %s8296_s17  ;;  %s8168_s1 = smov 13  }
   0xb   :  { %9444 = sst [smem:[#allocation76_spill]] %s8301_s21  ;;  %s8169_s7 = smov 14  }
   0xc   :  { %9445 = sst [smem:[#allocation77_spill]] %s8306_s25  ;;  %s8171_s22 = smov 16  }
   0xd   :  { %s8311_s29 = sld [smem:[%s9417_s0 + %s8161_s26]]   ;;  %s8167_s26 = smov 12  }
   0xe   :  { %s8316_s3 = sld [smem:[%s9417_s0 + %s8162_s30]]   ;;  %s8172_s28 = smov 17  }
   0xf   :  { %s8321_s8 = sld [smem:[%s9417_s0 + %s8163_s4]]  }
  0x10   :  { %s8326_s14 = sld [smem:[%s9417_s0 + %s8164_s10]]  }
  0x11   :  { %s8331_s19 = sld [smem:[%s9417_s0 + %s8165_s15]]   ;;  %s8170_s15 = smov 15  }
  0x12   :  { %s8336_s24 = sld [smem:[%s9417_s0 + %s8166_s20]]  }
  0x13   :  { %9446 = sst [smem:[#allocation78_spill]] %s8311_s29 }
  0x14   :  { %9447 = sst [smem:[#allocation79_spill]] %s8316_s3 }
  0x15   :  { %9448 = sst [smem:[#allocation80_spill]] %s8321_s8 }
  0x16   :  { %9449 = sst [smem:[#allocation81_spill]] %s8326_s14 }
  0x17   :  { %9450 = sst [smem:[#allocation82_spill]] %s8331_s19 }
  0x18   :  { %9451 = sst [smem:[#allocation83_spill]] %s8336_s24 }
  0x19   :  { %s8341_s30 = sld [smem:[%s9417_s0 + %s8167_s26]]  }
  0x1a   :  { %s8346_s6 = sld [smem:[%s9417_s0 + %s8168_s1]]  }
  0x1b   :  { %s8351_s12 = sld [smem:[%s9417_s0 + %s8169_s7]]   ;;  %s8173_s7 = smov 18  }
  0x1c   :  { %s8356_s20 = sld [smem:[%s9417_s0 + %s8170_s15]]   ;;  %s8174_s15 = smov 19  }
  0x1d   :  { %s8361_s27 = sld [smem:[%s9417_s0 + %s8171_s22]]   ;;  %s8175_s22 = smov 20  }
  0x1e   :  { %s8366_s4 = sld [smem:[%s9417_s0 + %s8172_s28]]   ;;  %s8176_s28 = smov 21  }
  0x1f   :  { %9452 = sst [smem:[#allocation84_spill]] %s8341_s30 }
  0x20   :  { %9453 = sst [smem:[#allocation85_spill]] %s8346_s6 }
  0x21   :  { %9454 = sst [smem:[#allocation86_spill]] %s8351_s12 }
  0x22   :  { %9455 = sst [smem:[#allocation87_spill]] %s8356_s20 }
  0x23   :  { %9456 = sst [smem:[#allocation88_spill]] %s8361_s27 }
  0x24   :  { %9457 = sst [smem:[#allocation89_spill]] %s8366_s4 }
  0x25   :  { %s8371_s29 = sld [smem:[%s9417_s0 + %s8173_s7]]   ;;  %s8177_s7 = smov 22  }
  0x26   :  { %s8376_s12 = sld [smem:[%s9417_s0 + %s8174_s15]]   ;;  %s8178_s15 = smov 23  }
  0x27   :  { %s8381_s27 = sld [smem:[%s9417_s0 + %s8175_s22]]   ;;  %s8179_s22 = smov 24  }
  0x28   :  { %s8386_s4 = sld [smem:[%s9417_s0 + %s8176_s28]]   ;;  %s8180_s28 = smov 25  }
  0x2b   :  { %9458 = sst [smem:[#allocation90_spill]] %s8371_s29 }
  0x2c   :  { %9459 = sst [smem:[#allocation91_spill]] %s8376_s12 }
  0x2d   :  { %9460 = sst [smem:[#allocation92_spill]] %s8381_s27 }
  0x2e   :  { %9461 = sst [smem:[#allocation93_spill]] %s8386_s4 }
  0x2f   :  { %s8391_s29 = sld [smem:[%s9417_s0 + %s8177_s7]]   ;;  %s8181_s7 = smov 26  }
  0x30   :  { %s8396_s12 = sld [smem:[%s9417_s0 + %s8178_s15]]   ;;  %s8182_s15 = smov 27  }
  0x31   :  { %s8401_s27 = sld [smem:[%s9417_s0 + %s8179_s22]]   ;;  %s8183_s22 = smov 28  }
  0x32   :  { %s8406_s4 = sld [smem:[%s9417_s0 + %s8180_s28]]   ;;  %s8184_s28 = smov 29  }
  0x35   :  { %9462 = sst [smem:[#allocation94_spill]] %s8391_s29 }
  0x36   :  { %9463 = sst [smem:[#allocation95_spill]] %s8396_s12 }
  0x37   :  { %9464 = sst [smem:[#allocation96_spill]] %s8401_s27 }
  0x38   :  { %9465 = sst [smem:[#allocation97_spill]] %s8406_s4 }
  0x39   :  { %s8411_s29 = sld [smem:[%s9417_s0 + %s8181_s7]]   ;;  %s8185_s7 = smov 30  }
  0x3a   :  { %s8416_s12 = sld [smem:[%s9417_s0 + %s8182_s15]]   ;;  %s8186_s15 = smov 31  }
  0x3b   :  { %s8421_s27 = sld [smem:[%s9417_s0 + %s8183_s22]]   ;;  %s8187_s22 = smov 32  }
  0x3c   :  { %s8426_s4 = sld [smem:[%s9417_s0 + %s8184_s28]]   ;;  %s8188_s28 = smov 33  }
  0x3d   :  { %s8446_s30 = sld [smem:[%s9417_s0 + %s8188_s28]]   ;;  %s8192_s28 = smov 37  }
  0x3f   :  { %9466 = sst [smem:[#allocation98_spill]] %s8411_s29 }
  0x40   :  { %9467 = sst [smem:[#allocation99_spill]] %s8416_s12 }
  0x41   :  { %9468 = sst [smem:[#allocation100_spill]] %s8421_s27 }
  0x42   :  { %9469 = sst [smem:[#allocation101_spill]] %s8426_s4 }
  0x43   :  { %s8431_s29 = sld [smem:[%s9417_s0 + %s8185_s7]]   ;;  %s8189_s7 = smov 34  }
  0x44   :  { %s8436_s12 = sld [smem:[%s9417_s0 + %s8186_s15]]   ;;  %s8190_s15 = smov 35  }
  0x45   :  { %s8441_s27 = sld [smem:[%s9417_s0 + %s8187_s22]]   ;;  %s8191_s22 = smov 36  }
  0x46   :  { %9472 = sst [smem:[#allocation104_spill]] %s8446_s30 }
  0x47   :  { %s8451_s24 = sld [smem:[%s9417_s0 + %s8189_s7]]   ;;  %s8193_s7 = smov 38  }
  0x48   :  { %s8461_s20 = sld [smem:[%s9417_s0 + %s8191_s22]]   ;;  %s8195_s22 = smov 40  }
  0x49   :  { %s8466_s30 = sld [smem:[%s9417_s0 + %s8192_s28]]   ;;  %s8196_s28 = smov 41  }
  0x4a   :  { %9470 = sst [smem:[#allocation102_spill]] %s8436_s12 }
  0x4b   :  { %9471 = sst [smem:[#allocation103_spill]] %s8441_s27 }
  0x4c   :  { %s8456_s12 = sld [smem:[%s9417_s0 + %s8190_s15]]   ;;  %s8194_s15 = smov 39  }
  0x4d   :  { %s8471_s6 = sld [smem:[%s9417_s0 + %s8193_s7]]   ;;  %s8197_s7 = smov 42  }
  0x4e   :  { %s8476_s19 = sld [smem:[%s9417_s0 + %s8194_s15]]   ;;  %s8198_s15 = smov 43  }
  0x4f   :  { %9474 = sst [smem:[#allocation106_spill]] %s8466_s30 }
  0x50   :  { %s8481_s14 = sld [smem:[%s9417_s0 + %s8195_s22]]   ;;  %s8199_s22 = smov 44  }
  0x51   :  { %s8486_s30 = sld [smem:[%s9417_s0 + %s8196_s28]]   ;;  %s8200_s28 = smov 45  }
  0x52   :  { %9473 = sst [smem:[#allocation105_spill]] %s8456_s12 }
  0x53   :  { %9475 = sst [smem:[#allocation107_spill]] %s8471_s6 }
  0x54   :  { %9476 = sst [smem:[#allocation108_spill]] %s8476_s19 }
  0x55   :  { %s8491_s8 = sld [smem:[%s9417_s0 + %s8197_s7]]   ;;  %s8201_s7 = smov 46  }
  0x56   :  { %s8496_s19 = sld [smem:[%s9417_s0 + %s8198_s15]]   ;;  %s8202_s15 = smov 47  }
  0x57   :  { %9477 = sst [smem:[#allocation109_spill]] %s8486_s30 }
  0x58   :  { %s8501_s17 = sld [smem:[%s9417_s0 + %s8199_s22]]   ;;  %s8203_s22 = smov 48  }
  0x59   :  { %s8506_s30 = sld [smem:[%s9417_s0 + %s8200_s28]]   ;;  %s8204_s28 = smov 49  }
  0x5a   :  { %s8511_s21 = sld [smem:[%s9417_s0 + %s8201_s7]]   ;;  %s8205_s7 = smov 50  }
  0x5b   :  { %9478 = sst [smem:[#allocation110_spill]] %s8491_s8 }
  0x5c   :  { %s8516_s9 = sld [smem:[%s9417_s0 + %s8202_s15]]   ;;  %s8206_s15 = smov 51  }
  0x5d   :  { %s8521_s3 = sld [smem:[%s9417_s0 + %s8203_s22]]   ;;  %s8207_s22 = smov 52  }
  0x5e   :  { %9479 = sst [smem:[#allocation111_spill]] %s8501_s17 }
  0x5f   :  { %9480 = sst [smem:[#allocation112_spill]] %s8506_s30 }
  0x60   :  { %s8526_s30 = sld [smem:[%s9417_s0 + %s8204_s28]]   ;;  %s8208_s28 = smov 53  }
  0x61   :  { %s8531_s25 = sld [smem:[%s9417_s0 + %s8205_s7]]   ;;  %s8209_s7 = smov 54  }
  0x62   :  { %9481 = sst [smem:[#allocation113_spill]] %s8516_s9 }
  0x63   :  { %9482 = sst [smem:[#allocation114_spill]] %s8521_s3 }
  0x64   :  { %s8536_s9 = sld [smem:[%s9417_s0 + %s8206_s15]]   ;;  %s8210_s15 = smov 55  }
  0x65   :  { %s8541_s13 = sld [smem:[%s9417_s0 + %s8207_s22]]   ;;  %s8211_s22 = smov 56  }
  0x66   :  { %s8546_s5 = sld [smem:[%s9417_s0 + %s8208_s28]]   ;;  %s8212_s28 = smov 57  }
  0x67   :  { %9483 = sst [smem:[#allocation115_spill]] %s8531_s25 }
  0x68   :  { %s8551_s25 = sld [smem:[%s9417_s0 + %s8209_s7]]   ;;  %s8213_s7 = smov 58  }
  0x69   :  { %s8561_s3 = sld [smem:[%s9417_s0 + %s8211_s22]]   ;;  %s8215_s22 = smov 60  }
  0x6a   :  { %9484 = sst [smem:[#allocation116_spill]] %s8536_s9 }
  0x6b   :  { %s8556_s9 = sld [smem:[%s9417_s0 + %s8210_s15]]   ;;  %s8214_s15 = smov 59  }
  0x6c   :  { %9485 = sst [smem:[#allocation117_spill]] %s8546_s5 }
  0x6d   :  { %s8566_s5 = sld [smem:[%s9417_s0 + %s8212_s28]]   ;;  %s8216_s28 = smov 61  }
  0x6e   :  { %9486 = sst [smem:[#allocation118_spill]] %s8551_s25 }
  0x6f   :  { %9487 = sst [smem:[#allocation119_spill]] %s8561_s3 }
  0x70   :  { %s8571_s25 = sld [smem:[%s9417_s0 + %s8213_s7]]   ;;  %s8217_s7 = smov 62  }
  0x71   :  { %s8576_s17 = sld [smem:[%s9417_s0 + %s8214_s15]]   ;;  %s8218_s15 = smov 63  }
  0x72   :  { %s8581_s3 = sld [smem:[%s9417_s0 + %s8215_s22]]   ;;  %s8219_s22 = smov 64  }
  0x73   :  { %9488 = sst [smem:[#allocation120_spill]] %s8566_s5 }
  0x74   :  { %s8586_s5 = sld [smem:[%s9417_s0 + %s8216_s28]]   ;;  %s8220_s28 = smov 65  }
  0x75   :  { %s8591_s8 = sld [smem:[%s9417_s0 + %s8217_s7]]   ;;  %s8221_s7 = smov 66  }
  0x76   :  { %s8601_s6 = sld [smem:[%s9417_s0 + %s8219_s22]]   ;;  %s8223_s22 = smov 68  }
  0x77   :  { %9489 = sst [smem:[#allocation121_spill]] %s8576_s17 }
  0x78   :  { %s8596_s17 = sld [smem:[%s9417_s0 + %s8218_s15]]   ;;  %s8222_s15 = smov 67  }
  0x79   :  { %s8611_s12 = sld [smem:[%s9417_s0 + %s8221_s7]]   ;;  %s8225_s7 = smov 70  }
  0x7a   :  { %9490 = sst [smem:[#allocation122_spill]] %s8586_s5 }
  0x7b   :  { %s8606_s5 = sld [smem:[%s9417_s0 + %s8220_s28]]   ;;  %s8224_s28 = smov 69  }
  0x7c   :  { %s8621_s27 = sld [smem:[%s9417_s0 + %s8223_s22]]   ;;  %s8227_s22 = smov 72  }
  0x7d   :  { %s8631_s4 = sld [smem:[%s9417_s0 + %s8225_s7]]  }
  0x7e   :  { %9491 = sst [smem:[#allocation123_spill]] %s8596_s17 }
  0x7f   :  { %s8616_s17 = sld [smem:[%s9417_s0 + %s8222_s15]]   ;;  %s8226_s15 = smov 71  }
  0x81   :  { %9492 = sst [smem:[#allocation124_spill]] %s8606_s5 }
  0x82   :  { %9494 = sst [smem:[#allocation126_spill]] %s8621_s27 }
  0x83   :  { %s8626_s5 = sld [smem:[%s9417_s0 + %s8224_s28]]   ;;  %s8228_s28 = smov 73  }
  0x84   :  { %s8641_s27 = sld [smem:[%s9417_s0 + %s8227_s22]]  }
  0x85   :  { %9493 = sst [smem:[#allocation125_spill]] %s8616_s17 }
  0x86   :  { %s8636_s17 = sld [smem:[%s9417_s0 + %s8226_s15]]  }
  0x89   :  { %9495 = sst [smem:[#allocation127_spill]] %s8626_s5 }
  0x8a   :  { %s8646_s5 = sld [smem:[%s9417_s0 + %s8228_s28]]  }
  0x8b   :  { %152 = vsyncpa [#allocation3], 0 }
  0x8c   :  { %153 = vsyncpa [#allocation6], 0 }
  0x8d   :  { %154 = vsyncpa [#allocation9], 0 }
  0x8e   :  { %155 = vsyncpa [#allocation12], 0 }
  0x8f   :  { %156 = vsyncpa [#allocation15], 0 }
  0x90   :  { %157 = vsyncpa [#allocation18], 0 }
  0x91   :  { %158 = vsyncpa [#allocation21], 0 }
  0x92   :  { %159 = vsyncpa [#allocation24], 0 }
  0x93   :  { %160 = vsyncpa [#allocation27], 0 }
  0x94   :  { %161 = vsyncpa [#allocation30], 0 }
  0x95   :  { %162 = vsyncpa [#allocation33], 0 }
  0x96   :  { %163 = vsyncpa [#allocation36], 0 }
  0x97   :  { %164 = vsyncpa [#allocation39], 0 }
  0x98   :  { %165 = vsyncpa [#allocation42], 0 }
  0x99   :  { %166 = vsyncpa [#allocation45], 0 }
  0x9a   :  { %167 = vsyncpa [#allocation48], 0 }
  0x9b   :  { %168 = vsyncpa [#allocation51], 0 }
  0x9c   :  { %169 = vsyncpa [#allocation4], 0  ;;  %s8229_s0 = smov [#allocation5]   ;;  %s8230_s10 = smov [#allocation8]  }
  0x9d   :  { %s244_s7 = sshll.u32 %s8229_s0, 4  ;;  %s268_s11 = sshll.u32 %s8230_s10, 4  ;;  %s245_s7 = int_to_ptr.vmem [resolvable:$true] %s244_s7  ;;  %s269_s11 = int_to_ptr.vmem [resolvable:$true] %s268_s11 }
  0x9e   :  { %s7448_s15 = scalar_lea.vmem %s245_s7, 16  ;;  %s7452_s16 = scalar_lea.vmem %s245_s7, 32 }
  0x9f   :  { %p7449_p0 = scmp.ne.s32.totalorder %s245_s7, %s7448_s15  ;;  %p7453_p1 = scmp.lt.s32.totalorder %s245_s7, %s245_s7 }
  0xa0   :  { %p7454_p2 = scmp.lt.s32.totalorder %s7452_s16, %s7448_s15 }
  0xa2   :  { %p7455_p3 = por %p7454_p2, %p7453_p1 }
  0xa4   :  { %p7456_p4 = pnand %p7455_p3, %p7449_p0 }
  0xa6   :  { %7459 = shalt.err (!%p7456_p4)
}
  0xa7   :  { %247 = dma.hbm_to_vmem [thread:$0]  %s8431_s29, 16, %s245_s7, [#allocation6]  }
  0xa8   :  { %s7468_s18 = scalar_lea.vmem %s269_s11, 16  ;;  %s7472_s22 = scalar_lea.vmem %s269_s11, 32 }
  0xa9   :  { %p7469_p5 = scmp.ne.s32.totalorder %s269_s11, %s7468_s18  ;;  %p7473_p6 = scmp.lt.s32.totalorder %s269_s11, %s269_s11 }
  0xaa   :  { %p7474_p7 = scmp.lt.s32.totalorder %s7472_s22, %s7468_s18 }
  0xac   :  { %p7475_p8 = por %p7474_p7, %p7473_p6 }
  0xae   :  { %p7476_p9 = pnand %p7475_p8, %p7469_p5 }
  0xb0   :  { %7479 = shalt.err (!%p7476_p9)
}
  0xb1   :  { %271 = dma.hbm_to_vmem [thread:$0]  %s8451_s24, 16, %s269_s11, [#allocation9]  }
  0xb2   :  { %s8231_s23 = smov [#allocation11]   ;;  %s8232_s28 = smov [#allocation14]  }
  0xb3   :  { %s288_s26 = sshll.u32 %s8231_s23, 4  ;;  %s312_s1 = sshll.u32 %s8232_s28, 4  ;;  %s289_s26 = int_to_ptr.vmem [resolvable:$true] %s288_s26  ;;  %s313_s1 = int_to_ptr.vmem [resolvable:$true] %s312_s1 }
  0xb4   :  { %s7488_s2 = scalar_lea.vmem %s289_s26, 16  ;;  %s7492_s0 = scalar_lea.vmem %s289_s26, 32 }
  0xb5   :  { %p7489_p10 = scmp.ne.s32.totalorder %s289_s26, %s7488_s2  ;;  %p7493_p11 = scmp.lt.s32.totalorder %s289_s26, %s289_s26 }
  0xb6   :  { %p7494_p12 = scmp.lt.s32.totalorder %s7492_s0, %s7488_s2 }
  0xb8   :  { %p7495_p13 = por %p7494_p12, %p7493_p11 }
  0xba   :  { %p7496_p0 = pnand %p7495_p13, %p7489_p10 }
  0xbc   :  { %7499 = shalt.err (!%p7496_p0)
}
  0xbd   :  { %291 = dma.hbm_to_vmem [thread:$0]  %s8461_s20, 16, %s289_s26, [#allocation12]  }
  0xbe   :  { %s7508_s29 = scalar_lea.vmem %s313_s1, 16  ;;  %s7512_s7 = scalar_lea.vmem %s313_s1, 32 }
  0xbf   :  { %p7509_p1 = scmp.ne.s32.totalorder %s313_s1, %s7508_s29  ;;  %p7513_p2 = scmp.lt.s32.totalorder %s313_s1, %s313_s1 }
  0xc0   :  { %p7514_p3 = scmp.lt.s32.totalorder %s7512_s7, %s7508_s29 }
  0xc2   :  { %p7515_p4 = por %p7514_p3, %p7513_p2 }
  0xc4   :  { %p7516_p5 = pnand %p7515_p4, %p7509_p1 }
  0xc6   :  { %7519 = shalt.err (!%p7516_p5)
}
  0xc7   :  { %315 = dma.hbm_to_vmem [thread:$0]  %s8481_s14, 16, %s313_s1, [#allocation15]  }
  0xc8   :  { %s8233_s24 = smov [#allocation17]   ;;  %s8234_s11 = smov [#allocation20]  }
  0xc9   :  { %s334_s10 = sshll.u32 %s8233_s24, 4  ;;  %s356_s15 = sshll.u32 %s8234_s11, 4  ;;  %s335_s10 = int_to_ptr.vmem [resolvable:$true] %s334_s10  ;;  %s357_s15 = int_to_ptr.vmem [resolvable:$true] %s356_s15 }
  0xca   :  { %s7528_s16 = scalar_lea.vmem %s335_s10, 16  ;;  %s7532_s18 = scalar_lea.vmem %s335_s10, 32 }
  0xcb   :  { %p7529_p6 = scmp.ne.s32.totalorder %s335_s10, %s7528_s16  ;;  %p7533_p7 = scmp.lt.s32.totalorder %s335_s10, %s335_s10 }
  0xcc   :  { %p7534_p8 = scmp.lt.s32.totalorder %s7532_s18, %s7528_s16 }
  0xce   :  { %p7535_p9 = por %p7534_p8, %p7533_p7 }
  0xd0   :  { %p7536_p10 = pnand %p7535_p9, %p7529_p6 }
  0xd2   :  { %7539 = shalt.err (!%p7536_p10)
}
  0xd3   :  { %337 = dma.hbm_to_vmem [thread:$0]  %s8496_s19, 16, %s335_s10, [#allocation18]  }
  0xd4   :  { %s7548_s20 = scalar_lea.vmem %s357_s15, 16  ;;  %s7552_s22 = scalar_lea.vmem %s357_s15, 32 }
  0xd5   :  { %p7549_p11 = scmp.ne.s32.totalorder %s357_s15, %s7548_s20  ;;  %p7553_p12 = scmp.lt.s32.totalorder %s357_s15, %s357_s15 }
  0xd6   :  { %p7554_p13 = scmp.lt.s32.totalorder %s7552_s22, %s7548_s20 }
  0xd8   :  { %p7555_p0 = por %p7554_p13, %p7553_p12 }
  0xda   :  { %p7556_p1 = pnand %p7555_p0, %p7549_p11 }
  0xdc   :  { %7559 = shalt.err (!%p7556_p1)
}
  0xdd   :  { %359 = dma.hbm_to_vmem [thread:$0]  %s8511_s21, 16, %s357_s15, [#allocation21]  }
  0xde   :  { %s8235_s14 = smov [#allocation23]   ;;  %s8236_s26 = smov [#allocation26]  }
  0xdf   :  { %s378_s23 = sshll.u32 %s8235_s14, 4  ;;  %s400_s28 = sshll.u32 %s8236_s26, 4  ;;  %s379_s23 = int_to_ptr.vmem [resolvable:$true] %s378_s23  ;;  %s401_s28 = int_to_ptr.vmem [resolvable:$true] %s400_s28 }
  0xe0   :  { %s7568_s1 = scalar_lea.vmem %s379_s23, 16  ;;  %s7572_s2 = scalar_lea.vmem %s379_s23, 32 }
  0xe1   :  { %p7569_p2 = scmp.ne.s32.totalorder %s379_s23, %s7568_s1  ;;  %p7573_p3 = scmp.lt.s32.totalorder %s379_s23, %s379_s23 }
  0xe2   :  { %p7574_p4 = scmp.lt.s32.totalorder %s7572_s2, %s7568_s1 }
  0xe4   :  { %p7575_p5 = por %p7574_p4, %p7573_p3 }
  0xe6   :  { %p7576_p6 = pnand %p7575_p5, %p7569_p2 }
  0xe8   :  { %7579 = shalt.err (!%p7576_p6)
}
  0xe9   :  { %381 = dma.hbm_to_vmem [thread:$0]  %s8526_s30, 16, %s379_s23, [#allocation24]  }
  0xea   :  { %s7588_s19 = scalar_lea.vmem %s401_s28, 16  ;;  %s7592_s0 = scalar_lea.vmem %s401_s28, 32 }
  0xeb   :  { %p7589_p7 = scmp.ne.s32.totalorder %s401_s28, %s7588_s19  ;;  %p7593_p8 = scmp.lt.s32.totalorder %s401_s28, %s401_s28 }
  0xec   :  { %p7594_p9 = scmp.lt.s32.totalorder %s7592_s0, %s7588_s19 }
  0xee   :  { %p7595_p10 = por %p7594_p9, %p7593_p8 }
  0xf0   :  { %p7596_p11 = pnand %p7595_p10, %p7589_p7 }
  0xf2   :  { %7599 = shalt.err (!%p7596_p11)
}
  0xf3   :  { %403 = dma.hbm_to_vmem [thread:$0]  %s8541_s13, 16, %s401_s28, [#allocation27]  }
  0xf4   :  { %s8237_s21 = smov [#allocation29]   ;;  %s8238_s7 = smov [#allocation32]  }
  0xf5   :  { %s422_s29 = sshll.u32 %s8237_s21, 4  ;;  %s444_s24 = sshll.u32 %s8238_s7, 4  ;;  %s423_s29 = int_to_ptr.vmem [resolvable:$true] %s422_s29  ;;  %s445_s24 = int_to_ptr.vmem [resolvable:$true] %s444_s24 }
  0xf6   :  { %s7608_s10 = scalar_lea.vmem %s423_s29, 16  ;;  %s7612_s11 = scalar_lea.vmem %s423_s29, 32 }
  0xf7   :  { %p7609_p12 = scmp.ne.s32.totalorder %s423_s29, %s7608_s10  ;;  %p7613_p13 = scmp.lt.s32.totalorder %s423_s29, %s423_s29 }
  0xf8   :  { %p7614_p0 = scmp.lt.s32.totalorder %s7612_s11, %s7608_s10 }
  0xfa   :  { %p7615_p1 = por %p7614_p0, %p7613_p13 }
  0xfc   :  { %p7616_p2 = pnand %p7615_p1, %p7609_p12 }
  0xfe   :  { %7619 = shalt.err (!%p7616_p2)
}
  0xff   :  { %425 = dma.hbm_to_vmem [thread:$0]  %s8556_s9, 16, %s423_s29, [#allocation30]  }
 0x100   :  { %s7628_s30 = scalar_lea.vmem %s445_s24, 16  ;;  %s7632_s15 = scalar_lea.vmem %s445_s24, 32 }
 0x101   :  { %p7629_p3 = scmp.ne.s32.totalorder %s445_s24, %s7628_s30  ;;  %p7633_p4 = scmp.lt.s32.totalorder %s445_s24, %s445_s24 }
 0x102   :  { %p7634_p5 = scmp.lt.s32.totalorder %s7632_s15, %s7628_s30 }
 0x104   :  { %p7635_p6 = por %p7634_p5, %p7633_p4 }
 0x106   :  { %p7636_p7 = pnand %p7635_p6, %p7629_p3 }
 0x108   :  { %7639 = shalt.err (!%p7636_p7)
}
 0x109   :  { %447 = dma.hbm_to_vmem [thread:$0]  %s8571_s25, 16, %s445_s24, [#allocation33]  }
 0x10a   :  { %s8239_s13 = smov [#allocation35]   ;;  %s8240_s18 = smov [#allocation38]  }
 0x10b   :  { %s466_s16 = sshll.u32 %s8239_s13, 4  ;;  %s488_s20 = sshll.u32 %s8240_s18, 4  ;;  %s467_s16 = int_to_ptr.vmem [resolvable:$true] %s466_s16  ;;  %s489_s20 = int_to_ptr.vmem [resolvable:$true] %s488_s20 }
 0x10c   :  { %s7648_s22 = scalar_lea.vmem %s467_s16, 16  ;;  %s7652_s14 = scalar_lea.vmem %s467_s16, 32 }
 0x10d   :  { %p7649_p8 = scmp.ne.s32.totalorder %s467_s16, %s7648_s22  ;;  %p7653_p9 = scmp.lt.s32.totalorder %s467_s16, %s467_s16 }
 0x10e   :  { %p7654_p10 = scmp.lt.s32.totalorder %s7652_s14, %s7648_s22 }
 0x110   :  { %p7655_p11 = por %p7654_p10, %p7653_p9 }
 0x112   :  { %p7656_p12 = pnand %p7655_p11, %p7649_p8 }
 0x114   :  { %7659 = shalt.err (!%p7656_p12)
}
 0x115   :  { %469 = dma.hbm_to_vmem [thread:$0]  %s8581_s3, 16, %s467_s16, [#allocation36]  }
 0x116   :  { %s7668_s9 = scalar_lea.vmem %s489_s20, 16  ;;  %s7672_s23 = scalar_lea.vmem %s489_s20, 32 }
 0x117   :  { %p7669_p13 = scmp.ne.s32.totalorder %s489_s20, %s7668_s9  ;;  %p7673_p0 = scmp.lt.s32.totalorder %s489_s20, %s489_s20 }
 0x118   :  { %p7674_p1 = scmp.lt.s32.totalorder %s7672_s23, %s7668_s9 }
 0x11a   :  { %p7675_p2 = por %p7674_p1, %p7673_p0 }
 0x11c   :  { %p7676_p3 = pnand %p7675_p2, %p7669_p13 }
 0x11e   :  { %7679 = shalt.err (!%p7676_p3)
}
 0x11f   :  { %491 = dma.hbm_to_vmem [thread:$0]  %s8591_s8, 16, %s489_s20, [#allocation39]  }
 0x120   :  { %s8241_s25 = smov [#allocation41]   ;;  %s8242_s28 = smov [#allocation44]  }
 0x121   :  { %s508_s26 = sshll.u32 %s8241_s25, 4  ;;  %s530_s1 = sshll.u32 %s8242_s28, 4  ;;  %s509_s26 = int_to_ptr.vmem [resolvable:$true] %s508_s26  ;;  %s531_s1 = int_to_ptr.vmem [resolvable:$true] %s530_s1 }
 0x122   :  { %s7688_s2 = scalar_lea.vmem %s509_s26, 16  ;;  %s7692_s19 = scalar_lea.vmem %s509_s26, 32 }
 0x123   :  { %p7689_p4 = scmp.ne.s32.totalorder %s509_s26, %s7688_s2  ;;  %p7693_p5 = scmp.lt.s32.totalorder %s509_s26, %s509_s26 }
 0x124   :  { %p7694_p6 = scmp.lt.s32.totalorder %s7692_s19, %s7688_s2 }
 0x126   :  { %p7695_p7 = por %p7694_p6, %p7693_p5 }
 0x128   :  { %p7696_p8 = pnand %p7695_p7, %p7689_p4 }
 0x12a   :  { %7699 = shalt.err (!%p7696_p8)
}
 0x12b   :  { %511 = dma.hbm_to_vmem [thread:$0]  %s8601_s6, 16, %s509_s26, [#allocation42]  }
 0x12c   :  { %s7708_s3 = scalar_lea.vmem %s531_s1, 16  ;;  %s7712_s0 = scalar_lea.vmem %s531_s1, 32 }
 0x12d   :  { %p7709_p9 = scmp.ne.s32.totalorder %s531_s1, %s7708_s3  ;;  %p7713_p10 = scmp.lt.s32.totalorder %s531_s1, %s531_s1 }
 0x12e   :  { %p7714_p11 = scmp.lt.s32.totalorder %s7712_s0, %s7708_s3 }
 0x130   :  { %p7715_p12 = por %p7714_p11, %p7713_p10 }
 0x132   :  { %p7716_p13 = pnand %p7715_p12, %p7709_p9 }
 0x134   :  { %7719 = shalt.err (!%p7716_p13)
}
 0x135   :  { %533 = dma.hbm_to_vmem [thread:$0]  %s8611_s12, 16, %s531_s1, [#allocation45]  }
 0x136   :  { %s8243_s8 = smov [#allocation47]  }
 0x137   :  { %s552_s21 = sshll.u32 %s8243_s8, 4  ;;  %s553_s21 = int_to_ptr.vmem [resolvable:$true] %s552_s21 }
 0x138   :  { %s7728_s29 = scalar_lea.vmem %s553_s21, 16  ;;  %s7732_s7 = scalar_lea.vmem %s553_s21, 32 }
 0x139   :  { %p7729_p0 = scmp.ne.s32.totalorder %s553_s21, %s7728_s29  ;;  %p7733_p1 = scmp.lt.s32.totalorder %s553_s21, %s553_s21 }
 0x13a   :  { %p7734_p2 = scmp.lt.s32.totalorder %s7732_s7, %s7728_s29 }
 0x13c   :  { %p7735_p3 = por %p7734_p2, %p7733_p1 }
 0x13e   :  { %p7736_p4 = pnand %p7735_p3, %p7729_p0 }
 0x140   :  { %7739 = shalt.err (!%p7736_p4)
}
 0x141   :  { %s9496_s6 = sld [smem:[#allocation127_spill]]  ;;  %s8244_s24 = smov [#allocation50]  }
 0x142   :  { %s571_s10 = sshll.u32 %s8244_s24, 4  ;;  %s8245_s11 = smov [#allocation2]   ;;  %s572_s10 = int_to_ptr.vmem [resolvable:$true] %s571_s10 }
 0x143   :  { %s234_s30 = sshll.u32 %s8245_s11, 4  ;;  %s7748_s15 = scalar_lea.vmem %s572_s10, 512  ;;  %s235_s30 = int_to_ptr.vmem [resolvable:$true] %s234_s30 }
 0x144   :  { %p7749_p5 = scmp.ne.s32.totalorder %s572_s10, %s7748_s15  ;;  %p7753_p6 = scmp.lt.s32.totalorder %s572_s10, %s572_s10 }
 0x145   :  { %p7754_p7 = scmp.lt.s32.totalorder %s7748_s15, %s7748_s15 }
 0x147   :  { %555 = dma.hbm_to_vmem [thread:$0]  %s9496_s6, 16, %s553_s21, [#allocation48]  }
 0x148   :  { %p7755_p8 = por %p7754_p7, %p7753_p6 }
 0x14a   :  { %p7756_p9 = pnand %p7755_p8, %p7749_p5 }
 0x14c   :  { %7759 = shalt.err (!%p7756_p9)
}
 0x14d   :  { %s8246_s12 = smov 128   ;;  %s8247_s13 = smov 8  }
 0x14e   :  { %577 = dma.hbm_to_vmem [thread:$0]  %s8636_s17, 512, %s572_s10, [#allocation51], %s8246_s12, %s8246_s12, %s8247_s13  }
 0x14f   :  { %s7768_s16 = scalar_lea.vmem %s235_s30, 16  ;;  %s7772_s18 = scalar_lea.vmem %s235_s30, 32 }
 0x150   :  { %p7769_p10 = scmp.ne.s32.totalorder %s235_s30, %s7768_s16  ;;  %p7773_p11 = scmp.lt.s32.totalorder %s235_s30, %s235_s30 }
 0x151   :  { %p7774_p12 = scmp.lt.s32.totalorder %s7772_s18, %s7768_s16 }
 0x153   :  { %p7775_p13 = por %p7774_p12, %p7773_p11 }
 0x155   :  { %p7776_p0 = pnand %p7775_p13, %p7769_p10 }
 0x157   :  { %7779 = shalt.err (!%p7776_p0)
}
 0x158   :  { %s9497_s20 = sld [smem:[#allocation101_spill]]  ;;  %s8248_s22 = smov [#allocation7]  }
 0x159   :  { %s256_s14 = sshll.u32 %s8248_s22, 4  ;;  %s8249_s9 = smov [#allocation10]   ;;  %s257_s14 = int_to_ptr.vmem [resolvable:$true] %s256_s14 }
 0x15a   :  { %s278_s23 = sshll.u32 %s8249_s9, 4  ;;  %s7788_s25 = scalar_lea.vmem %s257_s14, 16  ;;  %s279_s23 = int_to_ptr.vmem [resolvable:$true] %s278_s23 }
 0x15b   :  { %p7789_p1 = scmp.ne.s32.totalorder %s257_s14, %s7788_s25  ;;  %s7792_s26 = scalar_lea.vmem %s257_s14, 32 }
 0x15c   :  { %p7793_p2 = scmp.lt.s32.totalorder %s257_s14, %s257_s14  ;;  %p7794_p3 = scmp.lt.s32.totalorder %s7792_s26, %s7788_s25 }
 0x15e   :  { %237 = dma.hbm_to_vmem [thread:$0]  %s9497_s20, 16, %s235_s30, [#allocation3]  }
 0x15f   :  { %p7795_p4 = por %p7794_p3, %p7793_p2 }
 0x161   :  { %p7796_p5 = pnand %p7795_p4, %p7789_p1 }
 0x163   :  { %7799 = shalt.err (!%p7796_p5)
}
 0x164   :  { %s9498_s17 = sld [smem:[#allocation103_spill]]  ;;  %s7808_s28 = scalar_lea.vmem %s279_s23, 16 }
 0x165   :  { %p7809_p6 = scmp.ne.s32.totalorder %s279_s23, %s7808_s28  ;;  %s7812_s1 = scalar_lea.vmem %s279_s23, 32 }
 0x166   :  { %p7813_p7 = scmp.lt.s32.totalorder %s279_s23, %s279_s23  ;;  %p7814_p8 = scmp.lt.s32.totalorder %s7812_s1, %s7808_s28 }
 0x168   :  { %p7815_p9 = por %p7814_p8, %p7813_p7 }
 0x16a   :  { %259 = dma.hbm_to_vmem [thread:$0]  %s9498_s17, 16, %s257_s14, [#allocation6]  }
 0x16b   :  { %p7816_p10 = pnand %p7815_p9, %p7809_p6 }
 0x16d   :  { %7819 = shalt.err (!%p7816_p10)
}
 0x16e   :  { %s9499_s2 = sld [smem:[#allocation105_spill]]  ;;  %s8250_s19 = smov [#allocation13]  }
 0x16f   :  { %s300_s3 = sshll.u32 %s8250_s19, 4  ;;  %s8251_s0 = smov [#allocation16]   ;;  %s301_s3 = int_to_ptr.vmem [resolvable:$true] %s300_s3 }
 0x170   :  { %s324_s8 = sshll.u32 %s8251_s0, 4  ;;  %s7828_s21 = scalar_lea.vmem %s301_s3, 16  ;;  %s325_s8 = int_to_ptr.vmem [resolvable:$true] %s324_s8 }
 0x171   :  { %p7829_p11 = scmp.ne.s32.totalorder %s301_s3, %s7828_s21  ;;  %s7832_s29 = scalar_lea.vmem %s301_s3, 32 }
 0x172   :  { %p7833_p12 = scmp.lt.s32.totalorder %s301_s3, %s301_s3  ;;  %p7834_p13 = scmp.lt.s32.totalorder %s7832_s29, %s7828_s21 }
 0x174   :  { %281 = dma.hbm_to_vmem [thread:$0]  %s9499_s2, 16, %s279_s23, [#allocation9]  }
 0x175   :  { %p7835_p0 = por %p7834_p13, %p7833_p12 }
 0x177   :  { %p7836_p1 = pnand %p7835_p0, %p7829_p11 }
 0x179   :  { %7839 = shalt.err (!%p7836_p1)
}
 0x17a   :  { %s9500_s7 = sld [smem:[#allocation107_spill]]  ;;  %s7848_s6 = scalar_lea.vmem %s325_s8, 16 }
 0x17b   :  { %p7849_p2 = scmp.ne.s32.totalorder %s325_s8, %s7848_s6  ;;  %s7852_s24 = scalar_lea.vmem %s325_s8, 32 }
 0x17c   :  { %p7853_p3 = scmp.lt.s32.totalorder %s325_s8, %s325_s8  ;;  %p7854_p4 = scmp.lt.s32.totalorder %s7852_s24, %s7848_s6 }
 0x17e   :  { %p7855_p5 = por %p7854_p4, %p7853_p3 }
 0x180   :  { %303 = dma.hbm_to_vmem [thread:$0]  %s9500_s7, 16, %s301_s3, [#allocation12]  }
 0x181   :  { %p7856_p6 = pnand %p7855_p5, %p7849_p2 }
 0x183   :  { %7859 = shalt.err (!%p7856_p6)
}
 0x184   :  { %s9501_s10 = sld [smem:[#allocation110_spill]]  ;;  %s8252_s11 = smov [#allocation19]  }
 0x185   :  { %s344_s30 = sshll.u32 %s8252_s11, 4  ;;  %s8253_s15 = smov [#allocation22]   ;;  %s345_s30 = int_to_ptr.vmem [resolvable:$true] %s344_s30 }
 0x186   :  { %s368_s16 = sshll.u32 %s8253_s15, 4  ;;  %s7868_s18 = scalar_lea.vmem %s345_s30, 16  ;;  %s369_s16 = int_to_ptr.vmem [resolvable:$true] %s368_s16 }
 0x187   :  { %p7869_p7 = scmp.ne.s32.totalorder %s345_s30, %s7868_s18  ;;  %s7872_s20 = scalar_lea.vmem %s345_s30, 32 }
 0x188   :  { %p7873_p8 = scmp.lt.s32.totalorder %s345_s30, %s345_s30  ;;  %p7874_p9 = scmp.lt.s32.totalorder %s7872_s20, %s7868_s18 }
 0x18a   :  { %327 = dma.hbm_to_vmem [thread:$0]  %s9501_s10, 16, %s325_s8, [#allocation15]  }
 0x18b   :  { %p7875_p10 = por %p7874_p9, %p7873_p8 }
 0x18d   :  { %p7876_p11 = pnand %p7875_p10, %p7869_p7 }
 0x18f   :  { %7879 = shalt.err (!%p7876_p11)
}
 0x190   :  { %s9502_s22 = sld [smem:[#allocation111_spill]]  ;;  %s7888_s14 = scalar_lea.vmem %s369_s16, 16 }
 0x191   :  { %p7889_p12 = scmp.ne.s32.totalorder %s369_s16, %s7888_s14  ;;  %s7892_s9 = scalar_lea.vmem %s369_s16, 32 }
 0x192   :  { %p7893_p13 = scmp.lt.s32.totalorder %s369_s16, %s369_s16  ;;  %p7894_p0 = scmp.lt.s32.totalorder %s7892_s9, %s7888_s14 }
 0x194   :  { %p7895_p1 = por %p7894_p0, %p7893_p13 }
 0x196   :  { %347 = dma.hbm_to_vmem [thread:$0]  %s9502_s22, 16, %s345_s30, [#allocation18]  }
 0x197   :  { %p7896_p2 = pnand %p7895_p1, %p7889_p12 }
 0x199   :  { %7899 = shalt.err (!%p7896_p2)
}
 0x19a   :  { %s9503_s23 = sld [smem:[#allocation114_spill]]  ;;  %s8254_s25 = smov [#allocation25]  }
 0x19b   :  { %s388_s26 = sshll.u32 %s8254_s25, 4  ;;  %s8255_s17 = smov [#allocation28]   ;;  %s389_s26 = int_to_ptr.vmem [resolvable:$true] %s388_s26 }
 0x19c   :  { %s412_s28 = sshll.u32 %s8255_s17, 4  ;;  %s7908_s1 = scalar_lea.vmem %s389_s26, 16  ;;  %s413_s28 = int_to_ptr.vmem [resolvable:$true] %s412_s28 }
 0x19d   :  { %p7909_p3 = scmp.ne.s32.totalorder %s389_s26, %s7908_s1  ;;  %s7912_s2 = scalar_lea.vmem %s389_s26, 32 }
 0x19e   :  { %p7913_p4 = scmp.lt.s32.totalorder %s389_s26, %s389_s26  ;;  %p7914_p5 = scmp.lt.s32.totalorder %s7912_s2, %s7908_s1 }
 0x1a0   :  { %371 = dma.hbm_to_vmem [thread:$0]  %s9503_s23, 16, %s369_s16, [#allocation21]  }
 0x1a1   :  { %p7915_p6 = por %p7914_p5, %p7913_p4 }
 0x1a3   :  { %p7916_p7 = pnand %p7915_p6, %p7909_p3 }
 0x1a5   :  { %7919 = shalt.err (!%p7916_p7)
}
 0x1a6   :  { %s9504_s19 = sld [smem:[#allocation115_spill]]  ;;  %s7928_s3 = scalar_lea.vmem %s413_s28, 16 }
 0x1a7   :  { %p7929_p8 = scmp.ne.s32.totalorder %s413_s28, %s7928_s3  ;;  %s7932_s0 = scalar_lea.vmem %s413_s28, 32 }
 0x1a8   :  { %p7933_p9 = scmp.lt.s32.totalorder %s413_s28, %s413_s28  ;;  %p7934_p10 = scmp.lt.s32.totalorder %s7932_s0, %s7928_s3 }
 0x1aa   :  { %p7935_p11 = por %p7934_p10, %p7933_p9 }
 0x1ac   :  { %391 = dma.hbm_to_vmem [thread:$0]  %s9504_s19, 16, %s389_s26, [#allocation24]  }
 0x1ad   :  { %p7936_p12 = pnand %p7935_p11, %p7929_p8 }
 0x1af   :  { %7939 = shalt.err (!%p7936_p12)
}
 0x1b0   :  { %s9505_s8 = sld [smem:[#allocation118_spill]]  ;;  %s8256_s21 = smov [#allocation31]  }
 0x1b1   :  { %s432_s29 = sshll.u32 %s8256_s21, 4  ;;  %s8257_s7 = smov [#allocation34]   ;;  %s433_s29 = int_to_ptr.vmem [resolvable:$true] %s432_s29 }
 0x1b2   :  { %s453_s6 = sshll.u32 %s8257_s7, 4  ;;  %s7948_s24 = scalar_lea.vmem %s433_s29, 16  ;;  %s454_s6 = int_to_ptr.vmem [resolvable:$true] %s453_s6 }
 0x1b3   :  { %p7949_p13 = scmp.ne.s32.totalorder %s433_s29, %s7948_s24  ;;  %s7952_s10 = scalar_lea.vmem %s433_s29, 32 }
 0x1b4   :  { %p7953_p0 = scmp.lt.s32.totalorder %s433_s29, %s433_s29  ;;  %p7954_p1 = scmp.lt.s32.totalorder %s7952_s10, %s7948_s24 }
 0x1b6   :  { %415 = dma.hbm_to_vmem [thread:$0]  %s9505_s8, 16, %s413_s28, [#allocation27]  }
 0x1b7   :  { %p7955_p2 = por %p7954_p1, %p7953_p0 }
 0x1b9   :  { %p7956_p3 = pnand %p7955_p2, %p7949_p13 }
 0x1bb   :  { %7959 = shalt.err (!%p7956_p3)
}
 0x1bc   :  { %s9506_s11 = sld [smem:[#allocation119_spill]]  ;;  %s7968_s30 = scalar_lea.vmem %s454_s6, 512 }
 0x1bd   :  { %p7969_p4 = scmp.ne.s32.totalorder %s454_s6, %s7968_s30  ;;  %p7973_p5 = scmp.lt.s32.totalorder %s454_s6, %s454_s6 }
 0x1be   :  { %p7974_p6 = scmp.lt.s32.totalorder %s7968_s30, %s7968_s30 }
 0x1c0   :  { %p7975_p7 = por %p7974_p6, %p7973_p5 }
 0x1c2   :  { %435 = dma.hbm_to_vmem [thread:$0]  %s9506_s11, 16, %s433_s29, [#allocation30]  }
 0x1c3   :  { %p7976_p8 = pnand %p7975_p7, %p7969_p4 }
 0x1c5   :  { %7979 = shalt.err (!%p7976_p8)
}
 0x1c6   :  { %s9507_s15 = sld [smem:[#allocation121_spill]]  ;;  %s8258_s16 = smov [#allocation37]  }
 0x1c7   :  { %s475_s18 = sshll.u32 %s8258_s16, 4  ;;  %s8259_s20 = smov [#allocation40]   ;;  %s476_s18 = int_to_ptr.vmem [resolvable:$true] %s475_s18 }
 0x1c8   :  { %s498_s22 = sshll.u32 %s8259_s20, 4  ;;  %s7988_s14 = scalar_lea.vmem %s476_s18, 512  ;;  %s499_s22 = int_to_ptr.vmem [resolvable:$true] %s498_s22 }
 0x1c9   :  { %p7989_p9 = scmp.ne.s32.totalorder %s476_s18, %s7988_s14  ;;  %p7993_p10 = scmp.lt.s32.totalorder %s476_s18, %s476_s18 }
 0x1ca   :  { %p7994_p11 = scmp.lt.s32.totalorder %s7988_s14, %s7988_s14 }
 0x1cc   :  { %459 = dma.hbm_to_vmem [thread:$0]  %s9507_s15, 512, %s454_s6, [#allocation33], %s8246_s12, %s8246_s12, %s8247_s13  }
 0x1cd   :  { %p7995_p12 = por %p7994_p11, %p7993_p10 }
 0x1cf   :  { %p7996_p13 = pnand %p7995_p12, %p7989_p9 }
 0x1d1   :  { %7999 = shalt.err (!%p7996_p13)
}
 0x1d2   :  { %s9508_s9 = sld [smem:[#allocation122_spill]]  ;;  %s8008_s23 = scalar_lea.vmem %s499_s22, 16 }
 0x1d3   :  { %p8009_p0 = scmp.ne.s32.totalorder %s499_s22, %s8008_s23  ;;  %s8012_s25 = scalar_lea.vmem %s499_s22, 32 }
 0x1d4   :  { %p8013_p1 = scmp.lt.s32.totalorder %s499_s22, %s499_s22  ;;  %p8014_p2 = scmp.lt.s32.totalorder %s8012_s25, %s8008_s23 }
 0x1d6   :  { %p8015_p3 = por %p8014_p2, %p8013_p1 }
 0x1d8   :  { %481 = dma.hbm_to_vmem [thread:$0]  %s9508_s9, 512, %s476_s18, [#allocation36], %s8246_s12, %s8246_s12, %s8247_s13  }
 0x1d9   :  { %p8016_p4 = pnand %p8015_p3, %p8009_p0 }
 0x1db   :  { %8019 = shalt.err (!%p8016_p4)
}
 0x1dc   :  { %s9509_s26 = sld [smem:[#allocation123_spill]]  ;;  %s8260_s17 = smov [#allocation43]  }
 0x1dd   :  { %s517_s28 = sshll.u32 %s8260_s17, 4  ;;  %s8261_s1 = smov [#allocation46]   ;;  %s518_s28 = int_to_ptr.vmem [resolvable:$true] %s517_s28 }
 0x1de   :  { %s542_s2 = sshll.u32 %s8261_s1, 4  ;;  %s8028_s19 = scalar_lea.vmem %s518_s28, 512  ;;  %s543_s2 = int_to_ptr.vmem [resolvable:$true] %s542_s2 }
 0x1df   :  { %p8029_p5 = scmp.ne.s32.totalorder %s518_s28, %s8028_s19  ;;  %p8033_p6 = scmp.lt.s32.totalorder %s518_s28, %s518_s28 }
 0x1e0   :  { %p8034_p7 = scmp.lt.s32.totalorder %s8028_s19, %s8028_s19 }
 0x1e2   :  { %501 = dma.hbm_to_vmem [thread:$0]  %s9509_s26, 16, %s499_s22, [#allocation39]  }
 0x1e3   :  { %p8035_p8 = por %p8034_p7, %p8033_p6 }
 0x1e5   :  { %p8036_p9 = pnand %p8035_p8, %p8029_p5 }
 0x1e7   :  { %8039 = shalt.err (!%p8036_p9)
}
 0x1e8   :  { %s9510_s3 = sld [smem:[#allocation124_spill]]  ;;  %s8048_s0 = scalar_lea.vmem %s543_s2, 16 }
 0x1e9   :  { %p8049_p10 = scmp.ne.s32.totalorder %s543_s2, %s8048_s0  ;;  %s8052_s8 = scalar_lea.vmem %s543_s2, 32 }
 0x1ea   :  { %p8053_p11 = scmp.lt.s32.totalorder %s543_s2, %s543_s2  ;;  %p8054_p12 = scmp.lt.s32.totalorder %s8052_s8, %s8048_s0 }
 0x1ec   :  { %p8055_p13 = por %p8054_p12, %p8053_p11 }
 0x1ee   :  { %523 = dma.hbm_to_vmem [thread:$0]  %s9510_s3, 512, %s518_s28, [#allocation42], %s8246_s12, %s8246_s12, %s8247_s13  }
 0x1ef   :  { %p8056_p0 = pnand %p8055_p13, %p8049_p10 }
 0x1f1   :  { %8059 = shalt.err (!%p8056_p0)
}
 0x1f2   :  { %s9511_s21 = sld [smem:[#allocation126_spill]]  ;;  %s8262_s29 = smov [#allocation49]  }
 0x1f3   :  { %s562_s7 = sshll.u32 %s8262_s29, 4  ;;  %s8263_s6 = smov [#allocation52]   ;;  %s563_s7 = int_to_ptr.vmem [resolvable:$true] %s562_s7 }
 0x1f4   :  { %s584_s24 = sshll.u32 %s8263_s6, 4  ;;  %s8068_s10 = scalar_lea.vmem %s563_s7, 16  ;;  %s585_s24 = int_to_ptr.vmem [resolvable:$true] %s584_s24 }
 0x1f5   :  { %p8069_p1 = scmp.ne.s32.totalorder %s563_s7, %s8068_s10  ;;  %s8072_s11 = scalar_lea.vmem %s563_s7, 32 }
 0x1f6   :  { %p8073_p2 = scmp.lt.s32.totalorder %s563_s7, %s563_s7  ;;  %p8074_p3 = scmp.lt.s32.totalorder %s8072_s11, %s8068_s10 }
 0x1f8   :  { %545 = dma.hbm_to_vmem [thread:$0]  %s9511_s21, 16, %s543_s2, [#allocation45]  }
 0x1f9   :  { %p8075_p4 = por %p8074_p3, %p8073_p2 }
 0x1fb   :  { %p8076_p5 = pnand %p8075_p4, %p8069_p1 }
 0x1fd   :  { %8079 = shalt.err (!%p8076_p5)
}
 0x1fe   :  { %565 = dma.hbm_to_vmem [thread:$0]  %s8631_s4, 16, %s563_s7, [#allocation48]  }
 0x1ff   :  { %s8088_s12 = scalar_lea.vmem %s585_s24, 16  ;;  %s8092_s13 = scalar_lea.vmem %s585_s24, 32 }
 0x200   :  { %p8089_p6 = scmp.ne.s32.totalorder %s585_s24, %s8088_s12  ;;  %p8093_p7 = scmp.lt.s32.totalorder %s585_s24, %s585_s24 }
 0x201   :  { %p8094_p8 = scmp.lt.s32.totalorder %s8092_s13, %s8088_s12 }
 0x203   :  { %p8095_p9 = por %p8094_p8, %p8093_p7 }
 0x205   :  { %p8096_p10 = pnand %p8095_p9, %p8089_p6 }
 0x207   :  { %8099 = shalt.err (!%p8096_p10)
}
 0x208   :  { %587 = dma.hbm_to_vmem [thread:$0]  %s8641_s27, 16, %s585_s24, [#allocation51]  }
 0x209   :  { %8120 = dma.done.wait [#allocation3], 16  }
 0x20a   :  { %8121 = vsyncadd [#allocation3], 4294967280 }
 0x20b   :  { %8122 = dma.done.wait [#allocation6], 32  }
 0x20c   :  { %8123 = vsyncadd [#allocation6], 4294967264 }
 0x20d   :  { %8124 = dma.done.wait [#allocation9], 32  }
 0x20e   :  { %8125 = vsyncadd [#allocation9], 4294967264 }
 0x20f   :  { %8126 = dma.done.wait [#allocation12], 32  }
 0x210   :  { %8127 = vsyncadd [#allocation12], 4294967264 }
 0x211   :  { %8128 = dma.done.wait [#allocation15], 32  }
 0x212   :  { %8129 = vsyncadd [#allocation15], 4294967264 }
 0x213   :  { %8130 = dma.done.wait [#allocation18], 32  }
 0x214   :  { %8131 = vsyncadd [#allocation18], 4294967264 }
 0x215   :  { %8132 = dma.done.wait [#allocation21], 32  }
 0x216   :  { %8133 = vsyncadd [#allocation21], 4294967264 }
 0x217   :  { %8134 = dma.done.wait [#allocation24], 32  }
 0x218   :  { %8135 = vsyncadd [#allocation24], 4294967264 }
 0x219   :  { %8136 = dma.done.wait [#allocation27], 32  }
 0x21a   :  { %8137 = vsyncadd [#allocation27], 4294967264 }
 0x21b   :  { %8138 = dma.done.wait [#allocation30], 32  }
 0x21c   :  { %8139 = vsyncadd [#allocation30], 4294967264 }
 0x21d   :  { %8140 = dma.done.wait [#allocation33], 528  }
 0x21e   :  { %8141 = vsyncadd [#allocation33], 4294966768 }
 0x21f   :  { %8142 = dma.done.wait [#allocation36], 528  }
 0x220   :  { %8143 = vsyncadd [#allocation36], 4294966768 }
 0x221   :  { %8144 = dma.done.wait [#allocation39], 32  }
 0x222   :  { %8145 = vsyncadd [#allocation39], 4294967264 }
 0x223   :  { %8146 = dma.done.wait [#allocation42], 528  }
 0x224   :  { %8147 = vsyncadd [#allocation42], 4294966768 }
 0x225   :  { %8148 = dma.done.wait [#allocation45], 32  }
 0x226   :  { %8149 = vsyncadd [#allocation45], 4294967264 }
 0x227   :  { %8150 = dma.done.wait [#allocation48], 32  }
 0x228   :  { %8151 = vsyncadd [#allocation48], 4294967264 }
 0x229   :  { %8152 = dma.done.wait [#allocation51], 528  }
 0x22a   :  { %8153 = vsyncadd [#allocation51], 4294966768  ;;  %s9512_s27 = sld [smem:[#allocation72_spill]]  ;;  %v8264_v0 = vmov 0   ;;  %v8265_v1 = vmov 0.0   ;;  %vm713_vm0 = vcmask 1041408   ;;  %v688_v11 = vlaneseq }
 0x22b   :  { %s9513_s4 = sld [smem:[#allocation74_spill]]  ;;  %7369 = vset.pattern.permute.xlu0 %v8264_v0  ;;  %6727 = vmatprep.subr.mxu0 %v8265_v1  ;;  %vm8266_vm1 = vmmov 0   ;;  %vm709_vm2 = vcmask 408576   ;;  %vm928_vm4 = vcmask 261120   ;;  %vm813_vm5 = vcmask 1043456   ;;  %s8267_s14 = smov 120  }
 0x22c   :  { %s9514_s30 = sld [smem:[#allocation77_spill]]  ;;  %7370 = vset.pattern.permute.xlu1 %v8264_v0  ;;  %6744 = vmatprep.subr.mxu1 %v8265_v1  ;;  %v8716_v12 = vand.u32 127, %v688_v11  ;;  %vm809_vm7 = vcmask 490496   ;;  %v689_v43 = vshrl.u32 %v688_v11, 7  ;;  %vm1027_vm9 = vcmask 64512   ;;  %s8268_s9 = smov 112  }
 0x22d   :  { %6741 = vmatprep.mubr.msk.f32.mxu0 %vm8266_vm1, %v8265_v1  ;;  %6760 = vmatprep.mubr.msk.f32.mxu1 %vm8266_vm1, %v8265_v1  ;;  %s9515_s15 = sld [smem:[#allocation79_spill]]  ;;  %s8269_s23 = smov 104   ;;  %vm1519_vm10 = vcmask 130048   ;;  %vm1715_vm11 = vcmask 523264  }
 0x22e   :  { %s9516_s16 = sld [smem:[#allocation73_spill]]  ;;  %vm692_vm8 = vcmp.eq.s32.totalorder %v689_v43, %v8716_v12  ;;  %s8270_s25 = smov 96  }
 0x22f   :  { %s9517_s18 = sld [smem:[#allocation76_spill]]  ;;  %v8768_v46 = vsel %vm692_vm8, 1.0, %v8265_v1  ;;  %s8271_s28 = smov 16  }
 0x230   :  { %v695_v2 = vld [vmem:[%s9512_s27] sm:$0xff]  ;;  %s9518_s20 = sld [smem:[#allocation75_spill]] }
 0x231   :  { %v708_v3 = vld [vmem:[%s9513_s4 + $0x30] sm:$0x3]  ;;  %697 = vperm.xlu0 %7369, %v695_v2   ;;  %v707_v4 = vld [vmem:[%s9513_s4 + $0x28] sm:$0xff]  ;;  %v706_v6 = vld [vmem:[%s9513_s4 + $0x20] sm:$0xff]  ;;  %s9519_s22 = sld [smem:[#allocation80_spill]] }
 0x232   :  { %6728 = vmatpush3.msk.msra.mxu0 %vm713_vm0, %v708_v3  ;;  %v787_v5 = vld [vmem:[%s9514_s30] sm:$0xff]  ;;  %v705_v7 = vld [vmem:[%s9513_s4 + $0x18] sm:$0xff]  ;;  %v704_v8 = vld [vmem:[%s9513_s4 + $0x10] sm:$0xff]  ;;  %s9520_s26 = sld [smem:[#allocation81_spill]] }
 0x233   :  { %6729 = vmatprep.subr.mxu0 %v8265_v1  ;;  %v703_v9 = vld [vmem:[%s9513_s4 + $0x8] sm:$0xff]  ;;  %v702_v10 = vld [vmem:[%s9513_s4] sm:$0xff]  ;;  %v897_v14 = vld [vmem:[%s9515_s15 + $0x18] sm:$0xff]  ;;  %s9521_s17 = sld [smem:[#allocation82_spill]] }
 0x234   :  { %6730 = vmatpush3.msra.mxu0 %v707_v4  ;;  %v896_v16 = vld [vmem:[%s9515_s15 + $0x10] sm:$0xff]  ;;  %v895_v17 = vld [vmem:[%s9515_s15 + $0x8] sm:$0xff]  ;;  %v894_v18 = vld [vmem:[%s9515_s15] sm:$0xff]  ;;  %s9522_s1 = sld [smem:[#allocation85_spill]] }
 0x235   :  { %6731 = vmatprep.subr.mxu0 %v8265_v1  ;;  %790 = vperm.xlu0 %7369, %v787_v5   ;;  %v794_v19 = vld [vmem:[%s9516_s16] sm:$0xff]  ;;  %s9523_s2 = sld [smem:[#allocation87_spill]] }
 0x236   :  { %6732 = vmatpush3.msra.mxu0 %v706_v6  ;;  %796 = vperm.xlu1 %7370, %v794_v19   ;;  %v687_v20 = vld [vmem:[%s9517_s18] sm:$0xff]  ;;  %v808_v26 = vld [vmem:[%s9518_s20 + $0x38] sm:$0xf]  ;;  %v807_v27 = vld [vmem:[%s9518_s20 + $0x30] sm:$0xff]  ;;  %s9524_s19 = sld [smem:[#allocation83_spill]] }
 0x237   :  { %6733 = vmatprep.subr.mxu0 %v8265_v1  ;;  %6745 = vmatpush3.msk.msra.mxu1 %vm813_vm5, %v808_v26  ;;  %v806_v28 = vld [vmem:[%s9518_s20 + $0x28] sm:$0xff]  ;;  %v805_v29 = vld [vmem:[%s9518_s20 + $0x20] sm:$0xff]  ;;  %v804_v30 = vld [vmem:[%s9518_s20 + $0x18] sm:$0xff]  ;;  %s9525_s3 = sld [smem:[#allocation84_spill]] }
 0x238   :  { %6734 = vmatpush3.msra.mxu0 %v705_v7  ;;  %6746 = vmatprep.subr.mxu1 %v8265_v1  ;;  %v803_v32 = vld [vmem:[%s9518_s20 + $0x10] sm:$0xff]  ;;  %v802_v33 = vld [vmem:[%s9518_s20 + $0x8] sm:$0xff]  ;;  %v801_v34 = vld [vmem:[%s9518_s20] sm:$0xff]  ;;  %s9526_s0 = sld [smem:[#allocation86_spill]] }
 0x239   :  { %6735 = vmatprep.subr.mxu0 %v8265_v1  ;;  %6747 = vmatpush3.msra.mxu1 %v807_v27  ;;  %v6357_v36 = vld [vmem:[%s9519_s22] ss:$0 sm:$0xff]  ;;  %v901_v26 = vld [vmem:[%s9520_s26 + $0x10] sm:$0xff]  ;;  %v900_v27 = vld [vmem:[%s9520_s26 + $0x8] sm:$0xff]  ;;  %s9527_s8 = sld [smem:[#allocation88_spill]] }
 0x23a   :  { %6736 = vmatpush3.msra.mxu0 %v704_v8  ;;  %6748 = vmatprep.subr.mxu1 %v8265_v1  ;;  %s9528_s21 = sld [smem:[#allocation91_spill]] }
 0x23b   :  { %6737 = vmatprep.subr.mxu0 %v8265_v1  ;;  %6749 = vmatpush3.msra.mxu1 %v806_v28  ;;  %s9529_s29 = sld [smem:[#allocation89_spill]] }
 0x23c   :  { %6738 = vmatpush3.msra.mxu0 %v703_v9  ;;  %6750 = vmatprep.subr.mxu1 %v8265_v1  ;;  %s9530_s7 = sld [smem:[#allocation90_spill]] }
 0x23d   :  { %6739 = vmatprep.subr.mxu0 %v8265_v1  ;;  %6751 = vmatpush3.msra.mxu1 %v805_v29  ;;  %s9531_s6 = sld [smem:[#allocation92_spill]] }
 0x23e   :  { %6740 = vmatpush3.msra.mxu0 %v702_v10  ;;  %6752 = vmatprep.subr.mxu1 %v8265_v1  ;;  %s9532_s24 = sld [smem:[#allocation93_spill]] }
 0x23f   :  { %6763 = vmatprep.subr.mxu0 %v8265_v1  ;;  %6753 = vmatpush3.msra.mxu1 %v804_v30  ;;  %v899_v30 = vld [vmem:[%s9520_s26] sm:$0xff]  ;;  %s9533_s10 = sld [smem:[#allocation94_spill]] }
 0x240   :  { %6754 = vmatprep.subr.mxu1 %v8265_v1  ;;  %s9534_s11 = sld [smem:[#allocation97_spill]] }
 0x241   :  { %6755 = vmatpush3.msra.mxu1 %v803_v32  ;;  %s9535_s12 = sld [smem:[#allocation99_spill]] }
 0x242   :  { %6756 = vmatprep.subr.mxu1 %v8265_v1  ;;  %s9536_s13 = sld [smem:[#allocation95_spill]] }
 0x243   :  { %6757 = vmatpush3.msra.mxu1 %v802_v33  ;;  %s9537_s27 = sld [smem:[#allocation96_spill]] }
 0x244   :  { %6758 = vmatprep.subr.mxu1 %v8265_v1  ;;  %s9538_s4 = sld [smem:[#allocation98_spill]] }
 0x245   :  { %6759 = vmatpush3.msra.mxu1 %v801_v34  ;;  %s9539_s30 = sld [smem:[#allocation100_spill]] }
 0x246   :  { %6774 = vmatprep.subr.mxu1 %v8265_v1  ;;  %s9540_s15 = sld [smem:[#allocation102_spill]] }
 0x247   :  { %s9541_s16 = sld [smem:[#allocation78_spill]] }
 0x248   :  { %s9542_s20 = sld [smem:[#allocation106_spill]] }
 0x249   :  { %s9543_s22 = sld [smem:[#allocation104_spill]] }
 0x2ac   :  { %v698_v13 = vpop.permute.xlu0 %697 }
 0x2ad   :  { %vm699_vm3 = vcmp.eq.s32.totalorder %v698_v13, %v8716_v12 }
 0x2ae   :  { %v6351_v15 = vsel %vm699_vm3, 1.0, %v8265_v1 }
 0x2af   :  { %6742 = vmatmul.mubr.msk.f32.vlgmr.msra.gmra.mxu0 %vm709_vm2, %v6351_v15 }
 0x2b0   :  { %6764 = vmatpush3.msra.mxu0 %v897_v14  ;;  %6771 = vmatprep.mubr.msk.f32.mxu0 %vm8266_vm1, %v8265_v1  ;;  %v791_v23 = vpop.permute.xlu0 %790 }
 0x2b1   :  { %6765 = vmatprep.subr.mxu0 %v8265_v1  ;;  %v797_v31 = vpop.permute.xlu1 %796 }
 0x2b2   :  { %6766 = vmatpush3.msra.mxu0 %v896_v16  ;;  %vm798_vm6 = vcmp.eq.s32.totalorder %v797_v31, %v8716_v12 }
 0x2b3   :  { %6767 = vmatprep.subr.mxu0 %v8265_v1  ;;  %v6354_v35 = vsel %vm798_vm6, 1.0, %v8265_v1 }
 0x2b4   :  { %6768 = vmatpush3.msra.mxu0 %v895_v17  ;;  %6761 = vmatmul.mubr.msk.f32.vlgmr.msra.gmra.mxu1 %vm809_vm7, %v6354_v35  ;;  %v6371_v35 = vld [vmem:[%s9521_s17] ss:$0 sm:$0xff]  ;;  %s9546_s17 = sld [smem:[#allocation112_spill]] }
 0x2b5   :  { %6769 = vmatprep.subr.mxu0 %v8265_v1  ;;  %6776 = vmatprep.mubr.msk.f32.mxu1 %vm8266_vm1, %v8265_v1 }
 0x2b6   :  { %6770 = vmatpush3.msra.mxu0 %v894_v18 }
 0x2b7   :  { %6784 = vmatprep.subr.mxu0 %v8265_v1 }
 0x36f   :  { %v783_v21 = vpop.f32.mrf.mxu0 }
 0x370   :  { %v784_v22 = vadd.f32 %v783_v21, %v687_v20 }
 0x371   :  { %v6743_v24 = vpop.f32.mrf.mxu0 }
 0x372   :  { %v8732_v25 = vmul.f32 %v791_v23, %v784_v22  ;;  %v902_v24 = vld [vmem:[%s9520_s26 + $0x18] sm:$0xff]  ;;  %s9545_s26 = sld [smem:[#allocation109_spill]] }
 0x374   :  { %6772 = vmatmul.mubr.msk.f32.vlgmr.msra.gmra.mxu0 %vm928_vm4, %v8732_v25  ;;  %v8762_v41 = vpop.f32.mrf.mxu1 }
 0x375   :  { %6788 = vmatprep.mubr.msk.f32.mxu0 %vm8266_vm1, %v8265_v1 }
 0x376   :  { %v6762_v42 = vpop.f32.mrf.mxu1 }
 0x434   :  { %v998_v37 = vpop.f32.mrf.mxu0 }
 0x435   :  { %v999_v38 = vadd.f32 %v6357_v36, %v998_v37 }
 0x436   :  { %v6773_v39 = vpop.f32.mrf.mxu0 }
 0x437   :  { %v1003_v40 = vrot.slane %v999_v38, 4 }
 0x439   :  { %1004 = vrot.lane.b32.xlu1 %v1003_v40, %s8267_s14 }
 0x43d   :  { %1009 = vrot.lane.b32.xlu1 %v999_v38, %s8267_s14 }
 0x4ab   :  { %v1005_v44 = vpop.permute.xlu1 %1004 }
 0x4ac   :  { %v1007_v45 = vsel %vm813_vm5, %v999_v38, %v1005_v44 }
 0x4ad   :  { %1104 = vrot.lane.b32.xlu0 %v1007_v45, %s8268_s9  ;;  %6775 = vmatpush3.xpose.msk.msra.mxu1 %vm1027_vm9, %v1007_v45 }
 0x4ae   :  { %6779 = vmatprep.subr.mxu1 %v8265_v1 }
 0x4af   :  { %v1010_v47 = vpop.permute.xlu1 %1009 }
 0x4b0   :  { %6777 = vmatmul.mubr.msk.f32.vlgmr.msra.gmra.mxu1 %vm1027_vm9, %v8768_v46  ;;  %v1012_v48 = vsel %vm813_vm5, %v1003_v40, %v1010_v47 }
 0x4b1   :  { %1346 = vrot.lane.b32.xlu0 %v1012_v48, %s8268_s9  ;;  %6781 = vmatprep.mubr.msk.f32.mxu1 %vm8266_vm1, %v8265_v1 }
 0x51f   :  { %v1105_v49 = vpop.permute.xlu0 %1104 }
 0x520   :  { %6780 = vmatpush3.msra.mxu1 %v1105_v49  ;;  %v908_v49 = vld [vmem:[%s9522_s1 + $0x10] sm:$0xff] }
 0x521   :  { %6791 = vmatprep.subr.mxu1 %v8265_v1 }
 0x523   :  { %v1347_v52 = vpop.permute.xlu0 %1346 }
 0x570   :  { %v1100_v50 = vpop.f32.mrf.mxu1 }
 0x571   :  { %6782 = vmatmul.mubr.msk.f32.vlgmr.msra.gmra.mxu1 %vm1027_vm9, %v1100_v50  ;;  %v906_v50 = vld [vmem:[%s9522_s1] sm:$0xff] }
 0x572   :  { %6792 = vmatpush3.xpose.msk.msra.mxu1 %vm1027_vm9, %v1012_v48  ;;  %v6778_v51 = vpop.f32.mrf.mxu1  ;;  %6793 = vmatprep.mubr.msk.f32.mxu1 %vm8266_vm1, %v8265_v1 }
 0x573   :  { %6796 = vmatprep.subr.mxu1 %v8265_v1  ;;  %v918_v51 = vld [vmem:[%s9523_s2 + $0x38] sm:$0xff] }
 0x575   :  { %6794 = vmatmul.mubr.msk.f32.vlgmr.msra.gmra.mxu1 %vm1027_vm9, %v8768_v46 }
 0x576   :  { %6797 = vmatpush3.msra.mxu1 %v1347_v52  ;;  %6798 = vmatprep.mubr.msk.f32.mxu1 %vm8266_vm1, %v8265_v1  ;;  %v917_v52 = vld [vmem:[%s9523_s2 + $0x30] sm:$0xff] }
 0x577   :  { %6808 = vmatprep.subr.mxu1 %v8265_v1 }
 0x631   :  { %v1176_v53 = vpop.f32.mrf.mxu1 }
 0x632   :  { %v1180_v54 = vsel %vm1027_vm9, %v1176_v53, -inf }
 0x633   :  { %1181 = vmax.xlane.f32.xlu1 %v1180_v54  ;;  %v6783_v55 = vpop.f32.mrf.mxu1  ;;  %v915_v54 = vld [vmem:[%s9523_s2 + $0x20] sm:$0xff] }
 0x634   :  { %v914_v55 = vld [vmem:[%s9523_s2 + $0x18] sm:$0xff] }
 0x635   :  { %v1342_v56 = vpop.f32.mrf.mxu1 }
 0x636   :  { %6799 = vmatmul.mubr.msk.f32.vlgmr.msra.gmra.mxu1 %vm1027_vm9, %v1342_v56 }
 0x637   :  { %v6795_v57 = vpop.f32.mrf.mxu1  ;;  %6816 = vmatprep.mubr.msk.f32.mxu1 %vm8266_vm1, %v8265_v1  ;;  %6809 = vmatpush3.msra.mxu1 %v902_v24  ;;  %v1817_v24 = vld [vmem:[%s9528_s21] sm:$0xff] }
 0x638   :  { %6810 = vmatprep.subr.mxu1 %v8265_v1 }
 0x639   :  { %6811 = vmatpush3.msra.mxu1 %v901_v26 }
 0x63a   :  { %6812 = vmatprep.subr.mxu1 %v8265_v1 }
 0x63b   :  { %6813 = vmatpush3.msra.mxu1 %v900_v27 }
 0x63c   :  { %6814 = vmatprep.subr.mxu1 %v8265_v1 }
 0x63d   :  { %6815 = vmatpush3.msra.mxu1 %v899_v30  ;;  %v6379_v30 = vld [vmem:[%s9529_s29] ss:$0 sm:$0xff] }
 0x63e   :  { %6830 = vmatprep.subr.mxu1 %v8265_v1 }
 0x644   :  { %1016 = vrot.lane.b32.xlu1 %v1003_v40, %s8269_s23 }
 0x648   :  { %1020 = vrot.lane.b32.xlu1 %v1003_v40, %s8268_s9 }
 0x6bc   :  { %v1182_v58 = vpop.xlane.xlu1 %1181 }
 0x6bd   :  { %v1183_v59 = vsub.f32 %v1176_v53, %v1182_v58  ;;  %v916_v53 = vld [vmem:[%s9523_s2 + $0x28] sm:$0xff] }
 0x6bf   :  { %v1184_v60 = vmul.f32 1.442695, %v1183_v59 }
 0x6c0   :  { %v1017_v4 = vpop.permute.xlu1 %1016 }
 0x6c1   :  { %7371 = vpow2.f32 %v1184_v60  ;;  %v6373_v60 = vld [vmem:[%s9524_s19] ss:$0 sm:$0xff]  ;;  %s9549_s19 = sld [smem:[#allocation120_spill]] }
 0x6c4   :  { %v1021_v7 = vpop.permute.xlu1 %1020 }
 0x6ce   :  { %v7372_v61 = vpop.eup %7371 }
 0x6cf   :  { %v1186_v62 = vsel %vm1027_vm9, %v7372_v61, 0.0 }
 0x6d0   :  { %1187 = vadd.xlane.f32.xlu1 %v1186_v62  ;;  %v6374_v62 = vld [vmem:[%s9525_s3] ss:$0 sm:$0xff] }
 0x6e1   :  { %1192 = vrot.lane.b32.xlu1 %v1007_v45, %s8270_s25 }
 0x6f6   :  { %v1418_v63 = vpop.f32.mrf.mxu1 }
 0x6f7   :  { %v1422_v0 = vsel %vm1027_vm9, %v1418_v63, -inf }
 0x6f8   :  { %1423 = vmax.xlane.f32.xlu0 %v1422_v0  ;;  %v6800_v2 = vpop.f32.mrf.mxu1 }
 0x6f9   :  { %v913_v2 = vld [vmem:[%s9523_s2 + $0x10] sm:$0xff] }
 0x70e   :  { %1013 = vrot.lane.b32.xlu0 %v999_v38, %s8268_s9 }
 0x712   :  { %1023 = vrot.lane.b32.xlu0 %v999_v38, %s8269_s23 }
 0x759   :  { %v1188_v14 = vpop.xlane.xlu1 %1187 }
 0x75d   :  { %v1193_v17 = vpop.permute.xlu1 %1192 }
 0x781   :  { %v1424_v3 = vpop.xlane.xlu0 %1423 }
 0x782   :  { %v1425_v10 = vsub.f32 %v1418_v63, %v1424_v3  ;;  %v912_v3 = vld [vmem:[%s9523_s2 + $0x8] sm:$0xff] }
 0x784   :  { %v1426_v11 = vmul.f32 1.442695, %v1425_v10  ;;  %v6377_v10 = vld [vmem:[%s9527_s8] ss:$0 sm:$0xff] }
 0x785   :  { %v1014_v5 = vpop.permute.xlu0 %1013 }
 0x786   :  { %v1019_v6 = vsel %vm813_vm5, %v1014_v5, %v1017_v4  ;;  %7373 = vpow2.f32 %v1426_v11  ;;  %v911_v4 = vld [vmem:[%s9523_s2] sm:$0xff]  ;;  %s9548_s2 = sld [smem:[#allocation116_spill]] }
 0x787   :  { %1194 = vrot.lane.b32.xlu0 %v1019_v6, %s8270_s25  ;;  %7375 = vrcp.f32 %v1188_v14  ;;  %v6375_v5 = vld [vmem:[%s9526_s0] ss:$0 sm:$0xff] }
 0x789   :  { %v1024_v8 = vpop.permute.xlu0 %1023 }
 0x78a   :  { %v1026_v9 = vsel %vm813_vm5, %v1021_v7, %v1024_v8 }
 0x78b   :  { %1436 = vrot.lane.b32.xlu1 %v1026_v9, %s8270_s25 }
 0x793   :  { %v7374_v12 = vpop.eup %7373 }
 0x794   :  { %v1428_v13 = vsel %vm1027_vm9, %v7374_v12, 0.0  ;;  %v7376_v16 = vpop.eup %7375 }
 0x795   :  { %v1190_v18 = vmul.f32 %v7376_v16, %v7372_v61 }
 0x7a6   :  { %1429 = vadd.xlane.f32.xlu0 %v1428_v13 }
 0x7bc   :  { %1434 = vrot.lane.b32.xlu0 %v1012_v48, %s8270_s25  ;;  %v909_v48 = vld [vmem:[%s9522_s1 + $0x18] sm:$0xff] }
 0x7f9   :  { %v1195_v15 = vpop.permute.xlu0 %1194 }
 0x7fa   :  { %6785 = vmatpush3.xpose.msk.msra.mxu0 %vm1027_vm9, %v1195_v15 }
 0x7fb   :  { %6786 = vmatprep.subr.mxu0 %v8265_v1 }
 0x7fd   :  { %v1437_v19 = vpop.permute.xlu1 %1436 }
 0x7fe   :  { %6787 = vmatpush3.xpose.msk.msra.mxu0 %vm1027_vm9, %v1193_v17 }
 0x7ff   :  { %6801 = vmatprep.subr.mxu0 %v8265_v1 }
 0x801   :  { %6789 = vmatmul.mubr.msk.f32.vlgmr.msra.gmra.mxu0 %vm1027_vm9, %v1190_v18 }
 0x802   :  { %6802 = vmatpush3.xpose.msk.msra.mxu0 %vm1027_vm9, %v1437_v19  ;;  %6805 = vmatprep.mubr.msk.f32.mxu0 %vm8266_vm1, %v8265_v1 }
 0x803   :  { %6803 = vmatprep.subr.mxu0 %v8265_v1 }
 0x82f   :  { %v1430_v20 = vpop.xlane.xlu0 %1429 }
 0x830   :  { %7377 = vrcp.f32 %v1430_v20 }
 0x833   :  { %v1435_v21 = vpop.permute.xlu0 %1434 }
 0x834   :  { %6804 = vmatpush3.xpose.msk.msra.mxu0 %vm1027_vm9, %v1435_v21  ;;  %v1820_v21 = vld [vmem:[%s9528_s21 + $0x18] sm:$0xff] }
 0x835   :  { %6819 = vmatprep.subr.mxu0 %v8265_v1 }
 0x83d   :  { %v7378_v22 = vpop.eup %7377 }
 0x83e   :  { %v1432_v23 = vmul.f32 %v7378_v22, %v7374_v12  ;;  %v1819_v22 = vld [vmem:[%s9528_s21 + $0x10] sm:$0xff] }
 0x840   :  { %6806 = vmatmul.mubr.msk.f32.vlgmr.msra.gmra.mxu0 %vm1027_vm9, %v1432_v23  ;;  %v1818_v23 = vld [vmem:[%s9528_s21 + $0x8] sm:$0xff] }
 0x841   :  { %6827 = vmatprep.mubr.msk.f32.mxu0 %vm8266_vm1, %v8265_v1  ;;  %6820 = vmatpush3.msra.mxu0 %v909_v48 }
 0x842   :  { %6821 = vmatprep.subr.mxu0 %v8265_v1 }
 0x843   :  { %6822 = vmatpush3.msra.mxu0 %v908_v49 }
 0x844   :  { %6823 = vmatprep.subr.mxu0 %v8265_v1 }
 0x8c1   :  { %v1269_v28 = vpop.f32.mrf.mxu0 }
 0x8c3   :  { %v6790_v29 = vpop.f32.mrf.mxu0 }
 0x900   :  { %v1511_v31 = vpop.f32.mrf.mxu0 }
 0x901   :  { %1516 = vrot.lane.b32.xlu1 %v1511_v31, %s8271_s28 }
 0x902   :  { %v6807_v32 = vpop.f32.mrf.mxu0 }
 0x903   :  { %v6380_v32 = vld [vmem:[%s9530_s7] ss:$0 sm:$0xff] }
 0x973   :  { %v1517_v33 = vpop.permute.xlu1 %1516 }
 0x974   :  { %v1520_v34 = vsel %vm1519_vm10, %v1269_v28, %v1517_v33 }
 0x975   :  { %6817 = vmatmul.mubr.msk.f32.vlgmr.msra.gmra.mxu1 %vm928_vm4, %v1520_v34 }
 0x976   :  { %6846 = vmatprep.mubr.msk.f32.mxu1 %vm8266_vm1, %v8265_v1  ;;  %6831 = vmatpush3.msra.mxu1 %v918_v51 }
 0x977   :  { %6832 = vmatprep.subr.mxu1 %v8265_v1 }
 0x978   :  { %6833 = vmatpush3.msra.mxu1 %v917_v52 }
 0x979   :  { %6834 = vmatprep.subr.mxu1 %v8265_v1 }
 0x97a   :  { %6835 = vmatpush3.msra.mxu1 %v916_v53 }
 0x97b   :  { %6836 = vmatprep.subr.mxu1 %v8265_v1 }
 0x97c   :  { %6837 = vmatpush3.msra.mxu1 %v915_v54 }
 0x97d   :  { %6838 = vmatprep.subr.mxu1 %v8265_v1 }
 0x97e   :  { %6839 = vmatpush3.msra.mxu1 %v914_v55 }
 0x97f   :  { %6840 = vmatprep.subr.mxu1 %v8265_v1 }
 0x980   :  { %6841 = vmatpush3.msra.mxu1 %v913_v2 }
 0x981   :  { %6842 = vmatprep.subr.mxu1 %v8265_v1 }
 0x982   :  { %6843 = vmatpush3.msra.mxu1 %v912_v3 }
 0x983   :  { %6844 = vmatprep.subr.mxu1 %v8265_v1 }
 0x984   :  { %6845 = vmatpush3.msra.mxu1 %v911_v4 }
 0x985   :  { %6865 = vmatprep.subr.mxu1 %v8265_v1 }
 0xa35   :  { %v1596_v36 = vpop.f32.mrf.mxu1 }
 0xa36   :  { %v1597_v37 = vadd.f32 %v6371_v35, %v1596_v36  ;;  %v6381_v35 = vld [vmem:[%s9531_s6] ss:$0 sm:$0xff] }
 0xa37   :  { %v6818_v38 = vpop.f32.mrf.mxu1 }
 0xa38   :  { %v1600_v39 = vadd.f32 %v1597_v37, %v8732_v25  ;;  %v907_v25 = vld [vmem:[%s9522_s1 + $0x8] sm:$0xff]  ;;  %s9547_s1 = sld [smem:[#allocation113_spill]] }
 0xa39   :  { %6824 = vmatpush3.msra.mxu0 %v907_v25 }
 0xa3a   :  { %v1601_v40 = vsel %vm928_vm4, %v1600_v39, 0.0  ;;  %6825 = vmatprep.subr.mxu0 %v8265_v1 }
 0xa3b   :  { %1602 = vadd.xlane.f32.xlu0 %v1601_v40  ;;  %6826 = vmatpush3.msra.mxu0 %v906_v50 }
 0xa3c   :  { %6849 = vmatprep.subr.mxu0 %v8265_v1 }
 0xac4   :  { %v1603_v42 = vpop.xlane.xlu0 %1602 }
 0xac5   :  { %v1605_v43 = vmul.f32 0.03125, %v1603_v42 }
 0xac7   :  { %v1606_v44 = vsub.f32 %v1600_v39, %v1605_v43 }
 0xac9   :  { %v1607_v45 = vmul.f32 %v1606_v44, %v1606_v44 }
 0xacb   :  { %v1608_v47 = vsel %vm928_vm4, %v1607_v45, 0.0 }
 0xacc   :  { %1609 = vadd.xlane.f32.xlu1 %v1608_v47 }
 0xb55   :  { %v1610_v56 = vpop.xlane.xlu1 %1609 }
 0xb56   :  { %v1611_v57 = vmul.f32 0.03125, %v1610_v56 }
 0xb58   :  { %v1612_v58 = vadd.f32 1e-05, %v1611_v57 }
 0xb5a   :  { %7379 = vrsqrt.f32 %v1612_v58 }
 0xb67   :  { %v7380_v59 = vpop.eup %7379 }
 0xb68   :  { %v1614_v61 = vmul.f32 %v7380_v59, %v1606_v44 }
 0xb6a   :  { %v1621_v63 = vmul.f32 %v6373_v60, %v1614_v61 }
 0xb6c   :  { %v1628_v0 = vadd.f32 %v6374_v62, %v1621_v63 }
 0xb6e   :  { %6828 = vmatmul.mubr.msk.f32.vlgmr.msra.gmra.mxu0 %vm928_vm4, %v1628_v0 }
 0xb6f   :  { %6857 = vmatprep.mubr.msk.f32.mxu0 %vm8266_vm1, %v8265_v1  ;;  %6850 = vmatpush3.msra.mxu0 %v1820_v21  ;;  %v1824_v21 = vld [vmem:[%s9532_s24 + $0x10] sm:$0xff] }
 0xb70   :  { %6851 = vmatprep.subr.mxu0 %v8265_v1 }
 0xb71   :  { %6852 = vmatpush3.msra.mxu0 %v1819_v22  ;;  %v1823_v22 = vld [vmem:[%s9532_s24 + $0x8] sm:$0xff] }
 0xb72   :  { %6853 = vmatprep.subr.mxu0 %v8265_v1 }
 0xb73   :  { %6854 = vmatpush3.msra.mxu0 %v1818_v23 }
 0xb74   :  { %6855 = vmatprep.subr.mxu0 %v8265_v1 }
 0xb75   :  { %6856 = vmatpush3.msra.mxu0 %v1817_v24 }
 0xb76   :  { %6860 = vmatprep.subr.mxu0 %v8265_v1 }
 0xc2e   :  { %v1704_v6 = vpop.f32.mrf.mxu0 }
 0xc2f   :  { %v1705_v7 = vadd.f32 %v6375_v5, %v1704_v6 }
 0xc30   :  { %v6829_v8 = vpop.f32.mrf.mxu0 }
 0xc31   :  { %v1708_v9 = vmax.f32 %v1705_v7, 0.0 }
 0xc33   :  { %6847 = vmatmul.mubr.msk.f32.vlgmr.msra.gmra.mxu1 %vm1715_vm11, %v1708_v9 }
 0xc34   :  { %6867 = vmatprep.mubr.msk.f32.mxu1 %vm8266_vm1, %v8265_v1 }
 0xcf3   :  { %v1785_v11 = vpop.f32.mrf.mxu1 }
 0xcf4   :  { %v1786_v12 = vadd.f32 %v6377_v10, %v1785_v11 }
 0xcf5   :  { %v6848_v13 = vpop.f32.mrf.mxu1 }
 0xcf6   :  { %v1789_v14 = vadd.f32 %v1786_v12, %v1786_v12 }
 0xcf8   :  { %v1790_v15 = vsel %vm928_vm4, %v1789_v14, 0.0 }
 0xcf9   :  { %1791 = vadd.xlane.f32.xlu0 %v1790_v15 }
 0xd82   :  { %v1792_v16 = vpop.xlane.xlu0 %1791 }
 0xd83   :  { %v1793_v17 = vmul.f32 0.03125, %v1792_v16 }
 0xd85   :  { %v1794_v18 = vsub.f32 %v1789_v14, %v1793_v17 }
 0xd87   :  { %v1795_v19 = vmul.f32 %v1794_v18, %v1794_v18 }
 0xd89   :  { %v1796_v20 = vsel %vm928_vm4, %v1795_v19, 0.0 }
 0xd8a   :  { %1797 = vadd.xlane.f32.xlu0 %v1796_v20  ;;  %v1825_v20 = vld [vmem:[%s9532_s24 + $0x18] sm:$0xff] }
 0xe13   :  { %v1798_v26 = vpop.xlane.xlu0 %1797 }
 0xe14   :  { %v1799_v27 = vmul.f32 0.03125, %v1798_v26  ;;  %v1822_v26 = vld [vmem:[%s9532_s24] sm:$0xff] }
 0xe16   :  { %v1800_v28 = vadd.f32 1e-05, %v1799_v27 }
 0xe18   :  { %7381 = vrsqrt.f32 %v1800_v28 }
 0xe25   :  { %v7382_v29 = vpop.eup %7381 }
 0xe26   :  { %v1802_v31 = vmul.f32 %v7382_v29, %v1794_v18 }
 0xe28   :  { %v1809_v33 = vmul.f32 %v6379_v30, %v1802_v31  ;;  %v6395_v31 = vld [vmem:[%s9533_s10] ss:$0 sm:$0xff] }
 0xe2a   :  { %v8884_v34 = vadd.f32 %v6380_v32, %v1809_v33 }
 0xe2c   :  { %6858 = vmatmul.mubr.msk.f32.vlgmr.msra.gmra.mxu0 %vm928_vm4, %v8884_v34 }
 0xe2d   :  { %6862 = vmatprep.mubr.msk.f32.mxu0 %vm8266_vm1, %v8265_v1 }
 0xeec   :  { %v1920_v36 = vpop.f32.mrf.mxu0 }
 0xeed   :  { %v1921_v37 = vadd.f32 %v6381_v35, %v1920_v36 }
 0xeee   :  { %v6859_v38 = vpop.f32.mrf.mxu0 }
 0xeef   :  { %v1925_v39 = vrot.slane %v1921_v37, 4 }
 0xef1   :  { %1926 = vrot.lane.b32.xlu1 %v1925_v39, %s8267_s14 }
 0xef5   :  { %1931 = vrot.lane.b32.xlu1 %v1921_v37, %s8267_s14 }
 0xf63   :  { %v1927_v40 = vpop.permute.xlu1 %1926 }
 0xf64   :  { %v1929_v42 = vsel %vm813_vm5, %v1921_v37, %v1927_v40 }
 0xf65   :  { %2022 = vrot.lane.b32.xlu0 %v1929_v42, %s8268_s9  ;;  %6861 = vmatpush3.xpose.msk.msra.mxu0 %vm1027_vm9, %v1929_v42 }
 0xf66   :  { %6870 = vmatprep.subr.mxu0 %v8265_v1 }
 0xf67   :  { %v1932_v43 = vpop.permute.xlu1 %1931 }
 0xf68   :  { %6863 = vmatmul.mubr.msk.f32.vlgmr.msra.gmra.mxu0 %vm1027_vm9, %v8768_v46  ;;  %v1934_v44 = vsel %vm813_vm5, %v1925_v39, %v1932_v43 }
 0xf69   :  { %2264 = vrot.lane.b32.xlu1 %v1934_v44, %s8268_s9  ;;  %6874 = vmatprep.mubr.msk.f32.mxu0 %vm8266_vm1, %v8265_v1 }
 0xfd7   :  { %v2023_v45 = vpop.permute.xlu0 %2022 }
 0xfd8   :  { %6866 = vmatpush3.msra.mxu1 %v2023_v45  ;;  %v1831_v45 = vld [vmem:[%s9534_s11 + $0x10] sm:$0xff] }
 0xfd9   :  { %6877 = vmatprep.subr.mxu1 %v8265_v1 }
 0xfdb   :  { %v2265_v49 = vpop.permute.xlu1 %2264 }
0x1028   :  { %v2018_v47 = vpop.f32.mrf.mxu0 }
0x1029   :  { %6868 = vmatmul.mubr.msk.f32.vlgmr.msra.gmra.mxu1 %vm1027_vm9, %v2018_v47  ;;  %v1829_v47 = vld [vmem:[%s9534_s11] sm:$0xff] }
0x102a   :  { %6878 = vmatpush3.xpose.msk.msra.mxu1 %vm1027_vm9, %v1934_v44  ;;  %v6864_v48 = vpop.f32.mrf.mxu0  ;;  %6879 = vmatprep.mubr.msk.f32.mxu1 %vm8266_vm1, %v8265_v1 }
0x102b   :  { %6882 = vmatprep.subr.mxu1 %v8265_v1  ;;  %v1841_v48 = vld [vmem:[%s9535_s12 + $0x38] sm:$0xff] }
0x102d   :  { %6880 = vmatmul.mubr.msk.f32.vlgmr.msra.gmra.mxu1 %vm1027_vm9, %v8768_v46 }
0x102e   :  { %6883 = vmatpush3.msra.mxu1 %v2265_v49  ;;  %6884 = vmatprep.mubr.msk.f32.mxu1 %vm8266_vm1, %v8265_v1  ;;  %v1840_v49 = vld [vmem:[%s9535_s12 + $0x30] sm:$0xff] }
0x102f   :  { %6894 = vmatprep.subr.mxu1 %v8265_v1 }
0x10e9   :  { %v2094_v25 = vpop.f32.mrf.mxu1 }
0x10ea   :  { %v2098_v50 = vsel %vm1027_vm9, %v2094_v25, -inf }
0x10eb   :  { %2099 = vmax.xlane.f32.xlu0 %v2098_v50  ;;  %v6869_v51 = vpop.f32.mrf.mxu1  ;;  %v1838_v50 = vld [vmem:[%s9535_s12 + $0x20] sm:$0xff] }
0x10ec   :  { %v1837_v51 = vld [vmem:[%s9535_s12 + $0x18] sm:$0xff] }
0x10ed   :  { %v2260_v52 = vpop.f32.mrf.mxu1 }
0x10ee   :  { %6885 = vmatmul.mubr.msk.f32.vlgmr.msra.gmra.mxu1 %vm1027_vm9, %v2260_v52 }
0x10ef   :  { %v6881_v53 = vpop.f32.mrf.mxu1  ;;  %6902 = vmatprep.mubr.msk.f32.mxu1 %vm8266_vm1, %v8265_v1  ;;  %6895 = vmatpush3.msra.mxu1 %v1825_v20  ;;  %v2732_v20 = vld [vmem:[%s9540_s15] sm:$0xff] }
0x10f0   :  { %6896 = vmatprep.subr.mxu1 %v8265_v1 }
0x10f1   :  { %6897 = vmatpush3.msra.mxu1 %v1824_v21 }
0x10f2   :  { %6898 = vmatprep.subr.mxu1 %v8265_v1 }
0x10f3   :  { %6899 = vmatpush3.msra.mxu1 %v1823_v22 }
0x10f4   :  { %6900 = vmatprep.subr.mxu1 %v8265_v1 }
0x10f5   :  { %6901 = vmatpush3.msra.mxu1 %v1822_v26  ;;  %v6403_v26 = vld [vmem:[#allocation2] ss:$0 sm:$0xff] }
0x10f6   :  { %6916 = vmatprep.subr.mxu1 %v8265_v1 }
0x1101   :  { %1935 = vrot.lane.b32.xlu0 %v1921_v37, %s8268_s9 }
0x1105   :  { %1942 = vrot.lane.b32.xlu0 %v1925_v39, %s8268_s9 }
0x1174   :  { %v2100_v54 = vpop.xlane.xlu0 %2099 }
0x1175   :  { %v2101_v55 = vsub.f32 %v2094_v25, %v2100_v54  ;;  %v1839_v25 = vld [vmem:[%s9535_s12 + $0x28] sm:$0xff] }
0x1177   :  { %v2102_v56 = vmul.f32 1.442695, %v2101_v55 }
0x1178   :  { %v1936_v0 = vpop.permute.xlu0 %1935 }
0x1179   :  { %7383 = vpow2.f32 %v2102_v56  ;;  %v6397_v56 = vld [vmem:[%s9536_s13] ss:$0 sm:$0xff] }
0x117c   :  { %v1943_v5 = vpop.permute.xlu0 %1942 }
0x1186   :  { %v7384_v57 = vpop.eup %7383 }
0x1187   :  { %v2104_v58 = vsel %vm1027_vm9, %v7384_v57, 0.0 }
0x1188   :  { %2105 = vadd.xlane.f32.xlu0 %v2104_v58  ;;  %v6398_v58 = vld [vmem:[%s9537_s27] ss:$0 sm:$0xff] }
0x11ae   :  { %v2336_v59 = vpop.f32.mrf.mxu1 }
0x11af   :  { %v2340_v60 = vsel %vm1027_vm9, %v2336_v59, -inf }
0x11b0   :  { %2341 = vmax.xlane.f32.xlu1 %v2340_v60  ;;  %v6886_v61 = vpop.f32.mrf.mxu1 }
0x11b1   :  { %v1836_v61 = vld [vmem:[%s9535_s12 + $0x10] sm:$0xff] }
0x11c1   :  { %1938 = vrot.lane.b32.xlu1 %v1925_v39, %s8269_s23 }
0x11c5   :  { %1945 = vrot.lane.b32.xlu1 %v1921_v37, %s8269_s23 }
0x11c9   :  { %2110 = vrot.lane.b32.xlu1 %v1929_v42, %s8270_s25 }
0x1211   :  { %v2106_v10 = vpop.xlane.xlu0 %2105 }
0x1239   :  { %v2342_v62 = vpop.xlane.xlu1 %2341 }
0x123a   :  { %v2343_v63 = vsub.f32 %v2336_v59, %v2342_v62  ;;  %v1835_v62 = vld [vmem:[%s9535_s12 + $0x8] sm:$0xff] }
0x123c   :  { %v2344_v2 = vmul.f32 1.442695, %v2343_v63  ;;  %v1834_v63 = vld [vmem:[%s9535_s12] sm:$0xff] }
0x123d   :  { %v1939_v3 = vpop.permute.xlu1 %1938 }
0x123e   :  { %7385 = vpow2.f32 %v2344_v2  ;;  %v1941_v4 = vsel %vm813_vm5, %v1936_v0, %v1939_v3  ;;  %v6399_v0 = vld [vmem:[%s9538_s4] ss:$0 sm:$0xff] }
0x123f   :  { %2112 = vrot.lane.b32.xlu0 %v1941_v4, %s8270_s25  ;;  %7387 = vrcp.f32 %v2106_v10 }
0x1241   :  { %v1946_v6 = vpop.permute.xlu1 %1945 }
0x1242   :  { %v1948_v7 = vsel %vm813_vm5, %v1943_v5, %v1946_v6  ;;  %v6401_v6 = vld [vmem:[%s9539_s30] ss:$0 sm:$0xff] }
0x1243   :  { %2354 = vrot.lane.b32.xlu0 %v1948_v7, %s8270_s25 }
0x1245   :  { %v2111_v13 = vpop.permute.xlu1 %2110 }
0x124b   :  { %v7386_v8 = vpop.eup %7385 }
0x124c   :  { %v2346_v9 = vsel %vm1027_vm9, %v7386_v8, 0.0  ;;  %v7388_v12 = vpop.eup %7387 }
0x124d   :  { %2347 = vadd.xlane.f32.xlu1 %v2346_v9  ;;  %v2108_v14 = vmul.f32 %v7388_v12, %v7384_v57 }
0x125e   :  { %2352 = vrot.lane.b32.xlu1 %v1934_v44, %s8270_s25  ;;  %v1832_v44 = vld [vmem:[%s9534_s11 + $0x18] sm:$0xff] }
0x12b1   :  { %v2113_v11 = vpop.permute.xlu0 %2112 }
0x12b2   :  { %6871 = vmatpush3.xpose.msk.msra.mxu0 %vm1027_vm9, %v2113_v11 }
0x12b3   :  { %6872 = vmatprep.subr.mxu0 %v8265_v1 }
0x12b5   :  { %v2355_v15 = vpop.permute.xlu0 %2354 }
0x12b6   :  { %6873 = vmatpush3.xpose.msk.msra.mxu0 %vm1027_vm9, %v2111_v13 }
0x12b7   :  { %6887 = vmatprep.subr.mxu0 %v8265_v1 }
0x12b9   :  { %6875 = vmatmul.mubr.msk.f32.vlgmr.msra.gmra.mxu0 %vm1027_vm9, %v2108_v14 }
0x12ba   :  { %6888 = vmatpush3.xpose.msk.msra.mxu0 %vm1027_vm9, %v2355_v15  ;;  %6891 = vmatprep.mubr.msk.f32.mxu0 %vm8266_vm1, %v8265_v1 }
0x12bb   :  { %6889 = vmatprep.subr.mxu0 %v8265_v1 }
0x12d6   :  { %v2348_v16 = vpop.xlane.xlu1 %2347 }
0x12d7   :  { %7389 = vrcp.f32 %v2348_v16 }
0x12da   :  { %v2353_v17 = vpop.permute.xlu1 %2352 }
0x12db   :  { %6890 = vmatpush3.xpose.msk.msra.mxu0 %vm1027_vm9, %v2353_v17  ;;  %v2735_v17 = vld [vmem:[%s9540_s15 + $0x18] sm:$0xff] }
0x12dc   :  { %6905 = vmatprep.subr.mxu0 %v8265_v1 }
0x12e4   :  { %v7390_v18 = vpop.eup %7389 }
0x12e5   :  { %v2350_v19 = vmul.f32 %v7390_v18, %v7386_v8  ;;  %v2734_v18 = vld [vmem:[%s9540_s15 + $0x10] sm:$0xff] }
0x12e7   :  { %6892 = vmatmul.mubr.msk.f32.vlgmr.msra.gmra.mxu0 %vm1027_vm9, %v2350_v19  ;;  %v2733_v19 = vld [vmem:[%s9540_s15 + $0x8] sm:$0xff] }
0x12e8   :  { %6913 = vmatprep.mubr.msk.f32.mxu0 %vm8266_vm1, %v8265_v1  ;;  %6906 = vmatpush3.msra.mxu0 %v1832_v44 }
0x12e9   :  { %6907 = vmatprep.subr.mxu0 %v8265_v1 }
0x12ea   :  { %6908 = vmatpush3.msra.mxu0 %v1831_v45 }
0x12eb   :  { %6909 = vmatprep.subr.mxu0 %v8265_v1 }
0x1379   :  { %v2187_v23 = vpop.f32.mrf.mxu0 }
0x137b   :  { %v6876_v24 = vpop.f32.mrf.mxu0 }
0x13a7   :  { %v2429_v27 = vpop.f32.mrf.mxu0 }
0x13a8   :  { %2434 = vrot.lane.b32.xlu0 %v2429_v27, %s8271_s28 }
0x13a9   :  { %v6893_v28 = vpop.f32.mrf.mxu0 }
0x13aa   :  { %v6404_v28 = vld [vmem:[#allocation5] ss:$0 sm:$0xff] }
0x141a   :  { %v2435_v29 = vpop.permute.xlu0 %2434 }
0x141b   :  { %v2437_v30 = vsel %vm1519_vm10, %v2187_v23, %v2435_v29 }
0x141c   :  { %6903 = vmatmul.mubr.msk.f32.vlgmr.msra.gmra.mxu1 %vm928_vm4, %v2437_v30 }
0x141d   :  { %6932 = vmatprep.mubr.msk.f32.mxu1 %vm8266_vm1, %v8265_v1  ;;  %6917 = vmatpush3.msra.mxu1 %v1841_v48 }
0x141e   :  { %6918 = vmatprep.subr.mxu1 %v8265_v1 }
0x141f   :  { %6919 = vmatpush3.msra.mxu1 %v1840_v49 }
0x1420   :  { %6920 = vmatprep.subr.mxu1 %v8265_v1 }
0x1421   :  { %6921 = vmatpush3.msra.mxu1 %v1839_v25 }
0x1422   :  { %6922 = vmatprep.subr.mxu1 %v8265_v1 }
0x1423   :  { %6923 = vmatpush3.msra.mxu1 %v1838_v50 }
0x1424   :  { %6924 = vmatprep.subr.mxu1 %v8265_v1 }
0x1425   :  { %6925 = vmatpush3.msra.mxu1 %v1837_v51 }
0x1426   :  { %6926 = vmatprep.subr.mxu1 %v8265_v1 }
0x1427   :  { %6927 = vmatpush3.msra.mxu1 %v1836_v61 }
0x1428   :  { %6928 = vmatprep.subr.mxu1 %v8265_v1 }
0x1429   :  { %6929 = vmatpush3.msra.mxu1 %v1835_v62 }
0x142a   :  { %6930 = vmatprep.subr.mxu1 %v8265_v1 }
0x142b   :  { %6931 = vmatpush3.msra.mxu1 %v1834_v63 }
0x142c   :  { %6951 = vmatprep.subr.mxu1 %v8265_v1 }
0x14dc   :  { %v2513_v32 = vpop.f32.mrf.mxu1 }
0x14dd   :  { %v2514_v33 = vadd.f32 %v6395_v31, %v2513_v32  ;;  %v6405_v31 = vld [vmem:[#allocation7] ss:$0 sm:$0xff] }
0x14de   :  { %v6904_v35 = vpop.f32.mrf.mxu1 }
0x14df   :  { %v2517_v36 = vadd.f32 %v2514_v33, %v8884_v34  ;;  %v1830_v34 = vld [vmem:[%s9534_s11 + $0x8] sm:$0xff] }
0x14e0   :  { %6910 = vmatpush3.msra.mxu0 %v1830_v34 }
0x14e1   :  { %v2518_v37 = vsel %vm928_vm4, %v2517_v36, 0.0  ;;  %6911 = vmatprep.subr.mxu0 %v8265_v1 }
0x14e2   :  { %2519 = vadd.xlane.f32.xlu1 %v2518_v37  ;;  %6912 = vmatpush3.msra.mxu0 %v1829_v47 }
0x14e3   :  { %6935 = vmatprep.subr.mxu0 %v8265_v1 }
0x156b   :  { %v2520_v38 = vpop.xlane.xlu1 %2519 }
0x156c   :  { %v2521_v39 = vmul.f32 0.03125, %v2520_v38 }
0x156e   :  { %v2522_v40 = vsub.f32 %v2517_v36, %v2521_v39 }
0x1570   :  { %v2523_v42 = vmul.f32 %v2522_v40, %v2522_v40 }
0x1572   :  { %v2524_v43 = vsel %vm928_vm4, %v2523_v42, 0.0 }
0x1573   :  { %2525 = vadd.xlane.f32.xlu0 %v2524_v43 }
0x15fc   :  { %v2526_v52 = vpop.xlane.xlu0 %2525 }
0x15fd   :  { %v2527_v53 = vmul.f32 0.03125, %v2526_v52 }
0x15ff   :  { %v2528_v54 = vadd.f32 1e-05, %v2527_v53 }
0x1601   :  { %7391 = vrsqrt.f32 %v2528_v54 }
0x160e   :  { %v7392_v55 = vpop.eup %7391 }
0x160f   :  { %v2530_v57 = vmul.f32 %v7392_v55, %v2522_v40 }
0x1611   :  { %v2537_v59 = vmul.f32 %v6397_v56, %v2530_v57 }
0x1613   :  { %v2544_v60 = vadd.f32 %v6398_v58, %v2537_v59 }
0x1615   :  { %6914 = vmatmul.mubr.msk.f32.vlgmr.msra.gmra.mxu0 %vm928_vm4, %v2544_v60 }
0x1616   :  { %6943 = vmatprep.mubr.msk.f32.mxu0 %vm8266_vm1, %v8265_v1  ;;  %6936 = vmatpush3.msra.mxu0 %v2735_v17  ;;  %v2747_v17 = vld [vmem:[%s9542_s20 + $0x18] sm:$0xff] }
0x1617   :  { %6937 = vmatprep.subr.mxu0 %v8265_v1 }
0x1618   :  { %6938 = vmatpush3.msra.mxu0 %v2734_v18  ;;  %v2746_v18 = vld [vmem:[%s9542_s20 + $0x10] sm:$0xff] }
0x1619   :  { %6939 = vmatprep.subr.mxu0 %v8265_v1 }
0x161a   :  { %6940 = vmatpush3.msra.mxu0 %v2733_v19  ;;  %v2745_v19 = vld [vmem:[%s9542_s20 + $0x8] sm:$0xff] }
0x161b   :  { %6941 = vmatprep.subr.mxu0 %v8265_v1 }
0x161c   :  { %6942 = vmatpush3.msra.mxu0 %v2732_v20 }
0x161d   :  { %6946 = vmatprep.subr.mxu0 %v8265_v1 }
0x16d5   :  { %v2620_v2 = vpop.f32.mrf.mxu0 }
0x16d6   :  { %v2621_v3 = vadd.f32 %v6399_v0, %v2620_v2  ;;  %v887_v2 = vld [vmem:[%s9541_s16] sm:$0xff] }
0x16d7   :  { %v6915_v4 = vpop.f32.mrf.mxu0 }
0x16d8   :  { %v2624_v5 = vmax.f32 %v2621_v3, 0.0 }
0x16da   :  { %6933 = vmatmul.mubr.msk.f32.vlgmr.msra.gmra.mxu1 %vm1715_vm11, %v2624_v5 }
0x16db   :  { %6953 = vmatprep.mubr.msk.f32.mxu1 %vm8266_vm1, %v8265_v1 }
0x179a   :  { %v2700_v7 = vpop.f32.mrf.mxu1 }
0x179b   :  { %v2701_v8 = vadd.f32 %v6401_v6, %v2700_v7 }
0x179c   :  { %v6934_v9 = vpop.f32.mrf.mxu1 }
0x179d   :  { %v2704_v10 = vadd.f32 %v2701_v8, %v2701_v8 }
0x179f   :  { %v2705_v11 = vsel %vm928_vm4, %v2704_v10, 0.0 }
0x17a0   :  { %2706 = vadd.xlane.f32.xlu0 %v2705_v11 }
0x1829   :  { %v2707_v12 = vpop.xlane.xlu0 %2706 }
0x182a   :  { %v2708_v13 = vmul.f32 0.03125, %v2707_v12 }
0x182c   :  { %v2709_v14 = vsub.f32 %v2704_v10, %v2708_v13 }
0x182e   :  { %v2710_v15 = vmul.f32 %v2709_v14, %v2709_v14 }
0x1830   :  { %v2711_v16 = vsel %vm928_vm4, %v2710_v15, 0.0 }
0x1831   :  { %2712 = vadd.xlane.f32.xlu1 %v2711_v16 }
0x18ba   :  { %v2713_v21 = vpop.xlane.xlu1 %2712 }
0x18bb   :  { %v2714_v22 = vmul.f32 0.03125, %v2713_v21  ;;  %v7439_v21 = vld [vmem:[%s9517_s18] sm:$0xff]  ;;  %s9544_s18 = sld [smem:[#allocation108_spill]] }
0x18bd   :  { %v2715_v23 = vadd.f32 1e-05, %v2714_v22  ;;  %v884_v22 = vadd.f32 %v7439_v21, %v8762_v41  ;;  %v2739_v41 = vld [vmem:[%s9543_s22 + $0x10] sm:$0xff] }
0x18bf   :  { %7393 = vrsqrt.f32 %v2715_v23  ;;  %v2744_v23 = vld [vmem:[%s9542_s20] sm:$0xff] }
0x18cc   :  { %v7394_v24 = vpop.eup %7393 }
0x18cd   :  { %v2717_v27 = vmul.f32 %v7394_v24, %v2709_v14 }
0x18cf   :  { %v2724_v29 = vmul.f32 %v6403_v26, %v2717_v27  ;;  %v2740_v26 = vld [vmem:[%s9543_s22 + $0x18] sm:$0xff]  ;;  %v2738_v27 = vld [vmem:[%s9543_s22 + $0x8] sm:$0xff] }
0x18d1   :  { %v9006_v30 = vadd.f32 %v6404_v28, %v2724_v29 }
0x18d3   :  { %6944 = vmatmul.mubr.msk.f32.vlgmr.msra.gmra.mxu0 %vm928_vm4, %v9006_v30 }
0x18d4   :  { %6948 = vmatprep.mubr.msk.f32.mxu0 %vm8266_vm1, %v8265_v1 }
0x1993   :  { %v2852_v32 = vpop.f32.mrf.mxu0 }
0x1994   :  { %v2853_v33 = vadd.f32 %v6405_v31, %v2852_v32  ;;  %v2737_v31 = vld [vmem:[%s9543_s22] sm:$0xff] }
0x1995   :  { %v6945_v35 = vpop.f32.mrf.mxu0 }
0x1996   :  { %v2857_v36 = vrot.slane %v2853_v33, 4  ;;  %v6423_v35 = vld [vmem:[#allocation13] ss:$0 sm:$0xff] }
0x1998   :  { %2858 = vrot.lane.b32.xlu0 %v2857_v36, %s8267_s14 }
0x1a0a   :  { %v2859_v37 = vpop.permute.xlu0 %2858 }
0x1a0b   :  { %v2861_v38 = vsel %vm813_vm5, %v2853_v33, %v2859_v37 }
0x1a0c   :  { %2954 = vrot.lane.b32.xlu1 %v2861_v38, %s8268_s9  ;;  %6947 = vmatpush3.xpose.msk.msra.mxu0 %vm1027_vm9, %v2861_v38 }
0x1a0d   :  { %6956 = vmatprep.subr.mxu0 %v8265_v1 }
0x1a0f   :  { %6949 = vmatmul.mubr.msk.f32.vlgmr.msra.gmra.mxu0 %vm1027_vm9, %v8768_v46 }
0x1a10   :  { %2863 = vrot.lane.b32.xlu1 %v2853_v33, %s8267_s14  ;;  %6960 = vmatprep.mubr.msk.f32.mxu0 %vm8266_vm1, %v8265_v1 }
0x1a7e   :  { %v2955_v39 = vpop.permute.xlu1 %2954 }
0x1a7f   :  { %6952 = vmatpush3.msra.mxu1 %v2955_v39 }
0x1a80   :  { %6963 = vmatprep.subr.mxu1 %v8265_v1 }
0x1a82   :  { %v2864_v40 = vpop.permute.xlu1 %2863 }
0x1a83   :  { %v2866_v42 = vsel %vm813_vm5, %v2857_v36, %v2864_v40 }
0x1a84   :  { %3196 = vrot.lane.b32.xlu0 %v2866_v42, %s8268_s9 }
0x1acf   :  { %v2950_v43 = vpop.f32.mrf.mxu0 }
0x1ad0   :  { %6954 = vmatmul.mubr.msk.f32.vlgmr.msra.gmra.mxu1 %vm1027_vm9, %v2950_v43 }
0x1ad1   :  { %6964 = vmatpush3.xpose.msk.msra.mxu1 %vm1027_vm9, %v2866_v42  ;;  %v6950_v44 = vpop.f32.mrf.mxu0  ;;  %6965 = vmatprep.mubr.msk.f32.mxu1 %vm8266_vm1, %v8265_v1 }
0x1ad2   :  { %6968 = vmatprep.subr.mxu1 %v8265_v1 }
0x1ad4   :  { %6966 = vmatmul.mubr.msk.f32.vlgmr.msra.gmra.mxu1 %vm1027_vm9, %v8768_v46 }
0x1ad5   :  { %6970 = vmatprep.mubr.msk.f32.mxu1 %vm8266_vm1, %v8265_v1 }
0x1af6   :  { %v3197_v45 = vpop.permute.xlu0 %3196 }
0x1af7   :  { %6969 = vmatpush3.msra.mxu1 %v3197_v45  ;;  %v6419_v45 = vld [vmem:[#allocation8] ss:$0 sm:$0xff] }
0x1af8   :  { %6980 = vmatprep.subr.mxu1 %v8265_v1 }
0x1b90   :  { %v3026_v34 = vpop.f32.mrf.mxu1 }
0x1b91   :  { %v3030_v47 = vsel %vm1027_vm9, %v3026_v34, -inf }
0x1b92   :  { %3031 = vmax.xlane.f32.xlu1 %v3030_v47  ;;  %v6955_v48 = vpop.f32.mrf.mxu1 }
0x1b94   :  { %v3192_v49 = vpop.f32.mrf.mxu1 }
0x1b95   :  { %6971 = vmatmul.mubr.msk.f32.vlgmr.msra.gmra.mxu1 %vm1027_vm9, %v3192_v49 }
0x1b96   :  { %v6967_v25 = vpop.f32.mrf.mxu1  ;;  %6988 = vmatprep.mubr.msk.f32.mxu1 %vm8266_vm1, %v8265_v1  ;;  %6981 = vmatpush3.msra.mxu1 %v2740_v26 }
0x1b97   :  { %6982 = vmatprep.subr.mxu1 %v8265_v1 }
0x1b98   :  { %6983 = vmatpush3.msra.mxu1 %v2739_v41 }
0x1b99   :  { %6984 = vmatprep.subr.mxu1 %v8265_v1 }
0x1b9a   :  { %6985 = vmatpush3.msra.mxu1 %v2738_v27 }
0x1b9b   :  { %6986 = vmatprep.subr.mxu1 %v8265_v1 }
0x1b9c   :  { %6987 = vmatpush3.msra.mxu1 %v2737_v31 }
0x1b9d   :  { %7002 = vmatprep.subr.mxu1 %v8265_v1 }
0x1ba3   :  { %2870 = vrot.lane.b32.xlu1 %v2857_v36, %s8269_s23 }
0x1ba7   :  { %2874 = vrot.lane.b32.xlu1 %v2857_v36, %s8268_s9 }
0x1c1b   :  { %v3032_v50 = vpop.xlane.xlu1 %3031 }
0x1c1c   :  { %v3033_v51 = vsub.f32 %v3026_v34, %v3032_v50 }
0x1c1e   :  { %v3034_v52 = vmul.f32 1.442695, %v3033_v51 }
0x1c1f   :  { %v2871_v59 = vpop.permute.xlu1 %2870 }
0x1c20   :  { %7395 = vpow2.f32 %v3034_v52 }
0x1c23   :  { %v2875_v62 = vpop.permute.xlu1 %2874 }
0x1c2d   :  { %v7396_v53 = vpop.eup %7395 }
0x1c2e   :  { %v3036_v54 = vsel %vm1027_vm9, %v7396_v53, 0.0 }
0x1c2f   :  { %3037 = vadd.xlane.f32.xlu1 %v3036_v54 }
0x1c40   :  { %3042 = vrot.lane.b32.xlu1 %v2861_v38, %s8270_s25 }
0x1c55   :  { %v3268_v55 = vpop.f32.mrf.mxu1 }
0x1c56   :  { %v3272_v56 = vsel %vm1027_vm9, %v3268_v55, -inf }
0x1c57   :  { %3273 = vmax.xlane.f32.xlu0 %v3272_v56  ;;  %v6972_v57 = vpop.f32.mrf.mxu1  ;;  %v2750_v56 = vld [vmem:[%s9544_s18 + $0x8] sm:$0xff] }
0x1c58   :  { %v2749_v57 = vld [vmem:[%s9544_s18] sm:$0xff] }
0x1c6d   :  { %2867 = vrot.lane.b32.xlu0 %v2853_v33, %s8268_s9 }
0x1c71   :  { %2877 = vrot.lane.b32.xlu0 %v2853_v33, %s8269_s23 }
0x1cb8   :  { %v3038_v7 = vpop.xlane.xlu1 %3037 }
0x1cbc   :  { %v3043_v10 = vpop.permute.xlu1 %3042 }
0x1ce0   :  { %v3274_v58 = vpop.xlane.xlu0 %3273 }
0x1ce1   :  { %v3275_v3 = vsub.f32 %v3268_v55, %v3274_v58  ;;  %v2752_v55 = vld [vmem:[%s9544_s18 + $0x18] sm:$0xff] }
0x1ce3   :  { %v3276_v4 = vmul.f32 1.442695, %v3275_v3  ;;  %v6421_v3 = vld [vmem:[#allocation10] ss:$0 sm:$0xff] }
0x1ce4   :  { %v2868_v60 = vpop.permute.xlu0 %2867 }
0x1ce5   :  { %v2873_v61 = vsel %vm813_vm5, %v2868_v60, %v2871_v59  ;;  %7397 = vpow2.f32 %v3276_v4 }
0x1ce6   :  { %3044 = vrot.lane.b32.xlu0 %v2873_v61, %s8270_s25  ;;  %7399 = vrcp.f32 %v3038_v7 }
0x1ce8   :  { %v2878_v63 = vpop.permute.xlu0 %2877 }
0x1ce9   :  { %v2880_v0 = vsel %vm813_vm5, %v2875_v62, %v2878_v63 }
0x1cea   :  { %3286 = vrot.lane.b32.xlu1 %v2880_v0, %s8270_s25 }
0x1cee   :  { %890 = vperm.xlu1 %7370, %v887_v2  }
0x1cf2   :  { %v7398_v5 = vpop.eup %7397 }
0x1cf3   :  { %v3278_v6 = vsel %vm1027_vm9, %v7398_v5, 0.0  ;;  %v7400_v9 = vpop.eup %7399 }
0x1cf4   :  { %v3040_v11 = vmul.f32 %v7400_v9, %v7396_v53 }
0x1d05   :  { %3279 = vadd.xlane.f32.xlu0 %v3278_v6 }
0x1d1b   :  { %3284 = vrot.lane.b32.xlu0 %v2866_v42, %s8270_s25 }
0x1d58   :  { %v3045_v8 = vpop.permute.xlu0 %3044 }
0x1d59   :  { %6957 = vmatpush3.xpose.msk.msra.mxu0 %vm1027_vm9, %v3045_v8 }
0x1d5a   :  { %6958 = vmatprep.subr.mxu0 %v8265_v1 }
0x1d5c   :  { %v3287_v12 = vpop.permute.xlu1 %3286 }
0x1d5d   :  { %6959 = vmatpush3.xpose.msk.msra.mxu0 %vm1027_vm9, %v3043_v10 }
0x1d5e   :  { %6973 = vmatprep.subr.mxu0 %v8265_v1 }
0x1d60   :  { %6961 = vmatmul.mubr.msk.f32.vlgmr.msra.gmra.mxu0 %vm1027_vm9, %v3040_v11 }
0x1d61   :  { %6974 = vmatpush3.xpose.msk.msra.mxu0 %vm1027_vm9, %v3287_v12  ;;  %6977 = vmatprep.mubr.msk.f32.mxu0 %vm8266_vm1, %v8265_v1 }
0x1d62   :  { %6975 = vmatprep.subr.mxu0 %v8265_v1 }
0x1d69   :  { %v891_v20 = vpop.permute.xlu1 %890 }
0x1d6a   :  { %v9075_v24 = vmul.f32 %v891_v20, %v884_v22 }
0x1d8e   :  { %v3280_v13 = vpop.xlane.xlu0 %3279 }
0x1d8f   :  { %7401 = vrcp.f32 %v3280_v13 }
0x1d92   :  { %v3285_v14 = vpop.permute.xlu0 %3284 }
0x1d93   :  { %6976 = vmatpush3.xpose.msk.msra.mxu0 %vm1027_vm9, %v3285_v14 }
0x1d94   :  { %6991 = vmatprep.subr.mxu0 %v8265_v1 }
0x1d9c   :  { %v7402_v15 = vpop.eup %7401 }
0x1d9d   :  { %v3282_v16 = vmul.f32 %v7402_v15, %v7398_v5  ;;  %v6422_v5 = vld [vmem:[#allocation11] ss:$0 sm:$0xff] }
0x1d9f   :  { %6978 = vmatmul.mubr.msk.f32.vlgmr.msra.gmra.mxu0 %vm1027_vm9, %v3282_v16 }
0x1da0   :  { %6992 = vmatpush3.msra.mxu0 %v2747_v17  ;;  %6999 = vmatprep.mubr.msk.f32.mxu0 %vm8266_vm1, %v8265_v1  ;;  %v6425_v17 = vld [vmem:[#allocation14] ss:$0 sm:$0xff] }
0x1da1   :  { %6993 = vmatprep.subr.mxu0 %v8265_v1 }
0x1da2   :  { %6994 = vmatpush3.msra.mxu0 %v2746_v18 }
0x1da3   :  { %6995 = vmatprep.subr.mxu0 %v8265_v1 }
0x1da4   :  { %6996 = vmatpush3.msra.mxu0 %v2745_v19 }
0x1da5   :  { %6997 = vmatprep.subr.mxu0 %v8265_v1 }
0x1da6   :  { %6998 = vmatpush3.msra.mxu0 %v2744_v23 }
0x1da7   :  { %7000 = vmatmul.mubr.msk.f32.vlgmr.msra.gmra.mxu0 %vm928_vm4, %v9075_v24  ;;  %7013 = vmatprep.subr.mxu0 %v8265_v1 }
0x1da8   :  { %7015 = vmatprep.mubr.msk.f32.mxu0 %vm8266_vm1, %v8265_v1 }
0x1e20   :  { %v3119_v28 = vpop.f32.mrf.mxu0 }
0x1e22   :  { %v6962_v29 = vpop.f32.mrf.mxu0 }
0x1e5f   :  { %v3361_v32 = vpop.f32.mrf.mxu0 }
0x1e60   :  { %3366 = vrot.lane.b32.xlu0 %v3361_v32, %s8271_s28 }
0x1e61   :  { %v6979_v33 = vpop.f32.mrf.mxu0 }
0x1e67   :  { %v3552_v36 = vpop.f32.mrf.mxu0 }
0x1e68   :  { %v3553_v37 = vadd.f32 %v6423_v35, %v3552_v36 }
0x1e69   :  { %v7001_v38 = vpop.f32.mrf.mxu0 }
0x1e6a   :  { %v3636_v39 = vrot.slane %v3553_v37, 4 }
0x1e6c   :  { %3637 = vrot.lane.b32.xlu1 %v3636_v39, %s8267_s14 }
0x1ed2   :  { %v3367_v40 = vpop.permute.xlu0 %3366 }
0x1ed3   :  { %v3369_v42 = vsel %vm1519_vm10, %v3119_v28, %v3367_v40 }
0x1ed4   :  { %6989 = vmatmul.mubr.msk.f32.vlgmr.msra.gmra.mxu1 %vm928_vm4, %v3369_v42 }
0x1ed5   :  { %7010 = vmatprep.mubr.msk.f32.mxu1 %vm8266_vm1, %v8265_v1  ;;  %7003 = vmatpush3.msra.mxu1 %v2752_v55  ;;  %v2756_v55 = vld [vmem:[%s9545_s26 + $0x10] sm:$0xff] }
0x1ed6   :  { %7004 = vmatprep.subr.mxu1 %v8265_v1 }
0x1ede   :  { %v3638_v43 = vpop.permute.xlu1 %3637 }
0x1edf   :  { %v3640_v44 = vsel %vm813_vm5, %v3553_v37, %v3638_v43 }
0x1ee0   :  { %7014 = vmatpush3.xpose.msk.msra.mxu0 %vm1027_vm9, %v3640_v44 }
0x1ee1   :  { %7023 = vmatprep.subr.mxu0 %v8265_v1 }
0x1ee3   :  { %7016 = vmatmul.mubr.msk.f32.vlgmr.msra.gmra.mxu0 %vm1027_vm9, %v8768_v46 }
0x1ee4   :  { %7027 = vmatprep.mubr.msk.f32.mxu0 %vm8266_vm1, %v8265_v1 }
0x1f94   :  { %v3445_v34 = vpop.f32.mrf.mxu1 }
0x1f95   :  { %v3446_v47 = vadd.f32 %v6419_v45, %v3445_v34 }
0x1f96   :  { %v6990_v48 = vpop.f32.mrf.mxu1 }
0x1f97   :  { %v3449_v49 = vadd.f32 %v3446_v47, %v9006_v30  ;;  %v2751_v30 = vld [vmem:[%s9544_s18 + $0x10] sm:$0xff] }
0x1f98   :  { %7005 = vmatpush3.msra.mxu1 %v2751_v30  ;;  %v2755_v30 = vld [vmem:[%s9545_s26 + $0x8] sm:$0xff] }
0x1f99   :  { %v3450_v25 = vsel %vm928_vm4, %v3449_v49, 0.0  ;;  %7006 = vmatprep.subr.mxu1 %v8265_v1 }
0x1f9a   :  { %3451 = vadd.xlane.f32.xlu0 %v3450_v25  ;;  %7007 = vmatpush3.msra.mxu1 %v2750_v56  ;;  %v2754_v56 = vld [vmem:[%s9545_s26] sm:$0xff] }
0x1f9b   :  { %7008 = vmatprep.subr.mxu1 %v8265_v1 }
0x1f9c   :  { %7009 = vmatpush3.msra.mxu1 %v2749_v57 }
0x1f9d   :  { %7018 = vmatprep.subr.mxu1 %v8265_v1 }
0x1fa3   :  { %v3740_v58 = vpop.f32.mrf.mxu0 }
0x1fa5   :  { %v7017_v59 = vpop.f32.mrf.mxu0 }
0x1fb0   :  { %3744 = vrot.lane.b32.xlu0 %v3640_v44, %s8268_s9 }
0x2023   :  { %v3452_v50 = vpop.xlane.xlu0 %3451 }
0x2024   :  { %v3453_v51 = vmul.f32 0.03125, %v3452_v50 }
0x2026   :  { %v3454_v52 = vsub.f32 %v3449_v49, %v3453_v51 }
0x2027   :  { %v3745_v8 = vpop.permute.xlu0 %3744 }
0x2028   :  { %v3455_v53 = vmul.f32 %v3454_v52, %v3454_v52 }
0x202a   :  { %v3456_v54 = vsel %vm928_vm4, %v3455_v53, 0.0 }
0x202b   :  { %3457 = vadd.xlane.f32.xlu1 %v3456_v54  ;;  %v2757_v54 = vld [vmem:[%s9545_s26 + $0x18] sm:$0xff] }
0x203c   :  { %3642 = vrot.lane.b32.xlu1 %v3553_v37, %s8267_s14 }
0x20b4   :  { %v3458_v60 = vpop.xlane.xlu1 %3457 }
0x20b5   :  { %v3459_v61 = vmul.f32 0.03125, %v3458_v60 }
0x20b7   :  { %v3460_v62 = vadd.f32 1e-05, %v3459_v61  ;;  %v6439_v61 = vld [vmem:[#allocation16] ss:$0 sm:$0xff] }
0x20b8   :  { %v3643_v63 = vpop.permute.xlu1 %3642 }
0x20b9   :  { %7403 = vrsqrt.f32 %v3460_v62  ;;  %v3645_v0 = vsel %vm813_vm5, %v3636_v39, %v3643_v63 }
0x20ba   :  { %3983 = vrot.lane.b32.xlu0 %v3645_v0, %s8268_s9 }
0x20c6   :  { %v7404_v2 = vpop.eup %7403 }
0x20c7   :  { %v3462_v4 = vmul.f32 %v7404_v2, %v3454_v52 }
0x20c9   :  { %v3469_v6 = vmul.f32 %v6421_v3, %v3462_v4 }
0x20cb   :  { %v9119_v7 = vadd.f32 %v6422_v5, %v3469_v6 }
0x20cd   :  { %7011 = vmatmul.mubr.msk.f32.vlgmr.msra.gmra.mxu1 %vm928_vm4, %v9119_v7 }
0x20ce   :  { %7019 = vmatpush3.msra.mxu1 %v3745_v8  ;;  %7020 = vmatprep.mubr.msk.f32.mxu1 %vm8266_vm1, %v8265_v1 }
0x20cf   :  { %7030 = vmatprep.subr.mxu1 %v8265_v1 }
0x20d1   :  { %7021 = vmatmul.mubr.msk.f32.vlgmr.msra.gmra.mxu1 %vm1027_vm9, %v3740_v58 }
0x20d2   :  { %7031 = vmatpush3.xpose.msk.msra.mxu1 %vm1027_vm9, %v3645_v0  ;;  %7032 = vmatprep.mubr.msk.f32.mxu1 %vm8266_vm1, %v8265_v1 }
0x20d3   :  { %7035 = vmatprep.subr.mxu1 %v8265_v1 }
0x20d5   :  { %7033 = vmatmul.mubr.msk.f32.vlgmr.msra.gmra.mxu1 %vm1027_vm9, %v8768_v46 }
0x20d6   :  { %7037 = vmatprep.mubr.msk.f32.mxu1 %vm8266_vm1, %v8265_v1 }
0x212c   :  { %v3984_v9 = vpop.permute.xlu0 %3983 }
0x212d   :  { %7036 = vmatpush3.msra.mxu1 %v3984_v9 }
0x212e   :  { %7047 = vmatprep.subr.mxu1 %v8265_v1 }
0x218d   :  { %v3631_v10 = vpop.f32.mrf.mxu1 }
0x218e   :  { %v3632_v18 = vadd.f32 %v6425_v17, %v3631_v10  ;;  %v2764_v10 = vld [vmem:[%s9546_s17 + $0x18] sm:$0xff] }
0x218f   :  { %v7012_v11 = vpop.f32.mrf.mxu1  ;;  %v2769_v17 = vld [vmem:[%s9547_s1 + $0x18] sm:$0xff] }
0x2190   :  { %v3647_v19 = vrot.slane %v3632_v18, 4  ;;  %v2763_v11 = vld [vmem:[%s9546_s17 + $0x10] sm:$0xff] }
0x2191   :  { %v3816_v12 = vpop.f32.mrf.mxu1 }
0x2192   :  { %v3820_v13 = vsel %vm1027_vm9, %v3816_v12, -inf }
0x2193   :  { %3821 = vmax.xlane.f32.xlu1 %v3820_v13  ;;  %v7022_v14 = vpop.f32.mrf.mxu1  ;;  %v2773_v13 = vld [vmem:[%s9547_s1 + $0x38] sm:$0xff] }
0x2194   :  { %v2772_v14 = vld [vmem:[%s9547_s1 + $0x30] sm:$0xff] }
0x2195   :  { %v3979_v15 = vpop.f32.mrf.mxu1 }
0x2196   :  { %7038 = vmatmul.mubr.msk.f32.vlgmr.msra.gmra.mxu1 %vm1027_vm9, %v3979_v15  ;;  %v2771_v15 = vld [vmem:[%s9547_s1 + $0x28] sm:$0xff] }
0x2197   :  { %v7034_v16 = vpop.f32.mrf.mxu1  ;;  %7055 = vmatprep.mubr.msk.f32.mxu1 %vm8266_vm1, %v8265_v1  ;;  %7048 = vmatpush3.msra.mxu1 %v2757_v54 }
0x2198   :  { %7049 = vmatprep.subr.mxu1 %v8265_v1  ;;  %v2770_v16 = vld [vmem:[%s9547_s1 + $0x20] sm:$0xff] }
0x2199   :  { %7050 = vmatpush3.msra.mxu1 %v2756_v55 }
0x219a   :  { %7051 = vmatprep.subr.mxu1 %v8265_v1 }
0x219b   :  { %7052 = vmatpush3.msra.mxu1 %v2755_v30 }
0x219c   :  { %7053 = vmatprep.subr.mxu1 %v8265_v1 }
0x219d   :  { %7054 = vmatpush3.msra.mxu1 %v2754_v56  ;;  %v6447_v56 = vld [vmem:[#allocation23] ss:$0 sm:$0xff] }
0x219e   :  { %7069 = vmatprep.subr.mxu1 %v8265_v1 }
0x21a4   :  { %3654 = vrot.lane.b32.xlu1 %v3647_v19, %s8269_s23 }
0x21a8   :  { %3648 = vrot.lane.b32.xlu1 %v3647_v19, %s8267_s14 }
0x221c   :  { %v3822_v20 = vpop.xlane.xlu1 %3821 }
0x221d   :  { %v3823_v21 = vsub.f32 %v3816_v12, %v3822_v20  ;;  %v2761_v12 = vld [vmem:[%s9546_s17] sm:$0xff] }
0x221f   :  { %v3824_v22 = vmul.f32 1.442695, %v3823_v21 }
0x2220   :  { %v3655_v33 = vpop.permute.xlu1 %3654 }
0x2221   :  { %7405 = vpow2.f32 %v3824_v22  ;;  %v6441_v22 = vld [vmem:[#allocation17] ss:$0 sm:$0xff] }
0x2224   :  { %v3649_v38 = vpop.permute.xlu1 %3648 }
0x2225   :  { %v3657_v39 = vsel %vm813_vm5, %v3632_v18, %v3649_v38  ;;  %v6445_v38 = vld [vmem:[#allocation22] ss:$0 sm:$0xff] }
0x222e   :  { %v7406_v41 = vpop.eup %7405 }
0x222f   :  { %v3826_v28 = vsel %vm1027_vm9, %v7406_v41, 0.0 }
0x2256   :  { %v4055_v23 = vpop.f32.mrf.mxu1 }
0x2257   :  { %v4059_v26 = vsel %vm1027_vm9, %v4055_v23, -inf }
0x2258   :  { %4060 = vmax.xlane.f32.xlu0 %v4059_v26  ;;  %v7039_v27 = vpop.f32.mrf.mxu1  ;;  %v6442_v26 = vld [vmem:[#allocation19] ss:$0 sm:$0xff] }
0x225c   :  { %3827 = vadd.xlane.f32.xlu0 %v3826_v28  ;;  %v2768_v28 = vld [vmem:[%s9547_s1 + $0x10] sm:$0xff] }
0x2272   :  { %3651 = vrot.lane.b32.xlu0 %v3632_v18, %s8268_s9 }
0x2276   :  { %3663 = vrot.lane.b32.xlu0 %v3647_v19, %s8268_s9 }
0x227a   :  { %3660 = vrot.lane.b32.xlu0 %v3632_v18, %s8267_s14 }
0x22e1   :  { %v4061_v29 = vpop.xlane.xlu0 %4060 }
0x22e2   :  { %v4062_v31 = vsub.f32 %v4055_v23, %v4061_v29  ;;  %v2767_v29 = vld [vmem:[%s9547_s1 + $0x8] sm:$0xff] }
0x22e4   :  { %v4063_v32 = vmul.f32 1.442695, %v4062_v31  ;;  %v2766_v31 = vld [vmem:[%s9547_s1] sm:$0xff] }
0x22e5   :  { %v3828_v35 = vpop.xlane.xlu0 %3827 }
0x22e6   :  { %7407 = vpow2.f32 %v4063_v32  ;;  %v6443_v32 = vld [vmem:[#allocation20] ss:$0 sm:$0xff] }
0x22e7   :  { %7409 = vrcp.f32 %v3828_v35 }
0x22e9   :  { %v3652_v36 = vpop.permute.xlu0 %3651 }
0x22ea   :  { %v3658_v37 = vsel %vm813_vm5, %v3652_v36, %v3655_v33 }
0x22eb   :  { %7024 = vmatpush3.xpose.msk.msra.mxu0 %vm1027_vm9, %v3658_v37 }
0x22ec   :  { %7025 = vmatprep.subr.mxu0 %v8265_v1 }
0x22ed   :  { %v3664_v45 = vpop.permute.xlu0 %3663 }
0x22ef   :  { %7026 = vmatpush3.xpose.msk.msra.mxu0 %vm1027_vm9, %v3657_v39 }
0x22f0   :  { %7040 = vmatprep.subr.mxu0 %v8265_v1 }
0x22f1   :  { %v3661_v49 = vpop.permute.xlu0 %3660 }
0x22f2   :  { %v3669_v25 = vsel %vm813_vm5, %v3647_v19, %v3661_v49 }
0x22f3   :  { %v7408_v40 = vpop.eup %7407 }
0x22f4   :  { %v7410_v42 = vpop.eup %7409  ;;  %v4065_v43 = vsel %vm1027_vm9, %v7408_v40, 0.0 }
0x22f5   :  { %4066 = vadd.xlane.f32.xlu1 %v4065_v43  ;;  %v3830_v44 = vmul.f32 %v7410_v42, %v7406_v41 }
0x22f7   :  { %7028 = vmatmul.mubr.msk.f32.vlgmr.msra.gmra.mxu0 %vm1027_vm9, %v3830_v44 }
0x22f8   :  { %7044 = vmatprep.mubr.msk.f32.mxu0 %vm8266_vm1, %v8265_v1 }
0x2306   :  { %3666 = vrot.lane.b32.xlu1 %v3632_v18, %s8269_s23 }
0x237e   :  { %v4067_v34 = vpop.xlane.xlu1 %4066 }
0x237f   :  { %7411 = vrcp.f32 %v4067_v34 }
0x2382   :  { %v3667_v47 = vpop.permute.xlu1 %3666 }
0x2383   :  { %v3670_v48 = vsel %vm813_vm5, %v3664_v45, %v3667_v47 }
0x2384   :  { %7041 = vmatpush3.xpose.msk.msra.mxu0 %vm1027_vm9, %v3670_v48 }
0x2385   :  { %7042 = vmatprep.subr.mxu0 %v8265_v1 }
0x2388   :  { %7043 = vmatpush3.xpose.msk.msra.mxu0 %vm1027_vm9, %v3669_v25  ;;  %v4451_v25 = vld [vmem:[%s9548_s2 + $0x18] sm:$0xff] }
0x2389   :  { %7058 = vmatprep.subr.mxu0 %v8265_v1 }
0x238c   :  { %v7412_v50 = vpop.eup %7411 }
0x238d   :  { %v4069_v51 = vmul.f32 %v7412_v50, %v7408_v40  ;;  %v4450_v50 = vld [vmem:[%s9548_s2 + $0x10] sm:$0xff] }
0x238f   :  { %7045 = vmatmul.mubr.msk.f32.vlgmr.msra.gmra.mxu0 %vm1027_vm9, %v4069_v51  ;;  %v4449_v51 = vld [vmem:[%s9548_s2 + $0x8] sm:$0xff] }
0x2390   :  { %7066 = vmatprep.mubr.msk.f32.mxu0 %vm8266_vm1, %v8265_v1  ;;  %7059 = vmatpush3.msra.mxu0 %v2764_v10 }
0x2391   :  { %7060 = vmatprep.subr.mxu0 %v8265_v1 }
0x2392   :  { %7061 = vmatpush3.msra.mxu0 %v2763_v11 }
0x2393   :  { %7062 = vmatprep.subr.mxu0 %v8265_v1 }
0x23b7   :  { %v3906_v52 = vpop.f32.mrf.mxu0 }
0x23b9   :  { %v7029_v53 = vpop.f32.mrf.mxu0 }
0x244f   :  { %v4145_v57 = vpop.f32.mrf.mxu0 }
0x2450   :  { %4150 = vrot.lane.b32.xlu1 %v4145_v57, %s8271_s28 }
0x2451   :  { %v7046_v58 = vpop.f32.mrf.mxu0 }
0x2452   :  { %v6448_v58 = vld [vmem:[#allocation25] ss:$0 sm:$0xff] }
0x24c2   :  { %v4151_v59 = vpop.permute.xlu1 %4150 }
0x24c3   :  { %v4153_v60 = vsel %vm1519_vm10, %v3906_v52, %v4151_v59  ;;  %v4448_v52 = vld [vmem:[%s9548_s2] sm:$0xff] }
0x24c4   :  { %7056 = vmatmul.mubr.msk.f32.vlgmr.msra.gmra.mxu1 %vm928_vm4, %v4153_v60 }
0x24c5   :  { %7085 = vmatprep.mubr.msk.f32.mxu1 %vm8266_vm1, %v8265_v1  ;;  %7070 = vmatpush3.msra.mxu1 %v2773_v13 }
0x24c6   :  { %7071 = vmatprep.subr.mxu1 %v8265_v1 }
0x24c7   :  { %7072 = vmatpush3.msra.mxu1 %v2772_v14 }
0x24c8   :  { %7073 = vmatprep.subr.mxu1 %v8265_v1 }
0x24c9   :  { %7074 = vmatpush3.msra.mxu1 %v2771_v15 }
0x24ca   :  { %7075 = vmatprep.subr.mxu1 %v8265_v1 }
0x24cb   :  { %7076 = vmatpush3.msra.mxu1 %v2770_v16 }
0x24cc   :  { %7077 = vmatprep.subr.mxu1 %v8265_v1 }
0x24cd   :  { %7078 = vmatpush3.msra.mxu1 %v2769_v17 }
0x24ce   :  { %7079 = vmatprep.subr.mxu1 %v8265_v1 }
0x24cf   :  { %7080 = vmatpush3.msra.mxu1 %v2768_v28 }
0x24d0   :  { %7081 = vmatprep.subr.mxu1 %v8265_v1 }
0x24d1   :  { %7082 = vmatpush3.msra.mxu1 %v2767_v29 }
0x24d2   :  { %7083 = vmatprep.subr.mxu1 %v8265_v1 }
0x24d3   :  { %7084 = vmatpush3.msra.mxu1 %v2766_v31 }
0x24d4   :  { %7104 = vmatprep.subr.mxu1 %v8265_v1 }
0x2584   :  { %v4229_v62 = vpop.f32.mrf.mxu1 }
0x2585   :  { %v4230_v63 = vadd.f32 %v6439_v61, %v4229_v62  ;;  %v6449_v61 = vld [vmem:[#allocation26] ss:$0 sm:$0xff] }
0x2586   :  { %v7057_v0 = vpop.f32.mrf.mxu1 }
0x2587   :  { %v4233_v2 = vadd.f32 %v4230_v63, %v9119_v7  ;;  %v2762_v7 = vld [vmem:[%s9546_s17 + $0x8] sm:$0xff] }
0x2588   :  { %7063 = vmatpush3.msra.mxu0 %v2762_v7 }
0x2589   :  { %v4234_v3 = vsel %vm928_vm4, %v4233_v2, 0.0  ;;  %7064 = vmatprep.subr.mxu0 %v8265_v1 }
0x258a   :  { %4235 = vadd.xlane.f32.xlu0 %v4234_v3  ;;  %7065 = vmatpush3.msra.mxu0 %v2761_v12 }
0x258b   :  { %7088 = vmatprep.subr.mxu0 %v8265_v1 }
0x2613   :  { %v4236_v4 = vpop.xlane.xlu0 %4235 }
0x2614   :  { %v4237_v5 = vmul.f32 0.03125, %v4236_v4 }
0x2616   :  { %v4238_v6 = vsub.f32 %v4233_v2, %v4237_v5 }
0x2618   :  { %v4239_v8 = vmul.f32 %v4238_v6, %v4238_v6 }
0x261a   :  { %v4240_v9 = vsel %vm928_vm4, %v4239_v8, 0.0 }
0x261b   :  { %4241 = vadd.xlane.f32.xlu1 %v4240_v9 }
0x26a4   :  { %v4242_v18 = vpop.xlane.xlu1 %4241 }
0x26a5   :  { %v4243_v19 = vmul.f32 0.03125, %v4242_v18 }
0x26a7   :  { %v4244_v20 = vadd.f32 1e-05, %v4243_v19 }
0x26a9   :  { %7413 = vrsqrt.f32 %v4244_v20 }
0x26b6   :  { %v7414_v21 = vpop.eup %7413 }
0x26b7   :  { %v4246_v23 = vmul.f32 %v7414_v21, %v4238_v6 }
0x26b9   :  { %v4253_v41 = vmul.f32 %v6441_v22, %v4246_v23 }
0x26bb   :  { %v4260_v27 = vadd.f32 %v6442_v26, %v4253_v41 }
0x26bd   :  { %7067 = vmatmul.mubr.msk.f32.vlgmr.msra.gmra.mxu0 %vm928_vm4, %v4260_v27 }
0x26be   :  { %7096 = vmatprep.mubr.msk.f32.mxu0 %vm8266_vm1, %v8265_v1  ;;  %7089 = vmatpush3.msra.mxu0 %v4451_v25  ;;  %v4462_v25 = vld [vmem:[%s9549_s19 + $0x10] sm:$0xff] }
0x26bf   :  { %7090 = vmatprep.subr.mxu0 %v8265_v1 }
0x26c0   :  { %7091 = vmatpush3.msra.mxu0 %v4450_v50  ;;  %v4461_v50 = vld [vmem:[%s9549_s19 + $0x8] sm:$0xff] }
0x26c1   :  { %7092 = vmatprep.subr.mxu0 %v8265_v1 }
0x26c2   :  { %7093 = vmatpush3.msra.mxu0 %v4449_v51  ;;  %v4460_v51 = vld [vmem:[%s9549_s19] sm:$0xff] }
0x26c3   :  { %7094 = vmatprep.subr.mxu0 %v8265_v1 }
0x26c4   :  { %7095 = vmatpush3.msra.mxu0 %v4448_v52 }
0x26c5   :  { %7099 = vmatprep.subr.mxu0 %v8265_v1 }
0x277d   :  { %v4336_v33 = vpop.f32.mrf.mxu0 }
0x277e   :  { %v4337_v35 = vadd.f32 %v6443_v32, %v4336_v33 }
0x277f   :  { %v7068_v36 = vpop.f32.mrf.mxu0 }
0x2780   :  { %v4340_v37 = vmax.f32 %v4337_v35, 0.0 }
0x2782   :  { %7086 = vmatmul.mubr.msk.f32.vlgmr.msra.gmra.mxu1 %vm1715_vm11, %v4340_v37 }
0x2783   :  { %7106 = vmatprep.mubr.msk.f32.mxu1 %vm8266_vm1, %v8265_v1 }
0x2842   :  { %v4416_v39 = vpop.f32.mrf.mxu1 }
0x2843   :  { %v4417_v40 = vadd.f32 %v6445_v38, %v4416_v39 }
0x2844   :  { %v7087_v42 = vpop.f32.mrf.mxu1 }
0x2845   :  { %v4420_v43 = vadd.f32 %v4417_v40, %v4260_v27 }
0x2847   :  { %v4421_v44 = vsel %vm928_vm4, %v4420_v43, 0.0 }
0x2848   :  { %4422 = vadd.xlane.f32.xlu0 %v4421_v44 }
0x28d1   :  { %v4423_v45 = vpop.xlane.xlu0 %4422 }
0x28d2   :  { %v4424_v34 = vmul.f32 0.03125, %v4423_v45 }
0x28d4   :  { %v4425_v47 = vsub.f32 %v4420_v43, %v4424_v34 }
0x28d6   :  { %v4426_v48 = vmul.f32 %v4425_v47, %v4425_v47 }
0x28d8   :  { %v4427_v49 = vsel %vm928_vm4, %v4426_v48, 0.0 }
0x28d9   :  { %4428 = vadd.xlane.f32.xlu0 %v4427_v49  ;;  %v4463_v49 = vld [vmem:[%s9549_s19 + $0x18] sm:$0xff] }
0x2962   :  { %v4429_v53 = vpop.xlane.xlu0 %4428 }
0x2963   :  { %v4430_v54 = vmul.f32 0.03125, %v4429_v53 }
0x2965   :  { %v4431_v55 = vadd.f32 1e-05, %v4430_v54 }
0x2967   :  { %7415 = vrsqrt.f32 %v4431_v55 }
0x2974   :  { %v7416_v30 = vpop.eup %7415 }
0x2975   :  { %v4433_v57 = vmul.f32 %v7416_v30, %v4425_v47 }
0x2977   :  { %v4440_v59 = vmul.f32 %v6447_v56, %v4433_v57 }
0x2979   :  { %v9223_v60 = vadd.f32 %v6448_v58, %v4440_v59  ;;  %v6467_v58 = vld [vmem:[#allocation32] ss:$0 sm:$0xff] }
0x297b   :  { %7097 = vmatmul.mubr.msk.f32.vlgmr.msra.gmra.mxu0 %vm928_vm4, %v9223_v60 }
0x297c   :  { %7101 = vmatprep.mubr.msk.f32.mxu0 %vm8266_vm1, %v8265_v1 }
0x2a3b   :  { %v4568_v62 = vpop.f32.mrf.mxu0 }
0x2a3c   :  { %v4569_v63 = vadd.f32 %v6449_v61, %v4568_v62 }
0x2a3d   :  { %v7098_v0 = vpop.f32.mrf.mxu0 }
0x2a3e   :  { %v4573_v2 = vrot.slane %v4569_v63, 4 }
0x2a40   :  { %4574 = vrot.lane.b32.xlu1 %v4573_v2, %s8267_s14 }
0x2a44   :  { %4579 = vrot.lane.b32.xlu1 %v4569_v63, %s8267_s14 }
0x2ab2   :  { %v4575_v3 = vpop.permute.xlu1 %4574 }
0x2ab3   :  { %v4577_v4 = vsel %vm813_vm5, %v4569_v63, %v4575_v3 }
0x2ab4   :  { %4670 = vrot.lane.b32.xlu0 %v4577_v4, %s8268_s9  ;;  %7100 = vmatpush3.xpose.msk.msra.mxu0 %vm1027_vm9, %v4577_v4 }
0x2ab5   :  { %7109 = vmatprep.subr.mxu0 %v8265_v1 }
0x2ab6   :  { %v4580_v5 = vpop.permute.xlu1 %4579 }
0x2ab7   :  { %7102 = vmatmul.mubr.msk.f32.vlgmr.msra.gmra.mxu0 %vm1027_vm9, %v8768_v46  ;;  %v4582_v6 = vsel %vm813_vm5, %v4573_v2, %v4580_v5  ;;  %v6463_v5 = vld [vmem:[#allocation28] ss:$0 sm:$0xff] }
0x2ab8   :  { %4912 = vrot.lane.b32.xlu1 %v4582_v6, %s8268_s9  ;;  %7113 = vmatprep.mubr.msk.f32.mxu0 %vm8266_vm1, %v8265_v1 }
0x2b26   :  { %v4671_v8 = vpop.permute.xlu0 %4670 }
0x2b27   :  { %7105 = vmatpush3.msra.mxu1 %v4671_v8 }
0x2b28   :  { %7116 = vmatprep.subr.mxu1 %v8265_v1 }
0x2b2a   :  { %v4913_v11 = vpop.permute.xlu1 %4912 }
0x2b77   :  { %v4666_v9 = vpop.f32.mrf.mxu0 }
0x2b78   :  { %7107 = vmatmul.mubr.msk.f32.vlgmr.msra.gmra.mxu1 %vm1027_vm9, %v4666_v9 }
0x2b79   :  { %7117 = vmatpush3.xpose.msk.msra.mxu1 %vm1027_vm9, %v4582_v6  ;;  %v7103_v10 = vpop.f32.mrf.mxu0  ;;  %7118 = vmatprep.mubr.msk.f32.mxu1 %vm8266_vm1, %v8265_v1 }
0x2b7a   :  { %7121 = vmatprep.subr.mxu1 %v8265_v1 }
0x2b7c   :  { %7119 = vmatmul.mubr.msk.f32.vlgmr.msra.gmra.mxu1 %vm1027_vm9, %v8768_v46 }
0x2b7d   :  { %7122 = vmatpush3.msra.mxu1 %v4913_v11  ;;  %7123 = vmatprep.mubr.msk.f32.mxu1 %vm8266_vm1, %v8265_v1 }
0x2b7e   :  { %7133 = vmatprep.subr.mxu1 %v8265_v1 }
0x2c38   :  { %v4742_v7 = vpop.f32.mrf.mxu1 }
0x2c39   :  { %v4746_v12 = vsel %vm1027_vm9, %v4742_v7, -inf }
0x2c3a   :  { %4747 = vmax.xlane.f32.xlu0 %v4746_v12  ;;  %v7108_v13 = vpop.f32.mrf.mxu1 }
0x2c3c   :  { %v4908_v14 = vpop.f32.mrf.mxu1 }
0x2c3d   :  { %7124 = vmatmul.mubr.msk.f32.vlgmr.msra.gmra.mxu1 %vm1027_vm9, %v4908_v14 }
0x2c3e   :  { %v7120_v15 = vpop.f32.mrf.mxu1  ;;  %7141 = vmatprep.mubr.msk.f32.mxu1 %vm8266_vm1, %v8265_v1 }
0x2c50   :  { %4583 = vrot.lane.b32.xlu0 %v4569_v63, %s8268_s9 }
0x2c54   :  { %4590 = vrot.lane.b32.xlu0 %v4573_v2, %s8268_s9 }
0x2cc3   :  { %v4748_v16 = vpop.xlane.xlu0 %4747 }
0x2cc4   :  { %v4749_v17 = vsub.f32 %v4742_v7, %v4748_v16  ;;  %v4468_v16 = vld [vmem:[#allocation34 + $0x18] sm:$0xff] }
0x2cc6   :  { %v4750_v18 = vmul.f32 1.442695, %v4749_v17  ;;  %v4467_v17 = vld [vmem:[#allocation34 + $0x10] sm:$0xff] }
0x2cc7   :  { %v4584_v27 = vpop.permute.xlu0 %4583 }
0x2cc8   :  { %7417 = vpow2.f32 %v4750_v18  ;;  %v4465_v18 = vld [vmem:[#allocation34] sm:$0xff] }
0x2ccb   :  { %v4591_v32 = vpop.permute.xlu0 %4590 }
0x2cd5   :  { %v7418_v19 = vpop.eup %7417 }
0x2cd6   :  { %v4752_v20 = vsel %vm1027_vm9, %v7418_v19, 0.0 }
0x2cd7   :  { %4753 = vadd.xlane.f32.xlu0 %v4752_v20 }
0x2cfd   :  { %v4984_v21 = vpop.f32.mrf.mxu1 }
0x2cfe   :  { %v4988_v22 = vsel %vm1027_vm9, %v4984_v21, -inf }
0x2cff   :  { %4989 = vmax.xlane.f32.xlu1 %v4988_v22  ;;  %v7125_v23 = vpop.f32.mrf.mxu1 }
0x2d10   :  { %4586 = vrot.lane.b32.xlu1 %v4573_v2, %s8269_s23 }
0x2d14   :  { %4593 = vrot.lane.b32.xlu1 %v4569_v63, %s8269_s23 }
0x2d18   :  { %4758 = vrot.lane.b32.xlu1 %v4577_v4, %s8270_s25 }
0x2d60   :  { %v4754_v38 = vpop.xlane.xlu0 %4753 }
0x2d88   :  { %v4990_v26 = vpop.xlane.xlu1 %4989 }
0x2d89   :  { %v4991_v41 = vsub.f32 %v4984_v21, %v4990_v26 }
0x2d8b   :  { %v4992_v28 = vmul.f32 1.442695, %v4991_v41 }
0x2d8c   :  { %v4587_v29 = vpop.permute.xlu1 %4586 }
0x2d8d   :  { %7419 = vpow2.f32 %v4992_v28  ;;  %v4589_v31 = vsel %vm813_vm5, %v4584_v27, %v4587_v29  ;;  %v6465_v28 = vld [vmem:[#allocation29] ss:$0 sm:$0xff] }
0x2d8e   :  { %4760 = vrot.lane.b32.xlu0 %v4589_v31, %s8270_s25  ;;  %7421 = vrcp.f32 %v4754_v38  ;;  %v6466_v31 = vld [vmem:[#allocation31] ss:$0 sm:$0xff] }
0x2d90   :  { %v4594_v33 = vpop.permute.xlu1 %4593 }
0x2d91   :  { %v4596_v35 = vsel %vm813_vm5, %v4591_v32, %v4594_v33 }
0x2d92   :  { %5002 = vrot.lane.b32.xlu0 %v4596_v35, %s8270_s25 }
0x2d94   :  { %v4759_v42 = vpop.permute.xlu1 %4758 }
0x2d9a   :  { %v7420_v36 = vpop.eup %7419 }
0x2d9b   :  { %v4994_v37 = vsel %vm1027_vm9, %v7420_v36, 0.0  ;;  %v7422_v40 = vpop.eup %7421 }
0x2d9c   :  { %4995 = vadd.xlane.f32.xlu1 %v4994_v37  ;;  %v4756_v43 = vmul.f32 %v7422_v40, %v7418_v19 }
0x2dad   :  { %5000 = vrot.lane.b32.xlu1 %v4582_v6, %s8270_s25  ;;  %s9550_s25 = sld [smem:[#allocation117_spill]] }
0x2db3   :  { %v4456_v52 = vld [vmem:[%s9550_s25 + $0x18] sm:$0xff]  ;;  %v4455_v53 = vld [vmem:[%s9550_s25 + $0x10] sm:$0xff]  ;;  %v4454_v54 = vld [vmem:[%s9550_s25 + $0x8] sm:$0xff] }
0x2db4   :  { %7134 = vmatpush3.msra.mxu1 %v4456_v52 }
0x2db5   :  { %7135 = vmatprep.subr.mxu1 %v8265_v1 }
0x2db6   :  { %7136 = vmatpush3.msra.mxu1 %v4455_v53 }
0x2db7   :  { %7137 = vmatprep.subr.mxu1 %v8265_v1 }
0x2db8   :  { %7138 = vmatpush3.msra.mxu1 %v4454_v54 }
0x2db9   :  { %7139 = vmatprep.subr.mxu1 %v8265_v1 }
0x2e00   :  { %v4761_v39 = vpop.permute.xlu0 %4760 }
0x2e01   :  { %7110 = vmatpush3.xpose.msk.msra.mxu0 %vm1027_vm9, %v4761_v39 }
0x2e02   :  { %7111 = vmatprep.subr.mxu0 %v8265_v1 }
0x2e04   :  { %v5003_v44 = vpop.permute.xlu0 %5002 }
0x2e05   :  { %7112 = vmatpush3.xpose.msk.msra.mxu0 %vm1027_vm9, %v4759_v42 }
0x2e06   :  { %7126 = vmatprep.subr.mxu0 %v8265_v1 }
0x2e08   :  { %7114 = vmatmul.mubr.msk.f32.vlgmr.msra.gmra.mxu0 %vm1027_vm9, %v4756_v43 }
0x2e09   :  { %7127 = vmatpush3.xpose.msk.msra.mxu0 %vm1027_vm9, %v5003_v44  ;;  %7130 = vmatprep.mubr.msk.f32.mxu0 %vm8266_vm1, %v8265_v1 }
0x2e0a   :  { %7128 = vmatprep.subr.mxu0 %v8265_v1 }
0x2e25   :  { %v4996_v45 = vpop.xlane.xlu1 %4995 }
0x2e26   :  { %7423 = vrcp.f32 %v4996_v45 }
0x2e29   :  { %v5001_v34 = vpop.permute.xlu1 %5000 }
0x2e2a   :  { %7129 = vmatpush3.xpose.msk.msra.mxu0 %vm1027_vm9, %v5001_v34 }
0x2e2b   :  { %7144 = vmatprep.subr.mxu0 %v8265_v1 }
0x2e33   :  { %v7424_v47 = vpop.eup %7423 }
0x2e34   :  { %v4998_v48 = vmul.f32 %v7424_v47, %v7420_v36 }
0x2e36   :  { %7131 = vmatmul.mubr.msk.f32.vlgmr.msra.gmra.mxu0 %vm1027_vm9, %v4998_v48 }
0x2e37   :  { %7145 = vmatpush3.msra.mxu0 %v4463_v49  ;;  %7152 = vmatprep.mubr.msk.f32.mxu0 %vm8266_vm1, %v8265_v1 }
0x2e38   :  { %7146 = vmatprep.subr.mxu0 %v8265_v1 }
0x2e39   :  { %7147 = vmatpush3.msra.mxu0 %v4462_v25 }
0x2e3a   :  { %7148 = vmatprep.subr.mxu0 %v8265_v1 }
0x2e3b   :  { %7149 = vmatpush3.msra.mxu0 %v4461_v50 }
0x2e3c   :  { %7150 = vmatprep.subr.mxu0 %v8265_v1 }
0x2e3d   :  { %7151 = vmatpush3.msra.mxu0 %v4460_v51 }
0x2e3e   :  { %7153 = vmatmul.mubr.msk.f32.vlgmr.msra.gmra.mxu0 %vm928_vm4, %v9075_v24  ;;  %7166 = vmatprep.subr.mxu0 %v8265_v1  ;;  %v4453_v24 = vld [vmem:[%s9550_s25] sm:$0xff] }
0x2e3f   :  { %7168 = vmatprep.mubr.msk.f32.mxu0 %vm8266_vm1, %v8265_v1  ;;  %7140 = vmatpush3.msra.mxu1 %v4453_v24 }
0x2e40   :  { %7155 = vmatprep.subr.mxu1 %v8265_v1 }
0x2ec8   :  { %v4835_v55 = vpop.f32.mrf.mxu0 }
0x2eca   :  { %v7115_v30 = vpop.f32.mrf.mxu0 }
0x2ef6   :  { %v5077_v56 = vpop.f32.mrf.mxu0 }
0x2ef7   :  { %5082 = vrot.lane.b32.xlu0 %v5077_v56, %s8271_s28 }
0x2ef8   :  { %v7132_v57 = vpop.f32.mrf.mxu0 }
0x2efe   :  { %v5265_v59 = vpop.f32.mrf.mxu0 }
0x2eff   :  { %v5266_v61 = vadd.f32 %v6467_v58, %v5265_v59 }
0x2f00   :  { %v7154_v62 = vpop.f32.mrf.mxu0 }
0x2f01   :  { %v5349_v63 = vrot.slane %v5266_v61, 4 }
0x2f03   :  { %5350 = vrot.lane.b32.xlu1 %v5349_v63, %s8267_s14 }
0x2f69   :  { %v5083_v0 = vpop.permute.xlu0 %5082 }
0x2f6a   :  { %v5085_v2 = vsel %vm1519_vm10, %v4835_v55, %v5083_v0 }
0x2f6b   :  { %7142 = vmatmul.mubr.msk.f32.vlgmr.msra.gmra.mxu1 %vm928_vm4, %v5085_v2 }
0x2f6c   :  { %7163 = vmatprep.mubr.msk.f32.mxu1 %vm8266_vm1, %v8265_v1  ;;  %7156 = vmatpush3.msra.mxu1 %v4468_v16  ;;  %v4470_v16 = vld [vmem:[#allocation37] sm:$0xff] }
0x2f6d   :  { %7157 = vmatprep.subr.mxu1 %v8265_v1 }
0x2f6e   :  { %7158 = vmatpush3.msra.mxu1 %v4467_v17 }
0x2f6f   :  { %7159 = vmatprep.subr.mxu1 %v8265_v1 }
0x2f75   :  { %v5351_v3 = vpop.permute.xlu1 %5350 }
0x2f76   :  { %v5353_v4 = vsel %vm813_vm5, %v5266_v61, %v5351_v3 }
0x2f77   :  { %7167 = vmatpush3.xpose.msk.msra.mxu0 %vm1027_vm9, %v5353_v4 }
0x2f78   :  { %7176 = vmatprep.subr.mxu0 %v8265_v1 }
0x2f7a   :  { %7169 = vmatmul.mubr.msk.f32.vlgmr.msra.gmra.mxu0 %vm1027_vm9, %v8768_v46 }
0x2f7b   :  { %7180 = vmatprep.mubr.msk.f32.mxu0 %vm8266_vm1, %v8265_v1 }
0x302b   :  { %v5161_v6 = vpop.f32.mrf.mxu1 }
0x302c   :  { %v5162_v8 = vadd.f32 %v6463_v5, %v5161_v6 }
0x302d   :  { %v7143_v9 = vpop.f32.mrf.mxu1 }
0x302e   :  { %v5165_v10 = vadd.f32 %v5162_v8, %v9223_v60  ;;  %v4466_v60 = vld [vmem:[#allocation34 + $0x8] sm:$0xff] }
0x302f   :  { %7160 = vmatpush3.msra.mxu1 %v4466_v60 }
0x3030   :  { %v5166_v11 = vsel %vm928_vm4, %v5165_v10, 0.0  ;;  %7161 = vmatprep.subr.mxu1 %v8265_v1 }
0x3031   :  { %5167 = vadd.xlane.f32.xlu0 %v5166_v11  ;;  %7162 = vmatpush3.msra.mxu1 %v4465_v18 }
0x3032   :  { %7171 = vmatprep.subr.mxu1 %v8265_v1 }
0x303a   :  { %v5453_v19 = vpop.f32.mrf.mxu0 }
0x303c   :  { %v7170_v20 = vpop.f32.mrf.mxu0 }
0x303d   :  { %v6483_v20 = vld [vmem:[#allocation38] ss:$0 sm:$0xff] }
0x3047   :  { %5457 = vrot.lane.b32.xlu0 %v5353_v4, %s8268_s9 }
0x30ba   :  { %v5168_v7 = vpop.xlane.xlu0 %5167 }
0x30bb   :  { %v5169_v12 = vmul.f32 0.03125, %v5168_v7 }
0x30bd   :  { %v5170_v13 = vsub.f32 %v5165_v10, %v5169_v12 }
0x30be   :  { %v5458_v35 = vpop.permute.xlu0 %5457 }
0x30bf   :  { %v5171_v14 = vmul.f32 %v5170_v13, %v5170_v13 }
0x30c1   :  { %v5172_v15 = vsel %vm928_vm4, %v5171_v14, 0.0  ;;  %v4472_v14 = vld [vmem:[#allocation37 + $0x10] sm:$0xff] }
0x30c2   :  { %5173 = vadd.xlane.f32.xlu1 %v5172_v15  ;;  %v4471_v15 = vld [vmem:[#allocation37 + $0x8] sm:$0xff] }
0x30d3   :  { %5355 = vrot.lane.b32.xlu1 %v5266_v61, %s8267_s14 }
0x314b   :  { %v5174_v21 = vpop.xlane.xlu1 %5173 }
0x314c   :  { %v5175_v22 = vmul.f32 0.03125, %v5174_v21 }
0x314e   :  { %v5176_v23 = vadd.f32 1e-05, %v5175_v22 }
0x314f   :  { %v5356_v26 = vpop.permute.xlu1 %5355 }
0x3150   :  { %7425 = vrsqrt.f32 %v5176_v23  ;;  %v5358_v41 = vsel %vm813_vm5, %v5349_v63, %v5356_v26 }
0x3151   :  { %5696 = vrot.lane.b32.xlu0 %v5358_v41, %s8268_s9 }
0x315d   :  { %v7426_v27 = vpop.eup %7425 }
0x315e   :  { %v5178_v29 = vmul.f32 %v7426_v27, %v5170_v13  ;;  %v4473_v13 = vld [vmem:[#allocation37 + $0x18] sm:$0xff] }
0x3160   :  { %v5185_v32 = vmul.f32 %v6465_v28, %v5178_v29 }
0x3162   :  { %v9327_v33 = vadd.f32 %v6466_v31, %v5185_v32 }
0x3164   :  { %7164 = vmatmul.mubr.msk.f32.vlgmr.msra.gmra.mxu1 %vm928_vm4, %v9327_v33 }
0x3165   :  { %7172 = vmatpush3.msra.mxu1 %v5458_v35  ;;  %7173 = vmatprep.mubr.msk.f32.mxu1 %vm8266_vm1, %v8265_v1  ;;  %v4480_v35 = vld [vmem:[#allocation43 + $0x18] sm:$0xff] }
0x3166   :  { %7183 = vmatprep.subr.mxu1 %v8265_v1 }
0x3168   :  { %7174 = vmatmul.mubr.msk.f32.vlgmr.msra.gmra.mxu1 %vm1027_vm9, %v5453_v19 }
0x3169   :  { %7184 = vmatpush3.xpose.msk.msra.mxu1 %vm1027_vm9, %v5358_v41  ;;  %7185 = vmatprep.mubr.msk.f32.mxu1 %vm8266_vm1, %v8265_v1 }
0x316a   :  { %7188 = vmatprep.subr.mxu1 %v8265_v1 }
0x316c   :  { %7186 = vmatmul.mubr.msk.f32.vlgmr.msra.gmra.mxu1 %vm1027_vm9, %v8768_v46  ;;  %v6469_v46 = vld [vmem:[#allocation35] ss:$0 sm:$0xff] }
0x316d   :  { %7190 = vmatprep.mubr.msk.f32.mxu1 %vm8266_vm1, %v8265_v1 }
0x31c3   :  { %v5697_v36 = vpop.permute.xlu0 %5696 }
0x31c4   :  { %7189 = vmatpush3.msra.mxu1 %v5697_v36  ;;  %v4479_v36 = vld [vmem:[#allocation43 + $0x10] sm:$0xff] }
0x31c5   :  { %7200 = vmatprep.subr.mxu1 %v8265_v1 }
0x3224   :  { %v5344_v37 = vpop.f32.mrf.mxu1 }
0x3225   :  { %v5345_v45 = vadd.f32 %v6469_v46, %v5344_v37  ;;  %v4477_v37 = vld [vmem:[#allocation43] sm:$0xff] }
0x3226   :  { %v7165_v38 = vpop.f32.mrf.mxu1 }
0x3227   :  { %v5360_v34 = vrot.slane %v5345_v45, 4 }
0x3228   :  { %v5529_v39 = vpop.f32.mrf.mxu1 }
0x3229   :  { %v5533_v40 = vsel %vm1027_vm9, %v5529_v39, -inf }
0x322a   :  { %5534 = vmax.xlane.f32.xlu1 %v5533_v40  ;;  %v7175_v42 = vpop.f32.mrf.mxu1 }
0x322c   :  { %v5692_v43 = vpop.f32.mrf.mxu1 }
0x322d   :  { %7191 = vmatmul.mubr.msk.f32.vlgmr.msra.gmra.mxu1 %vm1027_vm9, %v5692_v43 }
0x322e   :  { %v7187_v44 = vpop.f32.mrf.mxu1  ;;  %7208 = vmatprep.mubr.msk.f32.mxu1 %vm8266_vm1, %v8265_v1  ;;  %7201 = vmatpush3.msra.mxu1 %v4473_v13 }
0x322f   :  { %7202 = vmatprep.subr.mxu1 %v8265_v1 }
0x3230   :  { %7203 = vmatpush3.msra.mxu1 %v4472_v14  ;;  %v6491_v14 = vld [vmem:[#allocation47] ss:$0 sm:$0xff] }
0x3231   :  { %7204 = vmatprep.subr.mxu1 %v8265_v1 }
0x3232   :  { %7205 = vmatpush3.msra.mxu1 %v4471_v15 }
0x3233   :  { %7206 = vmatprep.subr.mxu1 %v8265_v1 }
0x3234   :  { %7207 = vmatpush3.msra.mxu1 %v4470_v16  ;;  %v6492_v16 = vld [vmem:[#allocation49] ss:$0 sm:$0xff] }
0x3235   :  { %7222 = vmatprep.subr.mxu1 %v8265_v1 }
0x323b   :  { %5367 = vrot.lane.b32.xlu1 %v5360_v34, %s8269_s23 }
0x323f   :  { %5361 = vrot.lane.b32.xlu1 %v5360_v34, %s8267_s14 }
0x32b3   :  { %v5535_v47 = vpop.xlane.xlu1 %5534 }
0x32b4   :  { %v5536_v48 = vsub.f32 %v5529_v39, %v5535_v47  ;;  %v6485_v47 = vld [vmem:[#allocation40] ss:$0 sm:$0xff] }
0x32b6   :  { %v5537_v49 = vmul.f32 1.442695, %v5536_v48 }
0x32b7   :  { %v5368_v24 = vpop.permute.xlu1 %5367 }
0x32b8   :  { %7427 = vpow2.f32 %v5537_v49  ;;  %v6486_v49 = vld [vmem:[#allocation41] ss:$0 sm:$0xff] }
0x32bb   :  { %v5362_v59 = vpop.permute.xlu1 %5361 }
0x32bc   :  { %v5370_v61 = vsel %vm813_vm5, %v5345_v45, %v5362_v59 }
0x32c5   :  { %v7428_v51 = vpop.eup %7427 }
0x32c6   :  { %v5539_v53 = vsel %vm1027_vm9, %v7428_v51, 0.0 }
0x32ed   :  { %v5768_v25 = vpop.f32.mrf.mxu1 }
0x32ee   :  { %v5772_v50 = vsel %vm1027_vm9, %v5768_v25, -inf }
0x32ef   :  { %5773 = vmax.xlane.f32.xlu0 %v5772_v50  ;;  %v7192_v52 = vpop.f32.mrf.mxu1 }
0x32f3   :  { %5540 = vadd.xlane.f32.xlu0 %v5539_v53 }
0x3309   :  { %5364 = vrot.lane.b32.xlu0 %v5345_v45, %s8268_s9 }
0x330d   :  { %5376 = vrot.lane.b32.xlu0 %v5360_v34, %s8268_s9  ;;  %s8272_s9 = smov [#allocation53]  }
0x3311   :  { %5373 = vrot.lane.b32.xlu0 %v5345_v45, %s8267_s14  ;;  %s9551_s14 = sld [smem:[#allocation125_spill]] }
0x3317   :  { %v4489_v38 = vld [vmem:[%s9551_s14 + $0x38] sm:$0xff]  ;;  %v4488_v39 = vld [vmem:[%s9551_s14 + $0x30] sm:$0xff]  ;;  %v4487_v40 = vld [vmem:[%s9551_s14 + $0x28] sm:$0xff] }
0x3318   :  { %v4486_v42 = vld [vmem:[%s9551_s14 + $0x20] sm:$0xff]  ;;  %v4485_v43 = vld [vmem:[%s9551_s14 + $0x18] sm:$0xff]  ;;  %v4483_v52 = vld [vmem:[%s9551_s14 + $0x8] sm:$0xff] }
0x3319   :  { %v4482_v53 = vld [vmem:[%s9551_s14] sm:$0xff] }
0x3378   :  { %v5774_v54 = vpop.xlane.xlu0 %5773 }
0x3379   :  { %v5775_v55 = vsub.f32 %v5768_v25, %v5774_v54  ;;  %v6487_v54 = vld [vmem:[#allocation44] ss:$0 sm:$0xff] }
0x337b   :  { %v5776_v30 = vmul.f32 1.442695, %v5775_v55 }
0x337c   :  { %v5541_v56 = vpop.xlane.xlu0 %5540 }
0x337d   :  { %7429 = vpow2.f32 %v5776_v30 }
0x337e   :  { %7431 = vrcp.f32 %v5541_v56 }
0x3380   :  { %v5365_v57 = vpop.permute.xlu0 %5364 }
0x3381   :  { %v5371_v58 = vsel %vm813_vm5, %v5365_v57, %v5368_v24  ;;  %v6489_v57 = vld [vmem:[#allocation46] ss:$0 sm:$0xff] }
0x3382   :  { %7177 = vmatpush3.xpose.msk.msra.mxu0 %vm1027_vm9, %v5371_v58 }
0x3383   :  { %7178 = vmatprep.subr.mxu0 %v8265_v1 }
0x3384   :  { %v5377_v3 = vpop.permute.xlu0 %5376 }
0x3386   :  { %7179 = vmatpush3.xpose.msk.msra.mxu0 %vm1027_vm9, %v5370_v61 }
0x3387   :  { %7193 = vmatprep.subr.mxu0 %v8265_v1 }
0x3388   :  { %v5374_v8 = vpop.permute.xlu0 %5373 }
0x3389   :  { %v5382_v9 = vsel %vm813_vm5, %v5360_v34, %v5374_v8  ;;  %v6163_v8 = vld [vmem:[#allocation50 + $0x10] sm:$0xff] }
0x338a   :  { %v7430_v62 = vpop.eup %7429 }
0x338b   :  { %v7432_v63 = vpop.eup %7431  ;;  %v5778_v0 = vsel %vm1027_vm9, %v7430_v62, 0.0 }
0x338c   :  { %5779 = vadd.xlane.f32.xlu1 %v5778_v0  ;;  %v5543_v2 = vmul.f32 %v7432_v63, %v7428_v51  ;;  %v4484_v51 = vld [vmem:[%s9551_s14 + $0x10] sm:$0xff] }
0x338e   :  { %7181 = vmatmul.mubr.msk.f32.vlgmr.msra.gmra.mxu0 %vm1027_vm9, %v5543_v2 }
0x338f   :  { %7197 = vmatprep.mubr.msk.f32.mxu0 %vm8266_vm1, %v8265_v1 }
0x339d   :  { %5379 = vrot.lane.b32.xlu1 %v5345_v45, %s8269_s23  ;;  %s6252_s23 = sshll.u32 %s8272_s9, 4  ;;  %s6253_s23 = int_to_ptr.vmem [resolvable:$true] %s6252_s23 }
0x339e   :  { %p8105_p12 = scmp.lt.s32.totalorder %s6253_s23, %s6253_s23 }
0x3415   :  { %v5780_v4 = vpop.xlane.xlu1 %5779 }
0x3416   :  { %7433 = vrcp.f32 %v5780_v4 }
0x3419   :  { %v5380_v5 = vpop.permute.xlu1 %5379 }
0x341a   :  { %v5383_v6 = vsel %vm813_vm5, %v5377_v3, %v5380_v5 }
0x341b   :  { %7194 = vmatpush3.xpose.msk.msra.mxu0 %vm1027_vm9, %v5383_v6  ;;  %v6164_v6 = vld [vmem:[#allocation50 + $0x18] sm:$0xff] }
0x341c   :  { %7195 = vmatprep.subr.mxu0 %v8265_v1 }
0x341f   :  { %7196 = vmatpush3.xpose.msk.msra.mxu0 %vm1027_vm9, %v5382_v9  ;;  %v6162_v9 = vld [vmem:[#allocation50 + $0x8] sm:$0xff] }
0x3420   :  { %7211 = vmatprep.subr.mxu0 %v8265_v1 }
0x3423   :  { %v7434_v10 = vpop.eup %7433 }
0x3424   :  { %v5782_v11 = vmul.f32 %v7434_v10, %v7430_v62  ;;  %v6161_v10 = vld [vmem:[#allocation50] sm:$0xff] }
0x3426   :  { %7198 = vmatmul.mubr.msk.f32.vlgmr.msra.gmra.mxu0 %vm1027_vm9, %v5782_v11 }
0x3427   :  { %7219 = vmatprep.mubr.msk.f32.mxu0 %vm8266_vm1, %v8265_v1  ;;  %7212 = vmatpush3.msra.mxu0 %v4480_v35 }
0x3428   :  { %7213 = vmatprep.subr.mxu0 %v8265_v1 }
0x3429   :  { %7214 = vmatpush3.msra.mxu0 %v4479_v36 }
0x342a   :  { %7215 = vmatprep.subr.mxu0 %v8265_v1 }
0x344e   :  { %v5619_v7 = vpop.f32.mrf.mxu0 }
0x3450   :  { %v7182_v12 = vpop.f32.mrf.mxu0 }
0x34e6   :  { %v5858_v17 = vpop.f32.mrf.mxu0 }
0x34e7   :  { %5863 = vrot.lane.b32.xlu1 %v5858_v17, %s8271_s28  ;;  %s8100_s28 = scalar_lea.vmem %s6253_s23, 128 }
0x34e8   :  { %v7199_v60 = vpop.f32.mrf.mxu0  ;;  %p8101_p11 = scmp.ne.s32.totalorder %s6253_s23, %s8100_s28  ;;  %p8106_p13 = scmp.lt.s32.totalorder %s8100_s28, %s8100_s28 }
0x34ea   :  { %p8107_p0 = por %p8106_p13, %p8105_p12 }
0x34ec   :  { %p8108_p1 = pnand %p8107_p0, %p8101_p11 }
0x3559   :  { %v5864_v18 = vpop.permute.xlu1 %5863 }
0x355a   :  { %v5866_v19 = vsel %vm1519_vm10, %v5619_v7, %v5864_v18  ;;  %v6493_v18 = vld [vmem:[#allocation52] ss:$0 sm:$0xff] }
0x355b   :  { %7209 = vmatmul.mubr.msk.f32.vlgmr.msra.gmra.mxu1 %vm928_vm4, %v5866_v19 }
0x355c   :  { %7238 = vmatprep.mubr.msk.f32.mxu1 %vm8266_vm1, %v8265_v1  ;;  %7223 = vmatpush3.msra.mxu1 %v4489_v38 }
0x355d   :  { %7224 = vmatprep.subr.mxu1 %v8265_v1 }
0x355e   :  { %7225 = vmatpush3.msra.mxu1 %v4488_v39 }
0x355f   :  { %7226 = vmatprep.subr.mxu1 %v8265_v1 }
0x3560   :  { %7227 = vmatpush3.msra.mxu1 %v4487_v40 }
0x3561   :  { %7228 = vmatprep.subr.mxu1 %v8265_v1 }
0x3562   :  { %7229 = vmatpush3.msra.mxu1 %v4486_v42 }
0x3563   :  { %7230 = vmatprep.subr.mxu1 %v8265_v1 }
0x3564   :  { %7231 = vmatpush3.msra.mxu1 %v4485_v43 }
0x3565   :  { %7232 = vmatprep.subr.mxu1 %v8265_v1 }
0x3566   :  { %7233 = vmatpush3.msra.mxu1 %v4484_v51 }
0x3567   :  { %7234 = vmatprep.subr.mxu1 %v8265_v1 }
0x3568   :  { %7235 = vmatpush3.msra.mxu1 %v4483_v52 }
0x3569   :  { %7236 = vmatprep.subr.mxu1 %v8265_v1 }
0x356a   :  { %7237 = vmatpush3.msra.mxu1 %v4482_v53 }
0x361b   :  { %v5942_v21 = vpop.f32.mrf.mxu1 }
0x361c   :  { %v5943_v22 = vadd.f32 %v6483_v20, %v5942_v21 }
0x361d   :  { %v7210_v23 = vpop.f32.mrf.mxu1 }
0x361e   :  { %v5946_v26 = vadd.f32 %v5943_v22, %v9327_v33  ;;  %v4478_v33 = vld [vmem:[#allocation43 + $0x8] sm:$0xff] }
0x361f   :  { %7216 = vmatpush3.msra.mxu0 %v4478_v33 }
0x3620   :  { %v5947_v41 = vsel %vm928_vm4, %v5946_v26, 0.0  ;;  %7217 = vmatprep.subr.mxu0 %v8265_v1 }
0x3621   :  { %5948 = vadd.xlane.f32.xlu0 %v5947_v41  ;;  %7218 = vmatpush3.msra.mxu0 %v4477_v37 }
0x3622   :  { %7241 = vmatprep.subr.mxu0 %v8265_v1 }
0x36aa   :  { %v5949_v27 = vpop.xlane.xlu0 %5948 }
0x36ab   :  { %v5950_v28 = vmul.f32 0.03125, %v5949_v27 }
0x36ad   :  { %v5951_v29 = vsub.f32 %v5946_v26, %v5950_v28 }
0x36af   :  { %v5952_v31 = vmul.f32 %v5951_v29, %v5951_v29 }
0x36b1   :  { %v5953_v32 = vsel %vm928_vm4, %v5952_v31, 0.0 }
0x36b2   :  { %5954 = vadd.xlane.f32.xlu1 %v5953_v32 }
0x373b   :  { %v5955_v44 = vpop.xlane.xlu1 %5954 }
0x373c   :  { %v5956_v46 = vmul.f32 0.03125, %v5955_v44 }
0x373e   :  { %v5957_v45 = vadd.f32 1e-05, %v5956_v46 }
0x3740   :  { %7435 = vrsqrt.f32 %v5957_v45 }
0x374d   :  { %v7436_v34 = vpop.eup %7435 }
0x374e   :  { %v5959_v48 = vmul.f32 %v7436_v34, %v5951_v29 }
0x3750   :  { %v5966_v25 = vmul.f32 %v6485_v47, %v5959_v48 }
0x3752   :  { %v5973_v50 = vadd.f32 %v6486_v49, %v5966_v25 }
0x3754   :  { %7220 = vmatmul.mubr.msk.f32.vlgmr.msra.gmra.mxu0 %vm928_vm4, %v5973_v50 }
0x3755   :  { %7249 = vmatprep.mubr.msk.f32.mxu0 %vm8266_vm1, %v8265_v1  ;;  %7242 = vmatpush3.msra.mxu0 %v6164_v6 }
0x3756   :  { %7243 = vmatprep.subr.mxu0 %v8265_v1 }
0x3757   :  { %7244 = vmatpush3.msra.mxu0 %v6163_v8 }
0x3758   :  { %7245 = vmatprep.subr.mxu0 %v8265_v1 }
0x3759   :  { %7246 = vmatpush3.msra.mxu0 %v6162_v9 }
0x375a   :  { %7247 = vmatprep.subr.mxu0 %v8265_v1 }
0x375b   :  { %7248 = vmatpush3.msra.mxu0 %v6161_v10 }
0x3814   :  { %v6049_v55 = vpop.f32.mrf.mxu0 }
0x3815   :  { %v6050_v30 = vadd.f32 %v6487_v54, %v6049_v55 }
0x3816   :  { %v7221_v24 = vpop.f32.mrf.mxu0 }
0x3817   :  { %v6053_v56 = vmax.f32 %v6050_v30, 0.0 }
0x3819   :  { %7239 = vmatmul.mubr.msk.f32.vlgmr.msra.gmra.mxu1 %vm1715_vm11, %v6053_v56 }
0x38d9   :  { %v6129_v58 = vpop.f32.mrf.mxu1 }
0x38da   :  { %v6130_v59 = vadd.f32 %v6489_v57, %v6129_v58 }
0x38db   :  { %v7240_v61 = vpop.f32.mrf.mxu1 }
0x38dc   :  { %v6133_v62 = vadd.f32 %v6130_v59, %v5973_v50 }
0x38de   :  { %v6134_v63 = vsel %vm928_vm4, %v6133_v62, 0.0 }
0x38df   :  { %6135 = vadd.xlane.f32.xlu0 %v6134_v63 }
0x3968   :  { %v6136_v0 = vpop.xlane.xlu0 %6135 }
0x3969   :  { %v6137_v2 = vmul.f32 0.03125, %v6136_v0 }
0x396b   :  { %v6138_v3 = vsub.f32 %v6133_v62, %v6137_v2 }
0x396d   :  { %v6139_v4 = vmul.f32 %v6138_v3, %v6138_v3 }
0x396f   :  { %v6140_v5 = vsel %vm928_vm4, %v6139_v4, 0.0 }
0x3970   :  { %6141 = vadd.xlane.f32.xlu0 %v6140_v5 }
0x39f9   :  { %v6142_v11 = vpop.xlane.xlu0 %6141 }
0x39fa   :  { %v6143_v7 = vmul.f32 0.03125, %v6142_v11 }
0x39fc   :  { %v6144_v12 = vadd.f32 1e-05, %v6143_v7 }
0x39fe   :  { %7437 = vrsqrt.f32 %v6144_v12 }
0x3a0b   :  { %v7438_v13 = vpop.eup %7437 }
0x3a0c   :  { %v6146_v15 = vmul.f32 %v7438_v13, %v6138_v3 }
0x3a0e   :  { %v6153_v17 = vmul.f32 %v6491_v14, %v6146_v15 }
0x3a10   :  { %v6160_v60 = vadd.f32 %v6492_v16, %v6153_v17 }
0x3a12   :  { %7250 = vmatmul.mubr.msk.f32.vlgmr.msra.gmra.mxu0 %vm928_vm4, %v6160_v60 }
0x3ad2   :  { %v6241_v19 = vpop.f32.mrf.mxu0 }
0x3ad3   :  { %v6242_v20 = vadd.f32 %v6493_v18, %v6241_v19 }
0x3ad4   :  { %v7251_v1 = vpop.f32.mrf.mxu0 }
0x3ad5   :  { %6245 = vst [vmem:[#allocation53] sm:$0xff] %v6242_v20 }
0x3ad6   :  { %8111 = shalt.err (!%p8108_p1)
}
0x3ad7   :  { %6255 = dma.vmem_to_hbm [thread:$0]  %s6253_s23, 128, %s8646_s5, [#allocation4]  }
0x3ad8   :  { %8154 = dma.done.wait [#allocation4], 128  }
0x3ad9   :  { %8155 = vsyncadd [#allocation4], 4294967168 }
0x3ada   :  { %6259 = vsyncpa [#allocation3], 1 }
0x3adb   :  { %6260 = vsyncpa [#allocation6], 1 }
0x3adc   :  { %6261 = vsyncpa [#allocation9], 1 }
0x3add   :  { %6262 = vsyncpa [#allocation12], 1 }
0x3ade   :  { %6263 = vsyncpa [#allocation15], 1 }
0x3adf   :  { %6264 = vsyncpa [#allocation18], 1 }
0x3ae0   :  { %6265 = vsyncpa [#allocation21], 1 }
0x3ae1   :  { %6266 = vsyncpa [#allocation24], 1 }
0x3ae2   :  { %6267 = vsyncpa [#allocation27], 1 }
0x3ae3   :  { %6268 = vsyncpa [#allocation30], 1 }
0x3ae4   :  { %6269 = vsyncpa [#allocation33], 1 }
0x3ae5   :  { %6270 = vsyncpa [#allocation36], 1 }
0x3ae6   :  { %6271 = vsyncpa [#allocation39], 1 }
0x3ae7   :  { %6272 = vsyncpa [#allocation42], 1 }
0x3ae8   :  { %6273 = vsyncpa [#allocation45], 1 }
0x3ae9   :  { %6274 = vsyncpa [#allocation48], 1 }
0x3aea   :  { %6275 = vsyncpa [#allocation51], 1 }
0x3aeb   :  { %6276 = vsyncpa [#allocation4], 1 }

</bundles_post_ra>
